<compile_context>
chip_gen: v7x
topology: tpu7x:2x2x1
jax: 0.10.0
libtpu: 0.0.40
codegen_flags: <defaults>
</compile_context>

<pallas_src>
import jax
import jax.numpy as jnp
from jax import lax
from jax.experimental import pallas as pl
from jax.experimental.pallas import tpu as pltpu

_EPS = 1e-5
_LANE = 128
MATMUL_DTYPE = jnp.bfloat16   # set to jnp.float32 for exact f32 numerics


def _round_up(v, m):
    return (v + m - 1) // m * m


# ---------------------- Fused MaxPool2x2 + DoubleConv kernel -----------------

def _down_fused_kernel(x_ref, w1_ref, w2_ref, shifts_ref, o_ref, p_pad, h_pad):
    # x_ref     : (1, Ho, 2, Wo, 2*Cin_p) f32  NHWC with H split into (Ho, 2)
    #             and the W pool pair folded onto the lane axis.
    # w1_ref    : (3, 3, Cin_p,  Cmid_p) MATMUL_DTYPE  HWIO, BN scale folded in
    # w2_ref    : (3, 3, Cmid_p, Cout_p) MATMUL_DTYPE
    # shifts_ref: (2, Cmax) f32   row 0 = conv1 shift, row 1 = conv2 shift
    # o_ref     : (1, Ho, Wo, Cout_p) f32
    # p_pad     : VMEM (Ho+2, Wo+2, Cin_p)  zero-halo pooled input
    # h_pad     : VMEM (Ho+2, Wo+2, Cmid_p) zero-halo conv1 activation
    _, Ho, _, Wo, two_cin = x_ref.shape
    Cin_p = two_cin // 2
    Cmid_p = w1_ref.shape[-1]
    Cout_p = o_ref.shape[-1]

    # ---- 2x2 max pool, fully in-register ------------------------------------
    # H pair: major-dim integer index.  W pair: aligned 128-lane slices.
    row_max = jnp.maximum(x_ref[0, :, 0, :, :], x_ref[0, :, 1, :, :])
    pooled = jnp.maximum(row_max[:, :, :Cin_p], row_max[:, :, Cin_p:])  # (Ho,Wo,Cin_p)

    # ---- zero ONLY the 1-pixel halo border (interior is overwritten) --------
    def _zero_border(ref, c):
        hp, wp = Ho + 2, Wo + 2
        ref[0:1, :, :] = jnp.zeros((1, wp, c), ref.dtype)
        ref[hp - 1:hp, :, :] = jnp.zeros((1, wp, c), ref.dtype)
        ref[:, 0:1, :] = jnp.zeros((hp, 1, c), ref.dtype)
        ref[:, wp - 1:wp, :] = jnp.zeros((hp, 1, c), ref.dtype)

    _zero_border(p_pad, Cin_p)
    _zero_border(h_pad, Cmid_p)

    p_pad[1:Ho + 1, 1:Wo + 1, :] = pooled.astype(p_pad.dtype)

    def _conv3x3(src_pad, w_ref, cin, cout):
        # 9 MXU matmuls accumulated in f32; the reshape is layout-free since
        # Wo % 8 == 0 and cin % 128 == 0 (sublane/lane tiles preserved).
        acc = jnp.zeros((Ho * Wo, cout), jnp.float32)
        for dh in range(3):
            for dw in range(3):
                patch = src_pad[dh:dh + Ho, dw:dw + Wo, :]
                acc = acc + jnp.dot(patch.reshape(Ho * Wo, cin), w_ref[dh, dw],
                                    preferred_element_type=jnp.float32)
        return acc

    # ---- conv1 3x3 (pad=1) + folded BN + ReLU --------------------------------
    acc1 = _conv3x3(p_pad, w1_ref, Cin_p, Cmid_p)
    y1 = jnp.maximum(acc1 + shifts_ref[0:1, :Cmid_p], 0.0)
    h_pad[1:Ho + 1, 1:Wo + 1, :] = y1.reshape(Ho, Wo, Cmid_p).astype(h_pad.dtype)

    # ---- conv2 3x3 (pad=1) + folded BN + ReLU -> output ----------------------
    acc2 = _conv3x3(h_pad, w2_ref, Cmid_p, Cout_p)
    y2 = jnp.maximum(acc2 + shifts_ref[1:2, :Cout_p], 0.0)
    o_ref[0] = y2.reshape(Ho, Wo, Cout_p).astype(o_ref.dtype)


# ------------------------------- parameters ----------------------------------

def init_down_params(key, in_channels, out_channels):
    mid = out_channels  # DoubleConv default: mid_channels = out_channels
    ks = jax.random.split(key, 12)

    def conv_init(kw, kb, cin, cout):
        bound = 1.0 / jnp.sqrt(cin * 9.0)
        w = jax.random.uniform(kw, (3, 3, cin, cout), jnp.float32, -bound, bound)
        b = jax.random.uniform(kb, (cout,), jnp.float32, -bound, bound)
        return w, b

    def bn_init(kg, kb, km, kv, c):
        return dict(
            gamma=jax.random.uniform(kg, (c,), jnp.float32, 0.5, 1.5),
            beta=0.1 * jax.random.normal(kb, (c,), jnp.float32),
            mean=0.1 * jax.random.normal(km, (c,), jnp.float32),
            var=jax.random.uniform(kv, (c,), jnp.float32, 0.5, 1.5),
        )

    w1, b1 = conv_init(ks[0], ks[1], in_channels, mid)
    bn1 = bn_init(ks[2], ks[3], ks[4], ks[5], mid)
    w2, b2 = conv_init(ks[6], ks[7], mid, out_channels)
    bn2 = bn_init(ks[8], ks[9], ks[10], ks[11], out_channels)
    return dict(conv1_w=w1, conv1_b=b1, bn1=bn1,
                conv2_w=w2, conv2_b=b2, bn2=bn2)


def _fold_bn(conv_b, bn):
    scale = bn["gamma"] / jnp.sqrt(bn["var"] + _EPS)
    shift = bn["beta"] + (conv_b - bn["mean"]) * scale
    return scale, shift


def _prepare_folded_weights(p):
    """Fold BN scale into the conv weights (then cast to MATMUL_DTYPE) and
    return the per-channel additive shifts.  Shared by the kernel wrapper and
    the reference so both apply the identical precision policy."""
    s1, sh1 = _fold_bn(p["conv1_b"], p["bn1"])
    s2, sh2 = _fold_bn(p["conv2_b"], p["bn2"])
    w1 = (p["conv1_w"] * s1).astype(MATMUL_DTYPE)
    w2 = (p["conv2_w"] * s2).astype(MATMUL_DTYPE)
    return w1, w2, sh1, sh2


# ------------------------------- Down forward --------------------------------

@jax.jit
def down_forward(x_nchw, params):
    N, Cin, H, W = x_nchw.shape
    Ho, Wo = H // 2, W // 2                       # floor, like nn.MaxPool2d(2)
    Cmid = params["conv1_w"].shape[-1]
    Cout = params["conv2_w"].shape[-1]

    Cin_p = _round_up(Cin, _LANE)
    Cmid_p = _round_up(Cmid, _LANE)
    Cout_p = _round_up(Cout, _LANE)
    Cmax = max(Cmid_p, Cout_p)

    w1, w2, sh1, sh2 = _prepare_folded_weights(params)
    w1 = jnp.pad(w1, ((0, 0), (0, 0), (0, Cin_p - Cin), (0, Cmid_p - Cmid)))
    w2 = jnp.pad(w2, ((0, 0), (0, 0), (0, Cmid_p - Cmid), (0, Cout_p - Cout)))
    shifts = jnp.stack([jnp.pad(sh1, (0, Cmax - Cmid)),
                        jnp.pad(sh2, (0, Cmax - Cout))]).astype(jnp.float32)

    # Single fused XLA relayout pass (the unavoidable NCHW->NHWC transpose +
    # lane pad); the trailing reshape only re-labels dims: H -> (Ho, 2) and the
    # (2, Cin_p) W-pool pair -> the lane axis.  No pool-tap regroup pass.
    x = jnp.transpose(x_nchw[:, :, :2 * Ho, :2 * Wo], (0, 2, 3, 1))
    x = jnp.pad(x, ((0, 0), (0, 0), (0, 0), (0, Cin_p - Cin)))
    x = x.reshape(N, Ho, 2, Wo, 2 * Cin_p)

    out_p = pl.pallas_call(
        _down_fused_kernel,
        out_shape=jax.ShapeDtypeStruct((N, Ho, Wo, Cout_p), x_nchw.dtype),
        grid=(N,),
        in_specs=[
            pl.BlockSpec((1, Ho, 2, Wo, 2 * Cin_p), lambda n: (n, 0, 0, 0, 0)),
            pl.BlockSpec((3, 3, Cin_p, Cmid_p), lambda n: (0, 0, 0, 0)),
            pl.BlockSpec((3, 3, Cmid_p, Cout_p), lambda n: (0, 0, 0, 0)),
            pl.BlockSpec((2, Cmax), lambda n: (0, 0)),
        ],
        out_specs=pl.BlockSpec((1, Ho, Wo, Cout_p), lambda n: (n, 0, 0, 0)),
        scratch_shapes=[
            pltpu.VMEM((Ho + 2, Wo + 2, Cin_p), MATMUL_DTYPE),
            pltpu.VMEM((Ho + 2, Wo + 2, Cmid_p), MATMUL_DTYPE),
        ],
        compiler_params=pltpu.CompilerParams(
            dimension_semantics=("parallel",),
            vmem_limit_bytes=32 * 1024 * 1024),
    )(x, w1, w2, shifts)

    out = out_p[:, :, :, :Cout]                   # drop lane padding
    return jnp.transpose(out, (0, 3, 1, 2))       # NHWC -> NCHW


# -------------------------------- Reference -----------------------------------

def down_reference(x_nchw, params):
    """Pure-JAX reference with the SAME precision policy as the kernel
    (f32 pool / accumulate / BN+ReLU, MATMUL_DTYPE conv operands), so the
    comparison is tight.  Drift vs an all-f32 PyTorch forward is only the
    usual bf16-operand rounding (set MATMUL_DTYPE = jnp.float32 to remove)."""
    N, Cin, H, W = x_nchw.shape
    Ho, Wo = H // 2, W // 2
    x = jnp.transpose(x_nchw[:, :, :2 * Ho, :2 * Wo], (0, 2, 3, 1))
    x = lax.reduce_window(x, -jnp.inf, lax.max,
                          (1, 2, 2, 1), (1, 2, 2, 1), "VALID")
    w1, w2, sh1, sh2 = _prepare_folded_weights(params)

    def conv_shift_relu(h, w, shift):
        y = lax.conv_general_dilated(
            h.astype(MATMUL_DTYPE), w, (1, 1), "SAME",
            dimension_numbers=("NHWC", "HWIO", "NHWC"),
            preferred_element_type=jnp.float32)
        return jnp.maximum(y + shift, 0.0)

    y1 = conv_shift_relu(x, w1, sh1)
    y2 = conv_shift_relu(y1, w2, sh2)
    return jnp.transpose(y2, (0, 3, 1, 2)).astype(x_nchw.dtype)


# ----------------------------------- main --------------------------------------

if __name__ == "__main__":
    key = jax.random.PRNGKey(0)
    kx, kp = jax.random.split(key)

    N, C_in, H, W = 2, 4, 16, 16
    C_out = 8

    x = jax.random.normal(kx, (N, C_in, H, W), jnp.float32)
    params = init_down_params(kp, C_in, C_out)

    out = jax.block_until_ready(down_forward(x, params))
    assert out.shape == (N, C_out, H // 2, W // 2), out.shape

    ref = jax.block_until_ready(down_reference(x, params))
    if not jnp.allclose(out, ref, atol=5e-3, rtol=5e-3):
        raise AssertionError(
            f"mismatch vs reference, max abs err = {jnp.max(jnp.abs(out - ref))}")

    print("KERNEL_OK")
</pallas_src>

<mosaic_0001>
module attributes {stable_mosaic.version = 11 : i64} {
  func.func @_down_fused_kernel(%arg0: i32, %arg1: memref<1x8x2x8x256xf32, #tpu.memory_space<vmem>>, %arg2: memref<3x3x128x128xbf16, #tpu.memory_space<vmem>>, %arg3: memref<3x3x128x128xbf16, #tpu.memory_space<vmem>>, %arg4: memref<2x128xf32, #tpu.memory_space<vmem>>, %arg5: memref<1x8x8x128xf32, #tpu.memory_space<vmem>>, %arg6: memref<10x10x128xbf16, #tpu.memory_space<vmem>>, %arg7: memref<10x10x128xbf16, #tpu.memory_space<vmem>>) attributes {dimension_semantics = [#tpu.dimension_semantics<parallel>], iteration_bounds = array<i64: 2>, scalar_prefetch = 0 : i64, scratch_operands = 2 : i64, tpu.core_type = #tpu.core_type<tc>, window_params = [{transform_indices = @transform_0, window_bounds = array<i64: 1, 8, 2, 8, 256>}, {pipeline_mode = #tpu.pipeline_mode<synchronous>, transform_indices = @transform_1, window_bounds = array<i64: 3, 3, 128, 128>}, {pipeline_mode = #tpu.pipeline_mode<synchronous>, transform_indices = @transform_2, window_bounds = array<i64: 3, 3, 128, 128>}, {pipeline_mode = #tpu.pipeline_mode<synchronous>, transform_indices = @transform_3, window_bounds = array<i64: 2, 128>}, {transform_indices = @transform_4, window_bounds = array<i64: 1, 8, 8, 128>}]} {
    %c0 = arith.constant 0 : index
    %c0_0 = arith.constant 0 : index
    %c0_1 = arith.constant 0 : index
    %c0_2 = arith.constant 0 : index
    %c0_3 = arith.constant 0 : index
    %0 = vector.load %arg1[%c0, %c0_0, %c0_1, %c0_2, %c0_3] : memref<1x8x2x8x256xf32, #tpu.memory_space<vmem>>, vector<1x8x1x8x256xf32>
    %1 = vector.shape_cast %0 : vector<1x8x1x8x256xf32> to vector<8x8x256xf32>
    %c0_4 = arith.constant 0 : index
    %c0_5 = arith.constant 0 : index
    %c1 = arith.constant 1 : index
    %c0_6 = arith.constant 0 : index
    %c0_7 = arith.constant 0 : index
    %2 = vector.load %arg1[%c0_4, %c0_5, %c1, %c0_6, %c0_7] : memref<1x8x2x8x256xf32, #tpu.memory_space<vmem>>, vector<1x8x1x8x256xf32>
    %3 = vector.shape_cast %2 : vector<1x8x1x8x256xf32> to vector<8x8x256xf32>
    %4 = arith.maximumf %1, %3 : vector<8x8x256xf32>
    %5 = vector.extract_strided_slice %4 {offsets = [0, 0, 0], sizes = [8, 8, 128], strides = [1, 1, 1]} : vector<8x8x256xf32> to vector<8x8x128xf32>
    %6 = vector.extract_strided_slice %4 {offsets = [0, 0, 128], sizes = [8, 8, 128], strides = [1, 1, 1]} : vector<8x8x256xf32> to vector<8x8x128xf32>
    %7 = arith.maximumf %5, %6 : vector<8x8x128xf32>
    %cst = arith.constant 0.000000e+00 : bf16
    %8 = vector.broadcast %cst : bf16 to vector<1x10x128xbf16>
    %c0_8 = arith.constant 0 : index
    %c0_9 = arith.constant 0 : index
    %c0_10 = arith.constant 0 : index
    %9 = vector.load %arg6[%c0_8, %c0_9, %c0_10] : memref<10x10x128xbf16, #tpu.memory_space<vmem>>, vector<1x10x128xbf16>
    tpu.vector_store %arg6[%c0_8, %c0_9, %c0_10], %8 {strides = array<i32>} : memref<10x10x128xbf16, #tpu.memory_space<vmem>>, vector<1x10x128xbf16>,
    %cst_11 = arith.constant 0.000000e+00 : bf16
    %10 = vector.broadcast %cst_11 : bf16 to vector<1x10x128xbf16>
    %c9 = arith.constant 9 : index
    %c0_12 = arith.constant 0 : index
    %c0_13 = arith.constant 0 : index
    %11 = vector.load %arg6[%c9, %c0_12, %c0_13] : memref<10x10x128xbf16, #tpu.memory_space<vmem>>, vector<1x10x128xbf16>
    tpu.vector_store %arg6[%c9, %c0_12, %c0_13], %10 {strides = array<i32>} : memref<10x10x128xbf16, #tpu.memory_space<vmem>>, vector<1x10x128xbf16>,
    %cst_14 = arith.constant 0.000000e+00 : bf16
    %12 = vector.broadcast %cst_14 : bf16 to vector<10x1x128xbf16>
    %c0_15 = arith.constant 0 : index
    %c0_16 = arith.constant 0 : index
    %c0_17 = arith.constant 0 : index
    %13 = vector.load %arg6[%c0_15, %c0_16, %c0_17] : memref<10x10x128xbf16, #tpu.memory_space<vmem>>, vector<10x1x128xbf16>
    tpu.vector_store %arg6[%c0_15, %c0_16, %c0_17], %12 {strides = array<i32>} : memref<10x10x128xbf16, #tpu.memory_space<vmem>>, vector<10x1x128xbf16>,
    %cst_18 = arith.constant 0.000000e+00 : bf16
    %14 = vector.broadcast %cst_18 : bf16 to vector<10x1x128xbf16>
    %c0_19 = arith.constant 0 : index
    %c9_20 = arith.constant 9 : index
    %c0_21 = arith.constant 0 : index
    %15 = vector.load %arg6[%c0_19, %c9_20, %c0_21] : memref<10x10x128xbf16, #tpu.memory_space<vmem>>, vector<10x1x128xbf16>
    tpu.vector_store %arg6[%c0_19, %c9_20, %c0_21], %14 {strides = array<i32>} : memref<10x10x128xbf16, #tpu.memory_space<vmem>>, vector<10x1x128xbf16>,
    %cst_22 = arith.constant 0.000000e+00 : bf16
    %16 = vector.broadcast %cst_22 : bf16 to vector<1x10x128xbf16>
    %c0_23 = arith.constant 0 : index
    %c0_24 = arith.constant 0 : index
    %c0_25 = arith.constant 0 : index
    %17 = vector.load %arg7[%c0_23, %c0_24, %c0_25] : memref<10x10x128xbf16, #tpu.memory_space<vmem>>, vector<1x10x128xbf16>
    tpu.vector_store %arg7[%c0_23, %c0_24, %c0_25], %16 {strides = array<i32>} : memref<10x10x128xbf16, #tpu.memory_space<vmem>>, vector<1x10x128xbf16>,
    %cst_26 = arith.constant 0.000000e+00 : bf16
    %18 = vector.broadcast %cst_26 : bf16 to vector<1x10x128xbf16>
    %c9_27 = arith.constant 9 : index
    %c0_28 = arith.constant 0 : index
    %c0_29 = arith.constant 0 : index
    %19 = vector.load %arg7[%c9_27, %c0_28, %c0_29] : memref<10x10x128xbf16, #tpu.memory_space<vmem>>, vector<1x10x128xbf16>
    tpu.vector_store %arg7[%c9_27, %c0_28, %c0_29], %18 {strides = array<i32>} : memref<10x10x128xbf16, #tpu.memory_space<vmem>>, vector<1x10x128xbf16>,
    %cst_30 = arith.constant 0.000000e+00 : bf16
    %20 = vector.broadcast %cst_30 : bf16 to vector<10x1x128xbf16>
    %c0_31 = arith.constant 0 : index
    %c0_32 = arith.constant 0 : index
    %c0_33 = arith.constant 0 : index
    %21 = vector.load %arg7[%c0_31, %c0_32, %c0_33] : memref<10x10x128xbf16, #tpu.memory_space<vmem>>, vector<10x1x128xbf16>
    tpu.vector_store %arg7[%c0_31, %c0_32, %c0_33], %20 {strides = array<i32>} : memref<10x10x128xbf16, #tpu.memory_space<vmem>>, vector<10x1x128xbf16>,
    %cst_34 = arith.constant 0.000000e+00 : bf16
    %22 = vector.broadcast %cst_34 : bf16 to vector<10x1x128xbf16>
    %c0_35 = arith.constant 0 : index
    %c9_36 = arith.constant 9 : index
    %c0_37 = arith.constant 0 : index
    %23 = vector.load %arg7[%c0_35, %c9_36, %c0_37] : memref<10x10x128xbf16, #tpu.memory_space<vmem>>, vector<10x1x128xbf16>
    tpu.vector_store %arg7[%c0_35, %c9_36, %c0_37], %22 {strides = array<i32>} : memref<10x10x128xbf16, #tpu.memory_space<vmem>>, vector<10x1x128xbf16>,
    %24 = arith.truncf %7 : vector<8x8x128xf32> to vector<8x8x128xbf16>
    %c1_38 = arith.constant 1 : index
    %c1_39 = arith.constant 1 : index
    %c0_40 = arith.constant 0 : index
    %25 = vector.load %arg6[%c1_38, %c1_39, %c0_40] : memref<10x10x128xbf16, #tpu.memory_space<vmem>>, vector<8x8x128xbf16>
    tpu.vector_store %arg6[%c1_38, %c1_39, %c0_40], %24 {strides = array<i32>} : memref<10x10x128xbf16, #tpu.memory_space<vmem>>, vector<8x8x128xbf16>,
    %cst_41 = arith.constant 0.000000e+00 : f32
    %26 = vector.broadcast %cst_41 : f32 to vector<64x128xf32>
    %c0_42 = arith.constant 0 : index
    %c0_43 = arith.constant 0 : index
    %c0_44 = arith.constant 0 : index
    %27 = vector.load %arg6[%c0_42, %c0_43, %c0_44] : memref<10x10x128xbf16, #tpu.memory_space<vmem>>, vector<8x8x128xbf16>
    %28 = vector.shape_cast %27 : vector<8x8x128xbf16> to vector<64x128xbf16>
    %c0_45 = arith.constant 0 : index
    %c0_46 = arith.constant 0 : index
    %c0_47 = arith.constant 0 : index
    %c0_48 = arith.constant 0 : index
    %29 = vector.load %arg2[%c0_45, %c0_46, %c0_47, %c0_48] : memref<3x3x128x128xbf16, #tpu.memory_space<vmem>>, vector<1x1x128x128xbf16>
    %30 = vector.shape_cast %29 : vector<1x1x128x128xbf16> to vector<128x128xbf16>
    %cst_49 = arith.constant dense<0.000000e+00> : vector<64x128xf32>
    %31 = tpu.matmul %28, %30, %cst_49 {dimension_numbers = #tpu.dot_dimension_numbers<[1], [0], [0], [1], [0, 0, 1, 1], [], []>} : vector<64x128xbf16>, vector<128x128xbf16>, vector<64x128xf32> -> vector<64x128xf32>
    %32 = arith.addf %26, %31 : vector<64x128xf32>
    %c0_50 = arith.constant 0 : index
    %c1_51 = arith.constant 1 : index
    %c0_52 = arith.constant 0 : index
    %33 = vector.load %arg6[%c0_50, %c1_51, %c0_52] : memref<10x10x128xbf16, #tpu.memory_space<vmem>>, vector<8x8x128xbf16>
    %34 = vector.shape_cast %33 : vector<8x8x128xbf16> to vector<64x128xbf16>
    %c0_53 = arith.constant 0 : index
    %c1_54 = arith.constant 1 : index
    %c0_55 = arith.constant 0 : index
    %c0_56 = arith.constant 0 : index
    %35 = vector.load %arg2[%c0_53, %c1_54, %c0_55, %c0_56] : memref<3x3x128x128xbf16, #tpu.memory_space<vmem>>, vector<1x1x128x128xbf16>
    %36 = vector.shape_cast %35 : vector<1x1x128x128xbf16> to vector<128x128xbf16>
    %cst_57 = arith.constant dense<0.000000e+00> : vector<64x128xf32>
    %37 = tpu.matmul %34, %36, %cst_57 {dimension_numbers = #tpu.dot_dimension_numbers<[1], [0], [0], [1], [0, 0, 1, 1], [], []>} : vector<64x128xbf16>, vector<128x128xbf16>, vector<64x128xf32> -> vector<64x128xf32>
    %38 = arith.addf %32, %37 : vector<64x128xf32>
    %c0_58 = arith.constant 0 : index
    %c2 = arith.constant 2 : index
    %c0_59 = arith.constant 0 : index
    %39 = vector.load %arg6[%c0_58, %c2, %c0_59] : memref<10x10x128xbf16, #tpu.memory_space<vmem>>, vector<8x8x128xbf16>
    %40 = vector.shape_cast %39 : vector<8x8x128xbf16> to vector<64x128xbf16>
    %c0_60 = arith.constant 0 : index
    %c2_61 = arith.constant 2 : index
    %c0_62 = arith.constant 0 : index
    %c0_63 = arith.constant 0 : index
    %41 = vector.load %arg2[%c0_60, %c2_61, %c0_62, %c0_63] : memref<3x3x128x128xbf16, #tpu.memory_space<vmem>>, vector<1x1x128x128xbf16>
    %42 = vector.shape_cast %41 : vector<1x1x128x128xbf16> to vector<128x128xbf16>
    %cst_64 = arith.constant dense<0.000000e+00> : vector<64x128xf32>
    %43 = tpu.matmul %40, %42, %cst_64 {dimension_numbers = #tpu.dot_dimension_numbers<[1], [0], [0], [1], [0, 0, 1, 1], [], []>} : vector<64x128xbf16>, vector<128x128xbf16>, vector<64x128xf32> -> vector<64x128xf32>
    %44 = arith.addf %38, %43 : vector<64x128xf32>
    %c1_65 = arith.constant 1 : index
    %c0_66 = arith.constant 0 : index
    %c0_67 = arith.constant 0 : index
    %45 = vector.load %arg6[%c1_65, %c0_66, %c0_67] : memref<10x10x128xbf16, #tpu.memory_space<vmem>>, vector<8x8x128xbf16>
    %46 = vector.shape_cast %45 : vector<8x8x128xbf16> to vector<64x128xbf16>
    %c1_68 = arith.constant 1 : index
    %c0_69 = arith.constant 0 : index
    %c0_70 = arith.constant 0 : index
    %c0_71 = arith.constant 0 : index
    %47 = vector.load %arg2[%c1_68, %c0_69, %c0_70, %c0_71] : memref<3x3x128x128xbf16, #tpu.memory_space<vmem>>, vector<1x1x128x128xbf16>
    %48 = vector.shape_cast %47 : vector<1x1x128x128xbf16> to vector<128x128xbf16>
    %cst_72 = arith.constant dense<0.000000e+00> : vector<64x128xf32>
    %49 = tpu.matmul %46, %48, %cst_72 {dimension_numbers = #tpu.dot_dimension_numbers<[1], [0], [0], [1], [0, 0, 1, 1], [], []>} : vector<64x128xbf16>, vector<128x128xbf16>, vector<64x128xf32> -> vector<64x128xf32>
    %50 = arith.addf %44, %49 : vector<64x128xf32>
    %c1_73 = arith.constant 1 : index
    %c1_74 = arith.constant 1 : index
    %c0_75 = arith.constant 0 : index
    %51 = vector.load %arg6[%c1_73, %c1_74, %c0_75] : memref<10x10x128xbf16, #tpu.memory_space<vmem>>, vector<8x8x128xbf16>
    %52 = vector.shape_cast %51 : vector<8x8x128xbf16> to vector<64x128xbf16>
    %c1_76 = arith.constant 1 : index
    %c1_77 = arith.constant 1 : index
    %c0_78 = arith.constant 0 : index
    %c0_79 = arith.constant 0 : index
    %53 = vector.load %arg2[%c1_76, %c1_77, %c0_78, %c0_79] : memref<3x3x128x128xbf16, #tpu.memory_space<vmem>>, vector<1x1x128x128xbf16>
    %54 = vector.shape_cast %53 : vector<1x1x128x128xbf16> to vector<128x128xbf16>
    %cst_80 = arith.constant dense<0.000000e+00> : vector<64x128xf32>
    %55 = tpu.matmul %52, %54, %cst_80 {dimension_numbers = #tpu.dot_dimension_numbers<[1], [0], [0], [1], [0, 0, 1, 1], [], []>} : vector<64x128xbf16>, vector<128x128xbf16>, vector<64x128xf32> -> vector<64x128xf32>
    %56 = arith.addf %50, %55 : vector<64x128xf32>
    %c1_81 = arith.constant 1 : index
    %c2_82 = arith.constant 2 : index
    %c0_83 = arith.constant 0 : index
    %57 = vector.load %arg6[%c1_81, %c2_82, %c0_83] : memref<10x10x128xbf16, #tpu.memory_space<vmem>>, vector<8x8x128xbf16>
    %58 = vector.shape_cast %57 : vector<8x8x128xbf16> to vector<64x128xbf16>
    %c1_84 = arith.constant 1 : index
    %c2_85 = arith.constant 2 : index
    %c0_86 = arith.constant 0 : index
    %c0_87 = arith.constant 0 : index
    %59 = vector.load %arg2[%c1_84, %c2_85, %c0_86, %c0_87] : memref<3x3x128x128xbf16, #tpu.memory_space<vmem>>, vector<1x1x128x128xbf16>
    %60 = vector.shape_cast %59 : vector<1x1x128x128xbf16> to vector<128x128xbf16>
    %cst_88 = arith.constant dense<0.000000e+00> : vector<64x128xf32>
    %61 = tpu.matmul %58, %60, %cst_88 {dimension_numbers = #tpu.dot_dimension_numbers<[1], [0], [0], [1], [0, 0, 1, 1], [], []>} : vector<64x128xbf16>, vector<128x128xbf16>, vector<64x128xf32> -> vector<64x128xf32>
    %62 = arith.addf %56, %61 : vector<64x128xf32>
    %c2_89 = arith.constant 2 : index
    %c0_90 = arith.constant 0 : index
    %c0_91 = arith.constant 0 : index
    %63 = vector.load %arg6[%c2_89, %c0_90, %c0_91] : memref<10x10x128xbf16, #tpu.memory_space<vmem>>, vector<8x8x128xbf16>
    %64 = vector.shape_cast %63 : vector<8x8x128xbf16> to vector<64x128xbf16>
    %c2_92 = arith.constant 2 : index
    %c0_93 = arith.constant 0 : index
    %c0_94 = arith.constant 0 : index
    %c0_95 = arith.constant 0 : index
    %65 = vector.load %arg2[%c2_92, %c0_93, %c0_94, %c0_95] : memref<3x3x128x128xbf16, #tpu.memory_space<vmem>>, vector<1x1x128x128xbf16>
    %66 = vector.shape_cast %65 : vector<1x1x128x128xbf16> to vector<128x128xbf16>
    %cst_96 = arith.constant dense<0.000000e+00> : vector<64x128xf32>
    %67 = tpu.matmul %64, %66, %cst_96 {dimension_numbers = #tpu.dot_dimension_numbers<[1], [0], [0], [1], [0, 0, 1, 1], [], []>} : vector<64x128xbf16>, vector<128x128xbf16>, vector<64x128xf32> -> vector<64x128xf32>
    %68 = arith.addf %62, %67 : vector<64x128xf32>
    %c2_97 = arith.constant 2 : index
    %c1_98 = arith.constant 1 : index
    %c0_99 = arith.constant 0 : index
    %69 = vector.load %arg6[%c2_97, %c1_98, %c0_99] : memref<10x10x128xbf16, #tpu.memory_space<vmem>>, vector<8x8x128xbf16>
    %70 = vector.shape_cast %69 : vector<8x8x128xbf16> to vector<64x128xbf16>
    %c2_100 = arith.constant 2 : index
    %c1_101 = arith.constant 1 : index
    %c0_102 = arith.constant 0 : index
    %c0_103 = arith.constant 0 : index
    %71 = vector.load %arg2[%c2_100, %c1_101, %c0_102, %c0_103] : memref<3x3x128x128xbf16, #tpu.memory_space<vmem>>, vector<1x1x128x128xbf16>
    %72 = vector.shape_cast %71 : vector<1x1x128x128xbf16> to vector<128x128xbf16>
    %cst_104 = arith.constant dense<0.000000e+00> : vector<64x128xf32>
    %73 = tpu.matmul %70, %72, %cst_104 {dimension_numbers = #tpu.dot_dimension_numbers<[1], [0], [0], [1], [0, 0, 1, 1], [], []>} : vector<64x128xbf16>, vector<128x128xbf16>, vector<64x128xf32> -> vector<64x128xf32>
    %74 = arith.addf %68, %73 : vector<64x128xf32>
    %c2_105 = arith.constant 2 : index
    %c2_106 = arith.constant 2 : index
    %c0_107 = arith.constant 0 : index
    %75 = vector.load %arg6[%c2_105, %c2_106, %c0_107] : memref<10x10x128xbf16, #tpu.memory_space<vmem>>, vector<8x8x128xbf16>
    %76 = vector.shape_cast %75 : vector<8x8x128xbf16> to vector<64x128xbf16>
    %c2_108 = arith.constant 2 : index
    %c2_109 = arith.constant 2 : index
    %c0_110 = arith.constant 0 : index
    %c0_111 = arith.constant 0 : index
    %77 = vector.load %arg2[%c2_108, %c2_109, %c0_110, %c0_111] : memref<3x3x128x128xbf16, #tpu.memory_space<vmem>>, vector<1x1x128x128xbf16>
    %78 = vector.shape_cast %77 : vector<1x1x128x128xbf16> to vector<128x128xbf16>
    %cst_112 = arith.constant dense<0.000000e+00> : vector<64x128xf32>
    %79 = tpu.matmul %76, %78, %cst_112 {dimension_numbers = #tpu.dot_dimension_numbers<[1], [0], [0], [1], [0, 0, 1, 1], [], []>} : vector<64x128xbf16>, vector<128x128xbf16>, vector<64x128xf32> -> vector<64x128xf32>
    %80 = arith.addf %74, %79 : vector<64x128xf32>
    %c0_113 = arith.constant 0 : index
    %c0_114 = arith.constant 0 : index
    %81 = vector.load %arg4[%c0_113, %c0_114] : memref<2x128xf32, #tpu.memory_space<vmem>>, vector<1x128xf32>
    %82 = vector.broadcast %81 : vector<1x128xf32> to vector<64x128xf32>
    %83 = arith.addf %80, %82 : vector<64x128xf32>
    %cst_115 = arith.constant 0.000000e+00 : f32
    %84 = vector.broadcast %cst_115 : f32 to vector<64x128xf32>
    %85 = arith.maximumf %83, %84 : vector<64x128xf32>
    %86 = vector.shape_cast %85 : vector<64x128xf32> to vector<8x8x128xf32>
    %87 = arith.truncf %86 : vector<8x8x128xf32> to vector<8x8x128xbf16>
    %c1_116 = arith.constant 1 : index
    %c1_117 = arith.constant 1 : index
    %c0_118 = arith.constant 0 : index
    %88 = vector.load %arg7[%c1_116, %c1_117, %c0_118] : memref<10x10x128xbf16, #tpu.memory_space<vmem>>, vector<8x8x128xbf16>
    tpu.vector_store %arg7[%c1_116, %c1_117, %c0_118], %87 {strides = array<i32>} : memref<10x10x128xbf16, #tpu.memory_space<vmem>>, vector<8x8x128xbf16>,
    %cst_119 = arith.constant 0.000000e+00 : f32
    %89 = vector.broadcast %cst_119 : f32 to vector<64x128xf32>
    %c0_120 = arith.constant 0 : index
    %c0_121 = arith.constant 0 : index
    %c0_122 = arith.constant 0 : index
    %90 = vector.load %arg7[%c0_120, %c0_121, %c0_122] : memref<10x10x128xbf16, #tpu.memory_space<vmem>>, vector<8x8x128xbf16>
    %91 = vector.shape_cast %90 : vector<8x8x128xbf16> to vector<64x128xbf16>
    %c0_123 = arith.constant 0 : index
    %c0_124 = arith.constant 0 : index
    %c0_125 = arith.constant 0 : index
    %c0_126 = arith.constant 0 : index
    %92 = vector.load %arg3[%c0_123, %c0_124, %c0_125, %c0_126] : memref<3x3x128x128xbf16, #tpu.memory_space<vmem>>, vector<1x1x128x128xbf16>
    %93 = vector.shape_cast %92 : vector<1x1x128x128xbf16> to vector<128x128xbf16>
    %cst_127 = arith.constant dense<0.000000e+00> : vector<64x128xf32>
    %94 = tpu.matmul %91, %93, %cst_127 {dimension_numbers = #tpu.dot_dimension_numbers<[1], [0], [0], [1], [0, 0, 1, 1], [], []>} : vector<64x128xbf16>, vector<128x128xbf16>, vector<64x128xf32> -> vector<64x128xf32>
    %95 = arith.addf %89, %94 : vector<64x128xf32>
    %c0_128 = arith.constant 0 : index
    %c1_129 = arith.constant 1 : index
    %c0_130 = arith.constant 0 : index
    %96 = vector.load %arg7[%c0_128, %c1_129, %c0_130] : memref<10x10x128xbf16, #tpu.memory_space<vmem>>, vector<8x8x128xbf16>
    %97 = vector.shape_cast %96 : vector<8x8x128xbf16> to vector<64x128xbf16>
    %c0_131 = arith.constant 0 : index
    %c1_132 = arith.constant 1 : index
    %c0_133 = arith.constant 0 : index
    %c0_134 = arith.constant 0 : index
    %98 = vector.load %arg3[%c0_131, %c1_132, %c0_133, %c0_134] : memref<3x3x128x128xbf16, #tpu.memory_space<vmem>>, vector<1x1x128x128xbf16>
    %99 = vector.shape_cast %98 : vector<1x1x128x128xbf16> to vector<128x128xbf16>
    %cst_135 = arith.constant dense<0.000000e+00> : vector<64x128xf32>
    %100 = tpu.matmul %97, %99, %cst_135 {dimension_numbers = #tpu.dot_dimension_numbers<[1], [0], [0], [1], [0, 0, 1, 1], [], []>} : vector<64x128xbf16>, vector<128x128xbf16>, vector<64x128xf32> -> vector<64x128xf32>
    %101 = arith.addf %95, %100 : vector<64x128xf32>
    %c0_136 = arith.constant 0 : index
    %c2_137 = arith.constant 2 : index
    %c0_138 = arith.constant 0 : index
    %102 = vector.load %arg7[%c0_136, %c2_137, %c0_138] : memref<10x10x128xbf16, #tpu.memory_space<vmem>>, vector<8x8x128xbf16>
    %103 = vector.shape_cast %102 : vector<8x8x128xbf16> to vector<64x128xbf16>
    %c0_139 = arith.constant 0 : index
    %c2_140 = arith.constant 2 : index
    %c0_141 = arith.constant 0 : index
    %c0_142 = arith.constant 0 : index
    %104 = vector.load %arg3[%c0_139, %c2_140, %c0_141, %c0_142] : memref<3x3x128x128xbf16, #tpu.memory_space<vmem>>, vector<1x1x128x128xbf16>
    %105 = vector.shape_cast %104 : vector<1x1x128x128xbf16> to vector<128x128xbf16>
    %cst_143 = arith.constant dense<0.000000e+00> : vector<64x128xf32>
    %106 = tpu.matmul %103, %105, %cst_143 {dimension_numbers = #tpu.dot_dimension_numbers<[1], [0], [0], [1], [0, 0, 1, 1], [], []>} : vector<64x128xbf16>, vector<128x128xbf16>, vector<64x128xf32> -> vector<64x128xf32>
    %107 = arith.addf %101, %106 : vector<64x128xf32>
    %c1_144 = arith.constant 1 : index
    %c0_145 = arith.constant 0 : index
    %c0_146 = arith.constant 0 : index
    %108 = vector.load %arg7[%c1_144, %c0_145, %c0_146] : memref<10x10x128xbf16, #tpu.memory_space<vmem>>, vector<8x8x128xbf16>
    %109 = vector.shape_cast %108 : vector<8x8x128xbf16> to vector<64x128xbf16>
    %c1_147 = arith.constant 1 : index
    %c0_148 = arith.constant 0 : index
    %c0_149 = arith.constant 0 : index
    %c0_150 = arith.constant 0 : index
    %110 = vector.load %arg3[%c1_147, %c0_148, %c0_149, %c0_150] : memref<3x3x128x128xbf16, #tpu.memory_space<vmem>>, vector<1x1x128x128xbf16>
    %111 = vector.shape_cast %110 : vector<1x1x128x128xbf16> to vector<128x128xbf16>
    %cst_151 = arith.constant dense<0.000000e+00> : vector<64x128xf32>
    %112 = tpu.matmul %109, %111, %cst_151 {dimension_numbers = #tpu.dot_dimension_numbers<[1], [0], [0], [1], [0, 0, 1, 1], [], []>} : vector<64x128xbf16>, vector<128x128xbf16>, vector<64x128xf32> -> vector<64x128xf32>
    %113 = arith.addf %107, %112 : vector<64x128xf32>
    %c1_152 = arith.constant 1 : index
    %c1_153 = arith.constant 1 : index
    %c0_154 = arith.constant 0 : index
    %114 = vector.load %arg7[%c1_152, %c1_153, %c0_154] : memref<10x10x128xbf16, #tpu.memory_space<vmem>>, vector<8x8x128xbf16>
    %115 = vector.shape_cast %114 : vector<8x8x128xbf16> to vector<64x128xbf16>
    %c1_155 = arith.constant 1 : index
    %c1_156 = arith.constant 1 : index
    %c0_157 = arith.constant 0 : index
    %c0_158 = arith.constant 0 : index
    %116 = vector.load %arg3[%c1_155, %c1_156, %c0_157, %c0_158] : memref<3x3x128x128xbf16, #tpu.memory_space<vmem>>, vector<1x1x128x128xbf16>
    %117 = vector.shape_cast %116 : vector<1x1x128x128xbf16> to vector<128x128xbf16>
    %cst_159 = arith.constant dense<0.000000e+00> : vector<64x128xf32>
    %118 = tpu.matmul %115, %117, %cst_159 {dimension_numbers = #tpu.dot_dimension_numbers<[1], [0], [0], [1], [0, 0, 1, 1], [], []>} : vector<64x128xbf16>, vector<128x128xbf16>, vector<64x128xf32> -> vector<64x128xf32>
    %119 = arith.addf %113, %118 : vector<64x128xf32>
    %c1_160 = arith.constant 1 : index
    %c2_161 = arith.constant 2 : index
    %c0_162 = arith.constant 0 : index
    %120 = vector.load %arg7[%c1_160, %c2_161, %c0_162] : memref<10x10x128xbf16, #tpu.memory_space<vmem>>, vector<8x8x128xbf16>
    %121 = vector.shape_cast %120 : vector<8x8x128xbf16> to vector<64x128xbf16>
    %c1_163 = arith.constant 1 : index
    %c2_164 = arith.constant 2 : index
    %c0_165 = arith.constant 0 : index
    %c0_166 = arith.constant 0 : index
    %122 = vector.load %arg3[%c1_163, %c2_164, %c0_165, %c0_166] : memref<3x3x128x128xbf16, #tpu.memory_space<vmem>>, vector<1x1x128x128xbf16>
    %123 = vector.shape_cast %122 : vector<1x1x128x128xbf16> to vector<128x128xbf16>
    %cst_167 = arith.constant dense<0.000000e+00> : vector<64x128xf32>
    %124 = tpu.matmul %121, %123, %cst_167 {dimension_numbers = #tpu.dot_dimension_numbers<[1], [0], [0], [1], [0, 0, 1, 1], [], []>} : vector<64x128xbf16>, vector<128x128xbf16>, vector<64x128xf32> -> vector<64x128xf32>
    %125 = arith.addf %119, %124 : vector<64x128xf32>
    %c2_168 = arith.constant 2 : index
    %c0_169 = arith.constant 0 : index
    %c0_170 = arith.constant 0 : index
    %126 = vector.load %arg7[%c2_168, %c0_169, %c0_170] : memref<10x10x128xbf16, #tpu.memory_space<vmem>>, vector<8x8x128xbf16>
    %127 = vector.shape_cast %126 : vector<8x8x128xbf16> to vector<64x128xbf16>
    %c2_171 = arith.constant 2 : index
    %c0_172 = arith.constant 0 : index
    %c0_173 = arith.constant 0 : index
    %c0_174 = arith.constant 0 : index
    %128 = vector.load %arg3[%c2_171, %c0_172, %c0_173, %c0_174] : memref<3x3x128x128xbf16, #tpu.memory_space<vmem>>, vector<1x1x128x128xbf16>
    %129 = vector.shape_cast %128 : vector<1x1x128x128xbf16> to vector<128x128xbf16>
    %cst_175 = arith.constant dense<0.000000e+00> : vector<64x128xf32>
    %130 = tpu.matmul %127, %129, %cst_175 {dimension_numbers = #tpu.dot_dimension_numbers<[1], [0], [0], [1], [0, 0, 1, 1], [], []>} : vector<64x128xbf16>, vector<128x128xbf16>, vector<64x128xf32> -> vector<64x128xf32>
    %131 = arith.addf %125, %130 : vector<64x128xf32>
    %c2_176 = arith.constant 2 : index
    %c1_177 = arith.constant 1 : index
    %c0_178 = arith.constant 0 : index
    %132 = vector.load %arg7[%c2_176, %c1_177, %c0_178] : memref<10x10x128xbf16, #tpu.memory_space<vmem>>, vector<8x8x128xbf16>
    %133 = vector.shape_cast %132 : vector<8x8x128xbf16> to vector<64x128xbf16>
    %c2_179 = arith.constant 2 : index
    %c1_180 = arith.constant 1 : index
    %c0_181 = arith.constant 0 : index
    %c0_182 = arith.constant 0 : index
    %134 = vector.load %arg3[%c2_179, %c1_180, %c0_181, %c0_182] : memref<3x3x128x128xbf16, #tpu.memory_space<vmem>>, vector<1x1x128x128xbf16>
    %135 = vector.shape_cast %134 : vector<1x1x128x128xbf16> to vector<128x128xbf16>
    %cst_183 = arith.constant dense<0.000000e+00> : vector<64x128xf32>
    %136 = tpu.matmul %133, %135, %cst_183 {dimension_numbers = #tpu.dot_dimension_numbers<[1], [0], [0], [1], [0, 0, 1, 1], [], []>} : vector<64x128xbf16>, vector<128x128xbf16>, vector<64x128xf32> -> vector<64x128xf32>
    %137 = arith.addf %131, %136 : vector<64x128xf32>
    %c2_184 = arith.constant 2 : index
    %c2_185 = arith.constant 2 : index
    %c0_186 = arith.constant 0 : index
    %138 = vector.load %arg7[%c2_184, %c2_185, %c0_186] : memref<10x10x128xbf16, #tpu.memory_space<vmem>>, vector<8x8x128xbf16>
    %139 = vector.shape_cast %138 : vector<8x8x128xbf16> to vector<64x128xbf16>
    %c2_187 = arith.constant 2 : index
    %c2_188 = arith.constant 2 : index
    %c0_189 = arith.constant 0 : index
    %c0_190 = arith.constant 0 : index
    %140 = vector.load %arg3[%c2_187, %c2_188, %c0_189, %c0_190] : memref<3x3x128x128xbf16, #tpu.memory_space<vmem>>, vector<1x1x128x128xbf16>
    %141 = vector.shape_cast %140 : vector<1x1x128x128xbf16> to vector<128x128xbf16>
    %cst_191 = arith.constant dense<0.000000e+00> : vector<64x128xf32>
    %142 = tpu.matmul %139, %141, %cst_191 {dimension_numbers = #tpu.dot_dimension_numbers<[1], [0], [0], [1], [0, 0, 1, 1], [], []>} : vector<64x128xbf16>, vector<128x128xbf16>, vector<64x128xf32> -> vector<64x128xf32>
    %143 = arith.addf %137, %142 : vector<64x128xf32>
    %c1_192 = arith.constant 1 : index
    %c0_193 = arith.constant 0 : index
    %144 = vector.load %arg4[%c1_192, %c0_193] : memref<2x128xf32, #tpu.memory_space<vmem>>, vector<1x128xf32>
    %145 = vector.broadcast %144 : vector<1x128xf32> to vector<64x128xf32>
    %146 = arith.addf %143, %145 : vector<64x128xf32>
    %cst_194 = arith.constant 0.000000e+00 : f32
    %147 = vector.broadcast %cst_194 : f32 to vector<64x128xf32>
    %148 = arith.maximumf %146, %147 : vector<64x128xf32>
    %149 = vector.shape_cast %148 : vector<64x128xf32> to vector<8x8x128xf32>
    %c0_195 = arith.constant 0 : index
    %c0_196 = arith.constant 0 : index
    %c0_197 = arith.constant 0 : index
    %c0_198 = arith.constant 0 : index
    %150 = vector.load %arg5[%c0_195, %c0_196, %c0_197, %c0_198] : memref<1x8x8x128xf32, #tpu.memory_space<vmem>>, vector<1x8x8x128xf32>
    %151 = vector.shape_cast %150 : vector<1x8x8x128xf32> to vector<8x8x128xf32>
    %152 = vector.shape_cast %149 : vector<8x8x128xf32> to vector<1x8x8x128xf32>
    tpu.vector_store %arg5[%c0_195, %c0_196, %c0_197, %c0_198], %152 {strides = array<i32>} : memref<1x8x8x128xf32, #tpu.memory_space<vmem>>, vector<1x8x8x128xf32>,
    return
  }
  func.func @transform_0(%arg0: i32) -> (i32, i32, i32, i32, i32) {
    %c0_i32 = arith.constant 0 : i32
    %c0_i32_0 = arith.constant 0 : i32
    %c0_i32_1 = arith.constant 0 : i32
    %c0_i32_2 = arith.constant 0 : i32
    %c0_i32_3 = arith.constant 0 : i32
    return %arg0, %c0_i32, %c0_i32_0, %c0_i32_1, %c0_i32_2 : i32, i32, i32, i32, i32
  }
  func.func @transform_1(%arg0: i32) -> (i32, i32, i32, i32) {
    %c0_i32 = arith.constant 0 : i32
    %c0_i32_0 = arith.constant 0 : i32
    %c0_i32_1 = arith.constant 0 : i32
    %c0_i32_2 = arith.constant 0 : i32
    %c0_i32_3 = arith.constant 0 : i32
    return %c0_i32, %c0_i32_0, %c0_i32_1, %c0_i32_2 : i32, i32, i32, i32
  }
  func.func @transform_2(%arg0: i32) -> (i32, i32, i32, i32) {
    %c0_i32 = arith.constant 0 : i32
    %c0_i32_0 = arith.constant 0 : i32
    %c0_i32_1 = arith.constant 0 : i32
    %c0_i32_2 = arith.constant 0 : i32
    %c0_i32_3 = arith.constant 0 : i32
    return %c0_i32, %c0_i32_0, %c0_i32_1, %c0_i32_2 : i32, i32, i32, i32
  }
  func.func @transform_3(%arg0: i32) -> (i32, i32) {
    %c0_i32 = arith.constant 0 : i32
    %c0_i32_0 = arith.constant 0 : i32
    %c0_i32_1 = arith.constant 0 : i32
    return %c0_i32, %c0_i32_0 : i32, i32
  }
  func.func @transform_4(%arg0: i32) -> (i32, i32, i32, i32) {
    %c0_i32 = arith.constant 0 : i32
    %c0_i32_0 = arith.constant 0 : i32
    %c0_i32_1 = arith.constant 0 : i32
    %c0_i32_2 = arith.constant 0 : i32
    return %arg0, %c0_i32, %c0_i32_0, %c0_i32_1 : i32, i32, i32, i32
  }
}

</mosaic_0001>

<bundles_post_ra>
// kernel: down_forward.1
= control target key start
LH: loop header
LB: loop body
LE: loop exit
PB: predicated region body
PF: predicated region fallthrough
CT: control target
= control target key end

     0   :  { %s6320_s15 = smov 0   ;;  %s7509_s0 = inlined_call_operand.vmem [shape: f32[2,8,2,8,256], index: 0, kind: input, shape index: {}]   ;;  %s7510_s1 = inlined_call_operand.vmem [shape: bf16[3,3,128,128], index: 1, kind: input, shape index: {}]   ;;  %s7511_s2 = inlined_call_operand.vmem [shape: bf16[3,3,128,128], index: 2, kind: input, shape index: {}]   ;;  %s7512_s3 = inlined_call_operand.vmem [shape: f32[2,128], index: 3, kind: input, shape index: {}]   ;;  %s7513_s4 = inlined_call_operand.vmem [shape: f32[2,8,8,128], index: 4, kind: output, shape index: {}]  }
   0x1 LB: > { %s4750_s16 = sadd.s32 4294967295, %s6292_s15   ;;  %p4754_p0 = scmp.ge.s32.totalorder %s6292_s15, 1  ;;  %s6292_s15 = sphi %s6320_s15, %s14_s15  }
   0x2   : > { %p162_p1 = scmp.lt.s32.totalorder %s6292_s15, 3 }
   0x4   : > { %p163_p2 = pnand %p4754_p0, %p162_p1 }
   0x5   : > { %v6118_v0 = vld [vmem:[%s7510_s1 + $0x40] sm:$0xff] (!%p163_p2)   ;;  %p188_p3 = scmp.lt.s32.totalorder (!%p163_p2), %s4750_s16, 1  ;;  %v6119_v1 = vld [vmem:[%s7510_s1 + $0x48] sm:$0xff] (!%p163_p2)   ;;  %v6294_v2 = vmov (!%p163_p2), 0   ;;  %v6120_v3 = vld [vmem:[%s7510_s1 + $0x50] sm:$0xff] (!%p163_p2)   ;;  %vm261_vm0 = vcmask (!%p163_p2), 1040384  }
   0x6   : > { %166 = sbr.rel (%p163_p2) target bundleno = 1049 (0x419), region = 36  ;;  %5549 = vmatprep.subr.bf16.mxu0 (!%p163_p2), %v6118_v0  ;;  %256 = vst [vmem:[#allocation2] sm:$0xf] (!%p163_p2), %v6294_v2  ;;  %257 = vst [vmem:[#allocation2 + $0x4] sm:$0x1] (!%p163_p2), %v6294_v2  ;;  %v6121_v4 = vld [vmem:[%s7510_s1 + $0x58] sm:$0xff] (!%p163_p2)  }
   0x7   : > { %259 = vst [vmem:[#allocation2 + $0x48] sm:$0xf] (!%p163_p2), %v6294_v2  ;;  %260 = vst [vmem:[#allocation2 + $0x4c] sm:$0x1] (!%p163_p2), %v6294_v2  ;;  %5550 = vmatpush3.bf16.msra.mxu0 (!%p163_p2), %v6118_v0  ;;  %vm262_vm1 = vsmask.f32 (!%p163_p2), 256 }
   0x8   : > { %326 = vst [vmem:[#allocation3] sm:$0xf] (!%p163_p2), %v6294_v2  ;;  %327 = vst [vmem:[#allocation3 + $0x4] sm:$0x1] (!%p163_p2), %v6294_v2  ;;  %5551 = vmatprep.subr.bf16.mxu0 (!%p163_p2), %v6119_v1  ;;  %vm294_vm3 = vsmask.f32 (!%p163_p2), 7938 }
   0x9   : > { %329 = vst [vmem:[#allocation3 + $0x48] sm:$0xf] (!%p163_p2), %v6294_v2  ;;  %330 = vst [vmem:[#allocation3 + $0x4c] sm:$0x1] (!%p163_p2), %v6294_v2  ;;  %v267_v14 = vld [vmem:[#allocation2 + $0x8] sm:$0x1] (!%p163_p2) }
   0xa   : > { %vm6353_vm2 = vmand (!%p163_p2), %vm261_vm0, %vm262_vm1  ;;  %v299_v19 = vld [vmem:[#allocation2 + $0xc] sm:$0x1] (!%p163_p2)  ;;  %v6122_v20 = vld [vmem:[%s7510_s1 + $0x60] sm:$0xff] (!%p163_p2)   ;;  %vm504_vm5 = vcmask (!%p163_p2), 1043456   ;;  %vm586_vm7 = vsmask.f32 (!%p163_p2), 3328 }
   0xb   : > { %5552 = vmatpush3.bf16.msra.mxu0 (!%p163_p2), %v6119_v1  ;;  %vm6361_vm4 = vmand (!%p163_p2), %vm261_vm0, %vm294_vm3  ;;  %v268_v17 = vsel (!%p163_p2), %vm6353_vm2, 0, %v267_v14  ;;  %v6123_v31 = vld [vmem:[%s7510_s1 + $0x68] sm:$0xff] (!%p163_p2)   ;;  %v270_v37 = vld [vmem:[#allocation2 + $0x10] sm:$0x1] (!%p163_p2)  ;;  %vm587_vm8 = vsmask.f32 (!%p163_p2), 7440 }
   0xc   : > { %5553 = vmatprep.subr.bf16.mxu0 (!%p163_p2), %v6120_v3  ;;  %269 = vst [vmem:[#allocation2 + $0x8] sm:$0x1] (!%p163_p2), %v268_v17  ;;  %v300_v22 = vsel (!%p163_p2), %vm6361_vm4, 0, %v299_v19  ;;  %v271_v40 = vsel (!%p163_p2), %vm6353_vm2, 0, %v270_v37  ;;  %v273_v41 = vld [vmem:[#allocation2 + $0x18] sm:$0x1] (!%p163_p2)  ;;  %vm6395_vm6 = vmand (!%p163_p2), %vm504_vm5, %vm294_vm3 }
   0xd   : > { %s7525_s16 = smov (!%p188_p3, %s4750_s16), 1  ;;  %v264_v11 = vld [vmem:[#allocation2] sm:$0x1]  ;;  %v296_v16 = vld [vmem:[#allocation2 + $0x4] sm:$0x1]  ;;  %v274_v46 = vsel %vm6353_vm2, 0, %v273_v41  ;;  %vm6451_vm9 = vmor %vm586_vm7, %vm587_vm8 }
   0xe   : > { %s5315_s23 = sshll.u32 %s7525_s16, 8  ;;  %v265_v13 = vsel %vm6353_vm2, 0, %v264_v11  ;;  %v297_v18 = vsel %vm6361_vm4, 0, %v296_v16  ;;  %301 = vst [vmem:[#allocation2 + $0xc] sm:$0x1] %v300_v22  ;;  %v6124_v53 = vld [vmem:[%s7510_s1 + $0x70] sm:$0xff]  }
   0xf   : > { %s6343_s26 = scalar_lea.vmem %s7509_s0, %s5315_s23  ;;  %5554 = vmatpush3.bf16.msra.mxu0 %v6120_v3  ;;  %266 = vst [vmem:[#allocation2] sm:$0x1] %v265_v13  ;;  %298 = vst [vmem:[#allocation2 + $0x4] sm:$0x1] %v297_v18  ;;  %v302_v42 = vld [vmem:[#allocation2 + $0x14] sm:$0x1] }
  0x10   : > { %v199_v5 = vld [vmem:[%s6343_s26] sm:$0xff]  ;;  %v200_v6 = vld [vmem:[%s6343_s26 + $0x8] sm:$0xff]  ;;  %v4759_v7 = vld [vmem:[%s6343_s26 + $0x10] sm:$0xff]  ;;  %5555 = vmatprep.subr.bf16.mxu0 %v6121_v4  ;;  %272 = vst [vmem:[#allocation2 + $0x10] sm:$0x1] %v271_v40  ;;  %v303_v47 = vsel %vm6361_vm4, 0, %v302_v42 }
  0x11   : > { %v4760_v8 = vld [vmem:[%s6343_s26 + $0x18] sm:$0xff]  ;;  %v232_v9 = vmax.f32 %v199_v5, %v4759_v7  ;;  %v201_v23 = vld [vmem:[%s6343_s26 + $0x20] sm:$0xff]  ;;  %v202_v25 = vld [vmem:[%s6343_s26 + $0x28] sm:$0xff]  ;;  %275 = vst [vmem:[#allocation2 + $0x18] sm:$0x1] %v274_v46  ;;  %vm1008_vm10 = vcmask 1042432  }
  0x12   : > { %v233_v12 = vmax.f32 %v200_v6, %v4760_v8  ;;  %v203_v26 = vld [vmem:[%s6343_s26 + $0x40] sm:$0xff]  ;;  %v204_v27 = vld [vmem:[%s6343_s26 + $0x48] sm:$0xff]  ;;  %v4761_v28 = vld [vmem:[%s6343_s26 + $0x30] sm:$0xff]  ;;  %304 = vst [vmem:[#allocation2 + $0x14] sm:$0x1] %v303_v47  ;;  %vm1009_vm11 = vcmask 1046532  }
  0x13   : > { %5556 = vmatpush3.bf16.msra.mxu0 %v6121_v4  ;;  %v4762_v29 = vld [vmem:[%s6343_s26 + $0x38] sm:$0xff]  ;;  %v4763_v30 = vld [vmem:[%s6343_s26 + $0x50] sm:$0xff]  ;;  %v234_v35 = vmax.f32 %v201_v23, %v4761_v28  ;;  %v506_v49 = vld [vmem:[#allocation2 + $0x8] sm:$0xf]  ;;  %s5316_s25 = sshll.u32 %s7525_s16, 6 }
  0x14   : > { %v248_v21 = vmax.f32 %v232_v9, %v233_v12  ;;  %5557 = vmatprep.subr.bf16.mxu0 %v6122_v20  ;;  %v4764_v34 = vld [vmem:[%s6343_s26 + $0x58] sm:$0xff]  ;;  %v235_v36 = vmax.f32 %v202_v25, %v4762_v29  ;;  %v236_v38 = vmax.f32 %v203_v26, %v4763_v30  ;;  %v205_v12 = vld [vmem:[%s6343_s26 + $0x60] sm:$0xff]  ;;  %v206_v13 = vld [vmem:[%s6343_s26 + $0x68] sm:$0xff]  ;;  %s197_s29 = scalar_lea.vmem %s7513_s4, %s5316_s25 }
  0x15   : > { %v237_v39 = vmax.f32 %v204_v27, %v4764_v34  ;;  %v509_v56 = vld [vmem:[#allocation2 + $0xc] sm:$0x1]  ;;  %v305_v58 = vld [vmem:[#allocation2 + $0x1c] sm:$0x1]  ;;  %v6421_v14 = vld [vmem:[%s7510_s1] sm:$0xff]  }
  0x16   : > { %v5317_v24 = vpack.c.bf16 %v248_v21, %v248_v21  ;;  %v6387_v44 = vld [vmem:[#allocation2] sm:$0xf]  ;;  %v249_v45 = vmax.f32 %v234_v35, %v235_v36  ;;  %v6399_v50 = vld [vmem:[#allocation2 + $0x4] sm:$0x1]  ;;  %v6125_v61 = vld [vmem:[%s7510_s1 + $0x78] sm:$0xff]   ;;  %v306_v1 = vsel %vm6361_vm4, 0, %v305_v58 }
  0x17   : > { %5558 = vmatpush3.bf16.msra.mxu0 %v6122_v20  ;;  %v590_v51 = vshrl.u32 %v6387_v44, 16  ;;  %v250_v52 = vmax.f32 %v236_v38, %v237_v39  ;;  %v593_v57 = vshll.u32 %v6387_v44, 16  ;;  %v599_v0 = vshll.u32 %v6399_v50, 16  ;;  %307 = vst [vmem:[#allocation2 + $0x1c] sm:$0x1] %v306_v1  ;;  %v207_v21 = vld [vmem:[%s6343_s26 + $0x80] sm:$0xff]  ;;  %vm6545_vm12 = vmor %vm1008_vm10, %vm1009_vm11 }
  0x18   : > { %v424_v32 = vshrl.u32 %v5317_v24, 16  ;;  %v427_v33 = vshll.u32 %v5317_v24, 16  ;;  %5559 = vmatprep.subr.bf16.mxu0 %v6123_v31  ;;  %v5318_v59 = vpack.c.bf16 %v249_v45, %v249_v45  ;;  %v512_v11 = vld [vmem:[#allocation2 + $0x10] sm:$0xf]  ;;  %v518_v17 = vld [vmem:[#allocation2 + $0x18] sm:$0xf] }
  0x19   : > { %v5319_v60 = vpack.c.bf16 %v250_v52, %v250_v52  ;;  %v592_v2 = vrot.slane %v590_v51, 4  ;;  %v595_v6 = vrot.slane %v593_v57, 5  ;;  %v515_v16 = vld [vmem:[#allocation2 + $0x14] sm:$0x1]  ;;  %v208_v24 = vld [vmem:[%s6343_s26 + $0x88] sm:$0xff]  ;;  %v4766_v29 = vld [vmem:[%s6343_s26 + $0x78] sm:$0xff] }
  0x1a   : > { %v426_v43 = vrot.slane %v424_v32, 7  ;;  %v432_v3 = vshrl.u32 %v5318_v59, 16  ;;  %v435_v4 = vshll.u32 %v5318_v59, 16  ;;  %v4765_v25 = vld [vmem:[%s6343_s26 + $0x70] sm:$0xff]  ;;  %v239_v36 = vmax.f32 %v206_v13, %v4766_v29  ;;  %v279_v51 = vld [vmem:[#allocation2 + $0x28] sm:$0x1] }
  0x1b   : > { %5560 = vmatpush3.bf16.msra.mxu0 %v6123_v31  ;;  %v440_v5 = vshrl.u32 %v5319_v60, 16  ;;  %v443_v7 = vshll.u32 %v5319_v60, 16  ;;  %v596_v22 = vor.u32 %v595_v6, %v592_v2  ;;  %v4767_v30 = vld [vmem:[%s6343_s26 + $0x90] sm:$0xff]  ;;  %v4768_v31 = vld [vmem:[%s6343_s26 + $0x98] sm:$0xff]  ;;  %v238_v32 = vmax.f32 %v205_v12, %v4765_v25  ;;  %v308_v52 = vld [vmem:[#allocation2 + $0x24] sm:$0x1] }
  0x1c   : > { %v429_v54 = vor.u32 %v427_v33, %v426_v43  ;;  %v430_v55 = vrot.slane %v426_v43, 4  ;;  %5561 = vmatprep.subr.bf16.mxu0 %v6124_v53  ;;  %v434_v8 = vrot.slane %v432_v3, 7  ;;  %v240_v37 = vmax.f32 %v207_v21, %v4767_v30  ;;  %v276_v43 = vld [vmem:[#allocation2 + $0x20] sm:$0x1]  ;;  %v311_v57 = vld [vmem:[#allocation2 + $0x2c] sm:$0x1] }
  0x1d   : > { %v442_v9 = vrot.slane %v440_v5, 7  ;;  %v241_v38 = vmax.f32 %v208_v24, %v4768_v31  ;;  %v601_v39 = vrot.slane %v599_v0, 5  ;;  %v251_v46 = vmax.f32 %v238_v32, %v239_v36  ;;  %v4770_v24 = vld [vmem:[%s6343_s26 + $0xb8] sm:$0xff]  ;;  %v212_v30 = vld [vmem:[%s6343_s26 + $0xc8] sm:$0xff]  ;;  %v4771_v31 = vld [vmem:[%s6343_s26 + $0xd0] sm:$0xff] }
  0x1e   : > { %v507_v62 = vsel %vm6395_vm6, %v429_v54, %v506_v49  ;;  %v510_v63 = vsel %vm6353_vm2, %v430_v55, %v509_v56  ;;  %v437_v18 = vor.u32 %v435_v4, %v434_v8  ;;  %v438_v19 = vrot.slane %v434_v8, 4  ;;  %v521_v35 = vld [vmem:[#allocation2 + $0x1c] sm:$0x1]  ;;  %v209_v4 = vld [vmem:[%s6343_s26 + $0xa0] sm:$0xff] }
  0x1f   : > { %508 = vst [vmem:[#allocation2 + $0x8] sm:$0xf] %v507_v62  ;;  %511 = vst [vmem:[#allocation2 + $0xc] sm:$0x1] %v510_v63  ;;  %5562 = vmatpush3.bf16.msra.mxu0 %v6124_v53  ;;  %v445_v20 = vor.u32 %v443_v7, %v442_v9  ;;  %v446_v23 = vrot.slane %v442_v9, 4  ;;  %v252_v47 = vmax.f32 %v240_v37, %v241_v38  ;;  %v277_v49 = vsel %vm6353_vm2, 0, %v276_v43 }
  0x20   : > { %5563 = vmatprep.subr.bf16.mxu0 %v6125_v61  ;;  %v513_v26 = vsel %vm6395_vm6, %v437_v18, %v512_v11  ;;  %v516_v27 = vsel %vm6353_vm2, %v438_v19, %v515_v16  ;;  %v597_v53 = vrot.slane %v596_v22, 4  ;;  %278 = vst [vmem:[#allocation2 + $0x20] sm:$0x1] %v277_v49  ;;  %v280_v56 = vsel %vm6353_vm2, 0, %v279_v51  ;;  %v4769_v9 = vld [vmem:[%s6343_s26 + $0xb0] sm:$0xff]  ;;  %v210_v22 = vld [vmem:[%s6343_s26 + $0xa8] sm:$0xff] }
  0x21   : > { %v519_v28 = vsel %vm6395_vm6, %v445_v20, %v518_v17  ;;  %514 = vst [vmem:[#allocation2 + $0x10] sm:$0xf] %v513_v26  ;;  %517 = vst [vmem:[#allocation2 + $0x14] sm:$0x1] %v516_v27  ;;  %v522_v45 = vsel %vm6353_vm2, %v446_v23, %v521_v35  ;;  %v309_v59 = vsel %vm6361_vm4, 0, %v308_v52  ;;  %v312_v60 = vsel %vm6361_vm4, 0, %v311_v57 }
  0x22   : > { %520 = vst [vmem:[#allocation2 + $0x18] sm:$0xf] %v519_v28  ;;  %523 = vst [vmem:[#allocation2 + $0x1c] sm:$0x1] %v522_v45  ;;  %v5321_v62 = vpack.c.bf16 %v252_v47, %v252_v47  ;;  %v602_v5 = vsel %vm6451_vm9, %v597_v53, %v601_v39  ;;  %v211_v23 = vld [vmem:[%s6343_s26 + $0xc0] sm:$0xff]  ;;  %v4772_v38 = vld [vmem:[%s6343_s26 + $0xd8] sm:$0xff]  ;;  %v242_v39 = vmax.f32 %v209_v4, %v4769_v9 }
  0x23   : > { %5564 = vmatpush3.bf16.msra.mxu0 %v6125_v61  ;;  %281 = vst [vmem:[#allocation2 + $0x28] sm:$0x1] %v280_v56  ;;  %v5320_v61 = vpack.c.bf16 %v251_v46, %v251_v46  ;;  %310 = vst [vmem:[#allocation2 + $0x24] sm:$0x1] %v309_v59  ;;  %v243_v52 = vmax.f32 %v210_v22, %v4770_v24  ;;  %v244_v53 = vmax.f32 %v211_v23, %v4771_v31  ;;  %v6128_v24 = vld [vmem:[%s7510_s1 + $0x10] sm:$0xff]   ;;  %v6282_v58 = vld [vmem:[%s7511_s2 + $0x220] sm:$0xff]  }
  0x24   : > { %5573 = vmatprep.subr.bf16.mxu0 %v6421_v14  ;;  %313 = vst [vmem:[#allocation2 + $0x2c] sm:$0x1] %v312_v60  ;;  %v456_v3 = vshrl.u32 %v5321_v62, 16  ;;  %v459_v21 = vshll.u32 %v5321_v62, 16  ;;  %v285_v60 = vld [vmem:[#allocation2 + $0x38] sm:$0x1] }
  0x25   : > { %v448_v1 = vshrl.u32 %v5320_v61, 16  ;;  %v451_v2 = vshll.u32 %v5320_v61, 16  ;;  %v314_v61 = vld [vmem:[#allocation2 + $0x34] sm:$0x1] }
  0x26   : > { %v6435_v33 = vld [vmem:[#allocation2 + $0x8] sm:$0xf]  ;;  %v6437_v34 = vld [vmem:[#allocation2 + $0xc] sm:$0x1]  ;;  %v458_v43 = vrot.slane %v456_v3, 7 }
  0x27   : > { %v604_v40 = vshrl.u32 %v6435_v33, 16  ;;  %v607_v41 = vshll.u32 %v6435_v33, 16  ;;  %v613_v42 = vshll.u32 %v6437_v34, 16  ;;  %v450_v20 = vrot.slane %v448_v1, 7  ;;  %v524_v37 = vld [vmem:[#allocation2 + $0x20] sm:$0xf] }
  0x28   : > { %v6462_v7 = vld [vmem:[#allocation2 + $0x10] sm:$0xf]  ;;  %v6467_v11 = vld [vmem:[#allocation2 + $0x14] sm:$0x1]  ;;  %v461_v56 = vor.u32 %v459_v21, %v458_v43  ;;  %v462_v57 = vrot.slane %v458_v43, 4  ;;  %v253_v1 = vmax.f32 %v242_v39, %v243_v52 }
  0x29   : > { %v606_v54 = vrot.slane %v604_v40, 4  ;;  %v609_v55 = vrot.slane %v607_v41, 5  ;;  %v615_v0 = vrot.slane %v613_v42, 5  ;;  %v6464_v8 = vld [vmem:[#allocation2 + $0x18] sm:$0xf]  ;;  %v618_v12 = vshrl.u32 %v6462_v7, 16 }
  0x2a   : > { %v621_v13 = vshll.u32 %v6462_v7, 16  ;;  %v632_v16 = vshrl.u32 %v6464_v8, 16  ;;  %v635_v17 = vshll.u32 %v6464_v8, 16  ;;  %v627_v19 = vshll.u32 %v6467_v11, 16  ;;  %v6479_v26 = vld [vmem:[#allocation2 + $0x1c] sm:$0x1] }
  0x2b   : > { %v610_v63 = vor.u32 %v609_v55, %v606_v54  ;;  %v620_v27 = vrot.slane %v618_v12, 4  ;;  %v641_v36 = vshll.u32 %v6479_v26, 16  ;;  %v453_v41 = vor.u32 %v451_v2, %v450_v20  ;;  %v527_v45 = vld [vmem:[#allocation2 + $0x24] sm:$0x1]  ;;  %v530_v46 = vld [vmem:[#allocation2 + $0x28] sm:$0xf] }
  0x2c   : > { %v623_v28 = vrot.slane %v621_v13, 5  ;;  %v634_v29 = vrot.slane %v632_v16, 4  ;;  %v629_v32 = vrot.slane %v627_v19, 5  ;;  %v637_v35 = vrot.slane %v635_v17, 5  ;;  %v533_v51 = vld [vmem:[#allocation2 + $0x2c] sm:$0x1] }
  0x2d   : > { %v611_v6 = vrot.slane %v610_v63, 4  ;;  %v454_v42 = vrot.slane %v450_v20, 4  ;;  %v643_v49 = vrot.slane %v641_v36, 5  ;;  %v282_v54 = vld [vmem:[#allocation2 + $0x30] sm:$0x1]  ;;  %v525_v59 = vsel %vm6395_vm6, %v453_v41, %v524_v37 }
  0x2e   : > { %v624_v40 = vor.u32 %v623_v28, %v620_v27  ;;  %v638_v47 = vor.u32 %v637_v35, %v634_v29  ;;  %526 = vst [vmem:[#allocation2 + $0x20] sm:$0xf] %v525_v59  ;;  %v317_v2 = vld [vmem:[#allocation2 + $0x3c] sm:$0x1]  ;;  %v531_v4 = vsel %vm6395_vm6, %v461_v56, %v530_v46  ;;  %v286_v13 = vsel %vm6353_vm2, 0, %v285_v60 }
  0x2f   : > { %v616_v18 = vsel %vm6451_vm9, %v611_v6, %v615_v0  ;;  %v528_v63 = vsel %vm6353_vm2, %v454_v42, %v527_v45  ;;  %v245_v0 = vmax.f32 %v212_v30, %v4772_v38  ;;  %v283_v6 = vsel %vm6353_vm2, 0, %v282_v54  ;;  %532 = vst [vmem:[#allocation2 + $0x28] sm:$0xf] %v531_v4  ;;  %287 = vst [vmem:[#allocation2 + $0x38] sm:$0x1] %v286_v13  ;;  %v6129_v46 = vld [vmem:[%s7510_s1 + $0x18] sm:$0xff]  }
  0x30   : > { %v4799_v25 = vcombine.low %v602_v5, %v616_v18  ;;  %v625_v55 = vrot.slane %v624_v40, 4  ;;  %v639_v62 = vrot.slane %v638_v47, 4  ;;  %529 = vst [vmem:[#allocation2 + $0x24] sm:$0x1] %v528_v63  ;;  %v534_v5 = vsel %vm6353_vm2, %v462_v57, %v533_v51  ;;  %284 = vst [vmem:[#allocation2 + $0x30] sm:$0x1] %v283_v6 }
  0x31   : > { %535 = vst [vmem:[#allocation2 + $0x2c] sm:$0x1] %v534_v5  ;;  %v254_v12 = vmax.f32 %v244_v53, %v245_v0  ;;  %v315_v16 = vsel %vm6361_vm4, 0, %v314_v61  ;;  %v6127_v18 = vld [vmem:[%s7510_s1 + $0x8] sm:$0xff]   ;;  %v318_v19 = vsel %vm6361_vm4, 0, %v317_v2  ;;  %v5322_v20 = vpack.c.bf16 %v253_v1, %v253_v1  ;;  %v6130_v4 = vld [vmem:[%s7510_s1 + $0x20] sm:$0xff]  }
  0x32   : > { %5565 = vmatprep.mubr.bf16.mxu0 %v4799_v25  ;;  %v630_v3 = vsel %vm6451_vm9, %v625_v55, %v629_v32  ;;  %v644_v9 = vsel %vm6451_vm9, %v639_v62, %v643_v49  ;;  %316 = vst [vmem:[#allocation2 + $0x34] sm:$0x1] %v315_v16  ;;  %319 = vst [vmem:[#allocation2 + $0x3c] sm:$0x1] %v318_v19  ;;  %v1025_v5 = vrot.slane %v6479_v26, 5 }
  0x33   : > { %v4800_v17 = vcombine.low %v630_v3, %v644_v9  ;;  %v5323_v21 = vpack.c.bf16 %v254_v12, %v254_v12  ;;  %v464_v22 = vshrl.u32 %v5322_v20, 16  ;;  %v467_v23 = vshll.u32 %v5322_v20, 16  ;;  %v986_v13 = vld [vmem:[#allocation2 + $0x10] sm:$0xe]  ;;  %v987_v16 = vld [vmem:[#allocation2 + $0x18] sm:$0xe] }
  0x34   : > { %v1021_v3 = vrot.slane %v6467_v11, 5  ;;  %v6131_v11 = vld [vmem:[%s7510_s1 + $0x28] sm:$0xff]  }
  0x35   : > { %5566 = vmatmul.mubr.bf16.vlgmr.msra.gmra.mrb[0].mxu0 %v4800_v17  ;;  %v472_v25 = vshrl.u32 %v5323_v21, 16  ;;  %v6512_v27 = vld [vmem:[#allocation2 + $0x20] sm:$0xf]  ;;  %v466_v28 = vrot.slane %v464_v22, 7  ;;  %v475_v29 = vshll.u32 %v5323_v21, 16  ;;  %v4825_v17 = vrot.slane %v986_v13, 9 }
  0x36   : > { %5574 = vmatpush3.bf16.msra.mxu0 %v6421_v14  ;;  %v646_v31 = vshrl.u32 %v6512_v27, 16  ;;  %v649_v32 = vshll.u32 %v6512_v27, 16  ;;  %v6518_v36 = vld [vmem:[#allocation2 + $0x28] sm:$0xf]  ;;  %v542_v59 = vld [vmem:[#allocation2 + $0x38] sm:$0xf] }
  0x37   : > { %5575 = vmatprep.subr.bf16.mxu0 %v6127_v18  ;;  %v6514_v30 = vld [vmem:[#allocation2 + $0x24] sm:$0x1]  ;;  %v474_v35 = vrot.slane %v472_v25, 7  ;;  %v469_v38 = vor.u32 %v467_v23, %v466_v28  ;;  %v470_v39 = vrot.slane %v466_v28, 4  ;;  %v660_v42 = vshrl.u32 %v6518_v36, 16 }
  0x38   : > { %v6520_v14 = vld [vmem:[#allocation2 + $0x2c] sm:$0x1]  ;;  %v655_v37 = vshll.u32 %v6514_v30, 16  ;;  %v648_v40 = vrot.slane %v646_v31, 4  ;;  %v651_v41 = vrot.slane %v649_v32, 5  ;;  %v663_v43 = vshll.u32 %v6518_v36, 16 }
  0x39   : > { %v536_v45 = vld [vmem:[#allocation2 + $0x30] sm:$0xf]  ;;  %v669_v49 = vshll.u32 %v6520_v14, 16  ;;  %v477_v51 = vor.u32 %v475_v29, %v474_v35  ;;  %v478_v52 = vrot.slane %v474_v35, 4  ;;  %v539_v53 = vld [vmem:[#allocation2 + $0x34] sm:$0x1]  ;;  %v6556_v20 = vsel %vm6545_vm12, %v4825_v17, %v1021_v3 }
  0x3a   : > { %5576 = vmatpush3.bf16.msra.mxu0 %v6127_v18  ;;  %v657_v47 = vrot.slane %v655_v37, 5  ;;  %v652_v54 = vor.u32 %v651_v41, %v648_v40  ;;  %v662_v55 = vrot.slane %v660_v42, 4  ;;  %v665_v56 = vrot.slane %v663_v43, 5  ;;  %v545_v60 = vld [vmem:[#allocation2 + $0x3c] sm:$0x1]  ;;  %v6132_v37 = vld [vmem:[%s7510_s1 + $0x30] sm:$0xff]  }
  0x3b   : > { %5577 = vmatprep.subr.bf16.mxu0 %v6128_v24  ;;  %v537_v57 = vsel %vm6395_vm6, %v469_v38, %v536_v45  ;;  %v540_v61 = vsel %vm6353_vm2, %v470_v39, %v539_v53  ;;  %v543_v62 = vsel %vm6395_vm6, %v477_v51, %v542_v59  ;;  %v546_v63 = vsel %vm6353_vm2, %v478_v52, %v545_v60  ;;  %v6133_v51 = vld [vmem:[%s7510_s1 + $0x38] sm:$0xff]   ;;  %v6135_v59 = vld [vmem:[%s7510_s1 + $0x80] sm:$0xff]  }
  0x3c   : > { %538 = vst [vmem:[#allocation2 + $0x30] sm:$0xf] %v537_v57  ;;  %v653_v0 = vrot.slane %v652_v54, 4  ;;  %v666_v1 = vor.u32 %v665_v56, %v662_v55  ;;  %v671_v2 = vrot.slane %v669_v49, 5  ;;  %541 = vst [vmem:[#allocation2 + $0x34] sm:$0x1] %v540_v61  ;;  %v4811_v56 = vcombine.low %v6387_v44, %v6435_v33 }
  0x3d   : > { %544 = vst [vmem:[#allocation2 + $0x38] sm:$0xf] %v543_v62  ;;  %547 = vst [vmem:[#allocation2 + $0x3c] sm:$0x1] %v546_v63  ;;  %v4826_v18 = vrot.slane %v987_v16, 9  ;;  %v4812_v62 = vcombine.low %v6462_v7, %v6464_v8  ;;  %v1013_v63 = vrot.slane %v6399_v50, 5 }
  0x3e   : > { %5578 = vmatpush3.bf16.msra.mxu0 %v6128_v24  ;;  %v658_v6 = vsel %vm6451_vm9, %v653_v0, %v657_v47  ;;  %v667_v9 = vrot.slane %v666_v1, 4  ;;  %v984_v60 = vld [vmem:[#allocation2] sm:$0xe]  ;;  %v985_v61 = vld [vmem:[#allocation2 + $0x8] sm:$0xe]  ;;  %v1017_v44 = vrot.slane %v6437_v34, 5  ;;  %v4813_v0 = vcombine.low %v6512_v27, %v6518_v36 }
  0x3f   : > { %5579 = vmatprep.subr.bf16.mxu0 %v6129_v46  ;;  %v6562_v22 = vsel %vm6545_vm12, %v4826_v18, %v1025_v5  ;;  %v6137_v33 = vld [vmem:[%s7510_s1 + $0x88] sm:$0xff]   ;;  %v213_v1 = vld [vmem:[%s6343_s26 + $0xe0] sm:$0xff]  ;;  %v4823_v3 = vrot.slane %v984_v60, 9  ;;  %v4773_v5 = vld [vmem:[%s6343_s26 + $0xf0] sm:$0xff] }
  0x40   : > { %v672_v26 = vsel %vm6451_vm9, %v667_v9, %v671_v2  ;;  %v4848_v28 = vcombine.low %v6556_v20, %v6562_v22  ;;  %v214_v2 = vld [vmem:[%s6343_s26 + $0xe8] sm:$0xff]  ;;  %v288_v9 = vld [vmem:[#allocation2 + $0x40] sm:$0x1]  ;;  %v246_v13 = vmax.f32 %v213_v1, %v4773_v5  ;;  %v6138_v8 = vld [vmem:[%s7510_s1 + $0x90] sm:$0xff]  }
  0x41   : > { %v4801_v19 = vcombine.low %v658_v6, %v672_v26  ;;  %v4774_v6 = vld [vmem:[%s6343_s26 + $0xf8] sm:$0xff]  ;;  %v289_v50 = vsel %vm6353_vm2, 0, %v288_v9  ;;  %v1014_v27 = vsel %vm6545_vm12, %v4823_v3, %v1013_v63  ;;  %v6148_v63 = vld [vmem:[%s7510_s1 + $0xd0] sm:$0xff]   ;;  %v1367_v22 = vld [vmem:[#allocation2 + $0x8] sm:$0xf] }
  0x42   : > { %5580 = vmatpush3.bf16.msra.mxu0 %v6129_v46  ;;  %v247_v7 = vmax.f32 %v214_v2, %v4774_v6  ;;  %290 = vst [vmem:[#allocation2 + $0x40] sm:$0x1] %v289_v50  ;;  %v6154_v20 = vld [vmem:[#allocation2 + $0x8] ss:$8 sps:$4 sm:$0xff]   ;;  %v1384_v1 = vshrl.u32 %v1367_v22, 16  ;;  %v1387_v3 = vshll.u32 %v1367_v22, 16 }
  0x43   : > { %5581 = vmatprep.subr.bf16.mxu0 %v6130_v4  ;;  %v6558_v21 = vld [vmem:[#allocation2 + $0x30] sm:$0xf]  ;;  %5569 = vmatprep.mubr.bf16.mxu0 %v4801_v19  ;;  %v6566_v24 = vld [vmem:[#allocation2 + $0x34] sm:$0x1]  ;;  %v6139_v19 = vld [vmem:[%s7510_s1 + $0x98] sm:$0xff]  }
  0x44   : > { %v6564_v23 = vld [vmem:[#allocation2 + $0x38] sm:$0xf]  ;;  %v6568_v25 = vld [vmem:[#allocation2 + $0x3c] sm:$0x1]  ;;  %v674_v29 = vshrl.u32 %v6558_v21, 16  ;;  %v677_v31 = vshll.u32 %v6558_v21, 16  ;;  %v255_v34 = vmax.f32 %v246_v13, %v247_v7 }
  0x45   : > { %v683_v32 = vshll.u32 %v6566_v24, 16  ;;  %v688_v35 = vshrl.u32 %v6564_v23, 16  ;;  %v691_v38 = vshll.u32 %v6564_v23, 16  ;;  %v697_v39 = vshll.u32 %v6568_v25, 16  ;;  %v6151_v2 = vld [vmem:[%s7510_s1 + $0xe8] sm:$0xff]   ;;  %v6152_v13 = vld [vmem:[%s7510_s1 + $0xf0] sm:$0xff]  }
  0x46   : > { %5582 = vmatpush3.bf16.msra.mxu0 %v6130_v4  ;;  %v676_v40 = vrot.slane %v674_v29, 4  ;;  %v679_v41 = vrot.slane %v677_v31, 5  ;;  %v4824_v4 = vrot.slane %v985_v61, 9  ;;  %v5324_v16 = vpack.c.bf16 %v255_v34, %v255_v34  ;;  %v291_v5 = vld [vmem:[#allocation2 + $0x48] sm:$0x1] }
  0x47   : > { %5583 = vmatprep.subr.bf16.mxu0 %v6131_v11  ;;  %v690_v42 = vrot.slane %v688_v35, 4  ;;  %v693_v43 = vrot.slane %v691_v38, 5  ;;  %v685_v46 = vrot.slane %v683_v32, 5  ;;  %v699_v49 = vrot.slane %v697_v39, 5  ;;  %v6141_v35 = vld [vmem:[%s7510_s1 + $0xa8] sm:$0xff]   ;;  %v6143_v38 = vld [vmem:[%s7510_s1 + $0xb0] sm:$0xff]  }
  0x48   : > { %v680_v45 = vor.u32 %v679_v41, %v676_v40  ;;  %v1018_v36 = vsel %vm6545_vm12, %v4824_v4, %v1017_v44  ;;  %v4814_v17 = vcombine.low %v6558_v21, %v6564_v23  ;;  %v480_v26 = vshrl.u32 %v5324_v16, 16  ;;  %v6140_v21 = vld [vmem:[%s7510_s1 + $0xa0] sm:$0xff]   ;;  %v989_v41 = vld [vmem:[#allocation2 + $0x28] sm:$0xe]  ;;  %v6149_v44 = vld [vmem:[%s7510_s1 + $0xd8] sm:$0xff]  }
  0x49   : > { %v694_v47 = vor.u32 %v693_v43, %v690_v42  ;;  %v483_v18 = vshll.u32 %v5324_v16, 16  ;;  %v548_v31 = vld [vmem:[#allocation2 + $0x40] sm:$0xf]  ;;  %v6145_v42 = vld [vmem:[%s7510_s1 + $0xb8] sm:$0xff]   ;;  %v292_v9 = vsel %vm6353_vm2, 0, %v291_v5  ;;  %v1386_v34 = vrot.slane %v1384_v1, 4 }
  0x4a   : > { %5584 = vmatpush3.bf16.msra.mxu0 %v6131_v11  ;;  %v681_v52 = vrot.slane %v680_v45, 4  ;;  %v4847_v11 = vcombine.low %v1014_v27, %v1018_v36  ;;  %v482_v29 = vrot.slane %v480_v26, 7  ;;  %v988_v40 = vld [vmem:[#allocation2 + $0x20] sm:$0xe]  ;;  %v1029_v45 = vrot.slane %v6514_v30, 5 }
  0x4b   : > { %5585 = vmatprep.subr.bf16.mxu0 %v6132_v37  ;;  %v695_v53 = vrot.slane %v694_v47, 4  ;;  %v4827_v43 = vrot.slane %v988_v40, 9  ;;  %v1033_v47 = vrot.slane %v6520_v14, 5  ;;  %v1037_v30 = vrot.slane %v6566_v24, 5  ;;  %293 = vst [vmem:[#allocation2 + $0x48] sm:$0x1] %v292_v9 }
  0x4c   : > { %v686_v54 = vsel %vm6451_vm9, %v681_v52, %v685_v46  ;;  %v485_v32 = vor.u32 %v483_v18, %v482_v29  ;;  %v4828_v46 = vrot.slane %v989_v41, 9  ;;  %v990_v52 = vld [vmem:[#allocation2 + $0x30] sm:$0xe]  ;;  %v1041_v14 = vrot.slane %v6568_v25, 5  ;;  %v6676_v7 = vld [vmem:[#allocation2 + $0xc] sm:$0x1] }
  0x4d   : > { %v700_v55 = vsel %vm6451_vm9, %v695_v53, %v699_v49  ;;  %v486_v49 = vrot.slane %v482_v29, 4  ;;  %v1030_v53 = vsel %vm6545_vm12, %v4827_v43, %v1029_v45  ;;  %v4829_v60 = vrot.slane %v990_v52, 9  ;;  %v6678_v50 = vld [vmem:[#allocation2 + $0x14] sm:$0x1]  ;;  %v1371_v16 = vld [vmem:[#allocation2 + $0x18] sm:$0xf] }
  0x4e   : > { %5586 = vmatpush3.bf16.msra.mxu0 %v6132_v37  ;;  %v4802_v57 = vcombine.low %v686_v54, %v700_v55  ;;  %v549_v23 = vsel %vm6395_vm6, %v485_v32, %v548_v31  ;;  %v320_v37 = vld [vmem:[#allocation2 + $0x44] sm:$0x1]  ;;  %v1034_v54 = vsel %vm6545_vm12, %v4828_v46, %v1033_v47  ;;  %v991_v55 = vld [vmem:[#allocation2 + $0x38] sm:$0xe]  ;;  %v1407_v26 = vshll.u32 %v6678_v50, 16  ;;  %v6157_v40 = vld [vmem:[%s7510_s1 + $0x108] sm:$0xff]  }
  0x4f   : > { %5587 = vmatprep.subr.bf16.mxu0 %v6133_v51  ;;  %550 = vst [vmem:[#allocation2 + $0x40] sm:$0xf] %v549_v23  ;;  %v321_v39 = vsel %vm6361_vm4, 0, %v320_v37  ;;  %v4830_v61 = vrot.slane %v991_v55, 9  ;;  %v1038_v24 = vsel %vm6545_vm12, %v4829_v60, %v1037_v30  ;;  %v1373_v29 = vld [vmem:[#allocation2 + $0x20] sm:$0xf] }
  0x50   : > { %5570 = vmatmul.mubr.bf16.gmra.mrb[4].mxu0 %v4802_v57  ;;  %322 = vst [vmem:[#allocation2 + $0x44] sm:$0x1] %v321_v39  ;;  %v1412_v31 = vshrl.u32 %v1371_v16, 16  ;;  %v6155_v32 = vld [vmem:[%s7510_s1 + $0x100] sm:$0xff]   ;;  %v6162_v23 = vld [vmem:[#allocation2 + $0x28] ss:$8 sps:$4 sm:$0xff]  }
  0x51   : > { %5589 = vmatprep.mubr.bf16.mxu0 %v4811_v56  ;;  %v1042_v25 = vsel %vm6545_vm12, %v4830_v61, %v1041_v14  ;;  %v1409_v37 = vrot.slane %v1407_v26, 5  ;;  %v1426_v39 = vshrl.u32 %v1373_v29, 16  ;;  %v1429_v45 = vshll.u32 %v1373_v29, 16  ;;  %v1375_v46 = vld [vmem:[#allocation2 + $0x28] sm:$0xf]  ;;  %v6158_v52 = vld [vmem:[%s7510_s1 + $0x110] sm:$0xff]  }
  0x52   : > { %5588 = vmatpush3.bf16.msra.mxu0 %v6133_v51  ;;  %v6146_v51 = vld [vmem:[%s7510_s1 + $0xc0] sm:$0xff]   ;;  %v1414_v43 = vrot.slane %v1412_v31, 4  ;;  %v1377_v47 = vld [vmem:[#allocation2 + $0x30] sm:$0xf]  ;;  %v1443_v55 = vshll.u32 %v1375_v46, 16 }
  0x53   : > { %5597 = vmatprep.subr.bf16.mxu0 %v6135_v59  ;;  %v6712_v1 = vld [vmem:[#allocation2 + $0x34] sm:$0x1] }
  0x57   : > { %v551_v56 = vld [vmem:[#allocation2 + $0x44] sm:$0x1] }
  0x58   : > { %5590 = vmatmul.mubr.bf16.vlgmr.msra.gmra.mrb[0].mxu0 %v4812_v62  ;;  %v552_v57 = vsel %vm6353_vm2, %v486_v49, %v551_v56  ;;  %v6147_v62 = vld [vmem:[%s7510_s1 + $0xc8] sm:$0xff]   ;;  %v1454_v56 = vshrl.u32 %v1377_v47, 16 }
  0x59   : > { %5598 = vmatpush3.bf16.msra.mxu0 %v6135_v59  ;;  %5593 = vmatprep.mubr.bf16.mxu0 %v4813_v0  ;;  %553 = vst [vmem:[#allocation2 + $0x44] sm:$0x1] %v552_v57  ;;  %v4849_v59 = vcombine.low %v1030_v53, %v1034_v54  ;;  %v6150_v0 = vld [vmem:[%s7510_s1 + $0xe0] sm:$0xff]   ;;  %v1431_v53 = vrot.slane %v1429_v45, 5  ;;  %v1440_v54 = vshrl.u32 %v1375_v46, 16  ;;  %v6165_v45 = vld [vmem:[%s7510_s1 + $0x138] sm:$0xff]  }
  0x5a   : > { %5599 = vmatprep.subr.bf16.mxu0 %v6137_v33  ;;  %v6164_v57 = vld [vmem:[#allocation2 + $0x38] ss:$8 sps:$4 sm:$0xff]  }
  0x5b   : > { %v1442_v61 = vrot.slane %v1440_v54, 4 }
  0x5d   : > { %5600 = vmatpush3.bf16.msra.mxu0 %v6137_v33  ;;  %v4850_v33 = vcombine.low %v1038_v24, %v1042_v25  ;;  %v6701_v24 = vld [vmem:[#allocation2 + $0x1c] sm:$0x1]  ;;  %v323_v25 = vld [vmem:[#allocation2 + $0x4c] sm:$0x1] }
  0x5e   : > { %5601 = vmatprep.subr.bf16.mxu0 %v6138_v8  ;;  %v324_v22 = vsel %vm6361_vm4, 0, %v323_v25 }
  0x5f   : > { %325 = vst [vmem:[#allocation2 + $0x4c] sm:$0x1] %v324_v22 }
  0x60   : > { %5594 = vmatmul.mubr.bf16.gmra.mrb[4].mxu0 %v4814_v17  ;;  %v6153_v17 = vld [vmem:[%s7510_s1 + $0xf8] sm:$0xff]   ;;  %v6730_v46 = vld [vmem:[#allocation2 + $0x44] sm:$0x1] }
  0x61   : > { %5602 = vmatpush3.bf16.msra.mxu0 %v6138_v8  ;;  %5613 = vmatprep.mubr.bf16.mxu0 %v4847_v11  ;;  %v1389_v8 = vrot.slane %v1387_v3, 5  ;;  %v1393_v11 = vshll.u32 %v6676_v7, 16  ;;  %v1379_v3 = vld [vmem:[#allocation2 + $0x38] sm:$0xf] }
  0x62   : > { %5603 = vmatprep.subr.bf16.mxu0 %v6139_v19 }
  0x63   : > { %v1390_v18 = vor.u32 %v1389_v8, %v1386_v34  ;;  %v6161_v34 = vld [vmem:[%s7510_s1 + $0x128] sm:$0xff]  }
  0x65   : > { %5604 = vmatpush3.bf16.msra.mxu0 %v6139_v19  ;;  %v1391_v41 = vrot.slane %v1390_v18, 4 }
  0x66   : > { %5605 = vmatprep.subr.bf16.mxu0 %v6140_v21 }
  0x69   : > { %5606 = vmatpush3.bf16.msra.mxu0 %v6140_v21  ;;  %v6156_v21 = vld [vmem:[#allocation2 + $0x18] ss:$8 sps:$4 sm:$0xff]  }
  0x6a   : > { %5607 = vmatprep.subr.bf16.mxu0 %v6141_v35 }
  0x6d   : > { %5608 = vmatpush3.bf16.msra.mxu0 %v6141_v35  ;;  %v1395_v35 = vrot.slane %v1393_v11, 5  ;;  %v1471_v11 = vshll.u32 %v1379_v3, 16 }
  0x6e   : > { %5609 = vmatprep.subr.bf16.mxu0 %v6143_v38 }
  0x6f   : > { %v1396_v30 = vsel %vm6451_vm9, %v1391_v41, %v1395_v35  ;;  %v1473_v41 = vrot.slane %v1471_v11, 5 }
  0x71   : > { %5610 = vmatpush3.bf16.msra.mxu0 %v6143_v38  ;;  %v1415_v38 = vshll.u32 %v1371_v16, 16  ;;  %v6721_v16 = vld [vmem:[#allocation2 + $0x3c] sm:$0x1] }
  0x72   : > { %5611 = vmatprep.subr.bf16.mxu0 %v6145_v42 }
  0x73   : > { %v1417_v49 = vrot.slane %v1415_v38, 5 }
  0x75   : > { %5612 = vmatpush3.bf16.msra.mxu0 %v6145_v42  ;;  %v1418_v5 = vor.u32 %v1417_v49, %v1414_v43  ;;  %v1650_v49 = vld [vmem:[#allocation2 + $0x10] sm:$0xe] }
  0x76   : > { %5621 = vmatprep.subr.bf16.mxu0 %v6146_v51  ;;  %v4916_v25 = vrot.slane %v1650_v49, 9 }
  0x77   : > { %v1419_v31 = vrot.slane %v1418_v5, 4  ;;  %v1654_v5 = vld [vmem:[#allocation2 + $0x30] sm:$0xe] }
  0x78   : > { %5614 = vmatmul.mubr.bf16.vlgmr.msra.gmra.mrb[0].mxu0 %v4848_v28  ;;  %v1369_v28 = vld [vmem:[#allocation2 + $0x10] sm:$0xf] }
  0x79   : > { %5622 = vmatpush3.bf16.msra.mxu0 %v6146_v51  ;;  %5617 = vmatprep.mubr.bf16.mxu0 %v4849_v59  ;;  %v1398_v4 = vshrl.u32 %v1369_v28, 16  ;;  %v1401_v6 = vshll.u32 %v1369_v28, 16  ;;  %v1428_v51 = vrot.slane %v1426_v39, 4  ;;  %v6159_v59 = vld [vmem:[%s7510_s1 + $0x118] sm:$0xff]   ;;  %v1456_v28 = vrot.slane %v1454_v56, 4 }
  0x7a   : > { %5623 = vmatprep.subr.bf16.mxu0 %v6147_v62  ;;  %v1477_v39 = vshll.u32 %v6721_v16, 16  ;;  %v1675_v56 = vrot.slane %v6676_v7, 5  ;;  %v6748_v7 = vld [vmem:[#allocation2 + $0x20] sm:$0xe] }
  0x7b   : > { %v1400_v27 = vrot.slane %v1398_v4, 4  ;;  %v1403_v36 = vrot.slane %v1401_v6, 5  ;;  %v1381_v4 = vld [vmem:[#allocation2 + $0x40] sm:$0xf]  ;;  %v1432_v6 = vor.u32 %v1431_v53, %v1428_v51 }
  0x7c   : > { %v1482_v26 = vshrl.u32 %v1381_v4, 16  ;;  %v1485_v18 = vshll.u32 %v1381_v4, 16 }
  0x7d   : > { %5624 = vmatpush3.bf16.msra.mxu0 %v6147_v62  ;;  %v1404_v19 = vor.u32 %v1403_v36, %v1400_v27  ;;  %v1457_v62 = vshll.u32 %v1377_v47, 16  ;;  %v1463_v36 = vshll.u32 %v6712_v1, 16  ;;  %v1649_v47 = vld [vmem:[#allocation2 + $0x8] sm:$0xe] }
  0x7e   : > { %5625 = vmatprep.subr.bf16.mxu0 %v6148_v63  ;;  %v1487_v43 = vrot.slane %v1485_v18, 5  ;;  %v1699_v18 = vrot.slane %v6721_v16, 5  ;;  %v340_v16 = vld [vmem:[#allocation3 + $0x18] sm:$0x1] }
  0x7f   : > { %v1405_v42 = vrot.slane %v1404_v19, 4  ;;  %v6163_v19 = vld [vmem:[%s7510_s1 + $0x130] sm:$0xff]   ;;  %v1465_v38 = vrot.slane %v1463_v36, 5 }
  0x80   : > { %5618 = vmatmul.mubr.bf16.gmra.mrb[4].mxu0 %v4850_v33  ;;  %v6708_v33 = vld [vmem:[#allocation2 + $0x2c] sm:$0x1]  ;;  %v6168_v36 = vld [vmem:[%s7510_s1 + $0x150] sm:$0xff]  }
  0x81   : > { %5626 = vmatpush3.bf16.msra.mxu0 %v6148_v63  ;;  %5637 = vmatprep.mubr.bf16.mxu0 %v6154_v20  ;;  %v1410_v14 = vsel %vm6451_vm9, %v1405_v42, %v1409_v37  ;;  %v6160_v63 = vld [vmem:[%s7510_s1 + $0x120] sm:$0xff]   ;;  %v1445_v20 = vrot.slane %v1443_v55, 5  ;;  %v1484_v42 = vrot.slane %v1482_v26, 4  ;;  %v1695_v26 = vrot.slane %v6712_v1, 5 }
  0x82   : > { %5627 = vmatprep.subr.bf16.mxu0 %v6149_v44  ;;  %v4903_v60 = vcombine.low %v1396_v30, %v1410_v14  ;;  %v1679_v30 = vrot.slane %v6678_v50, 5  ;;  %v6166_v14 = vld [vmem:[%s7510_s1 + $0x140] sm:$0xff]   ;;  %v1683_v50 = vrot.slane %v6701_v24, 5 }
  0x83   : > { %v1446_v8 = vor.u32 %v1445_v20, %v1442_v61  ;;  %v1488_v53 = vor.u32 %v1487_v43, %v1484_v42  ;;  %v4915_v61 = vrot.slane %v1649_v47, 9  ;;  %v6170_v1 = vld [vmem:[%s7510_s1 + $0x160] sm:$0xff]  }
  0x84   : > { %v6174_v42 = vld [vmem:[%s7510_s1 + $0x180] sm:$0xff]  }
  0x85   : > { %5628 = vmatpush3.bf16.msra.mxu0 %v6149_v44  ;;  %v6706_v44 = vld [vmem:[#allocation2 + $0x24] sm:$0x1]  ;;  %v1447_v35 = vrot.slane %v1446_v8, 4  ;;  %v4918_v8 = vrot.slane %v6748_v7, 9 }
  0x86   : > { %5629 = vmatprep.subr.bf16.mxu0 %v6150_v0  ;;  %v1435_v9 = vshll.u32 %v6706_v44, 16  ;;  %v1687_v20 = vrot.slane %v6706_v44, 5  ;;  %v1680_v44 = vsel %vm6545_vm12, %v4916_v25, %v1679_v30  ;;  %v6182_v30 = vld [vmem:[#allocation2 + $0x10] ss:$8 sps:$4 sm:$0xff]  }
  0x89   : > { %5630 = vmatpush3.bf16.msra.mxu0 %v6150_v0  ;;  %v1459_v0 = vrot.slane %v1457_v62, 5 }
  0x8a   : > { %5631 = vmatprep.subr.bf16.mxu0 %v6151_v2 }
  0x8b   : > { %v1460_v27 = vor.u32 %v1459_v0, %v1456_v28  ;;  %v6167_v28 = vld [vmem:[%s7510_s1 + $0x148] sm:$0xff]   ;;  %v1489_v0 = vrot.slane %v1488_v53, 4 }
  0x8d   : > { %5632 = vmatpush3.bf16.msra.mxu0 %v6151_v2  ;;  %v1421_v2 = vshll.u32 %v6701_v24, 16  ;;  %v1461_v37 = vrot.slane %v1460_v27, 4  ;;  %v1676_v24 = vsel %vm6545_vm12, %v4915_v61, %v1675_v56  ;;  %v1691_v27 = vrot.slane %v6708_v33, 5  ;;  %v2032_v61 = vld [vmem:[#allocation2 + $0x18] sm:$0xf] }
  0x8e   : > { %5633 = vmatprep.subr.bf16.mxu0 %v6152_v13  ;;  %v2061_v7 = vshrl.u32 %v2032_v61, 16 }
  0x8f   : > { %v1423_v29 = vrot.slane %v1421_v2, 5 }
  0x91   : > { %5634 = vmatpush3.bf16.msra.mxu0 %v6152_v13  ;;  %v1449_v13 = vshll.u32 %v6708_v33, 16  ;;  %v1424_v54 = vsel %vm6451_vm9, %v1419_v31, %v1423_v29  ;;  %v1703_v31 = vrot.slane %v6730_v46, 5 }
  0x92   : > { %5635 = vmatprep.subr.bf16.mxu0 %v6153_v17 }
  0x95   : > { %5636 = vmatpush3.bf16.msra.mxu0 %v6153_v17  ;;  %v1468_v17 = vshrl.u32 %v1379_v3, 16  ;;  %v1653_v3 = vld [vmem:[#allocation2 + $0x28] sm:$0xe] }
  0x96   : > { %5645 = vmatprep.subr.bf16.mxu0 %v6155_v32  ;;  %v4919_v11 = vrot.slane %v1653_v3, 9  ;;  %v6833_v3 = vld [vmem:[#allocation2 + $0x14] sm:$0x1] }
  0x98   : > { %5638 = vmatmul.mubr.bf16.vlgmr.msra.gmra.mrb[0].mxu0 %v6156_v21  ;;  %v1437_v21 = vrot.slane %v1435_v9, 5  ;;  %v6757_v9 = vld [vmem:[#allocation2 + $0x40] sm:$0xe] }
  0x99   : > { %5646 = vmatpush3.bf16.msra.mxu0 %v6155_v32  ;;  %5641 = vmatprep.mubr.bf16.mxu0 %v6162_v23  ;;  %v1433_v32 = vrot.slane %v1432_v6, 4  ;;  %v1451_v23 = vrot.slane %v1449_v13, 5  ;;  %v6755_v6 = vld [vmem:[#allocation2 + $0x38] sm:$0xe]  ;;  %v4922_v33 = vrot.slane %v6757_v9, 9  ;;  %v2056_v9 = vshll.u32 %v6833_v3, 16 }
  0x9a   : > { %5647 = vmatprep.subr.bf16.mxu0 %v6157_v40  ;;  %v4921_v29 = vrot.slane %v6755_v6, 9 }
  0x9b   : > { %v1438_v55 = vsel %vm6451_vm9, %v1433_v32, %v1437_v21  ;;  %v6169_v32 = vld [vmem:[%s7510_s1 + $0x158] sm:$0xff]  }
  0x9c   : > { %v4904_v22 = vcombine.low %v1424_v54, %v1438_v55  ;;  %v1700_v53 = vsel %vm6545_vm12, %v4921_v29, %v1699_v18  ;;  %v1704_v54 = vsel %vm6545_vm12, %v4922_v33, %v1703_v31  ;;  %v6176_v55 = vld [vmem:[%s7510_s1 + $0x190] sm:$0xff]   ;;  %v6192_v29 = vld [vmem:[#allocation2 + $0x40] ss:$8 sps:$4 sm:$0xff]  }
  0x9d   : > { %5648 = vmatpush3.bf16.msra.mxu0 %v6157_v40  ;;  %v1470_v40 = vrot.slane %v1468_v17, 4  ;;  %v4942_v56 = vcombine.low %v1700_v53, %v1704_v54  ;;  %v2034_v31 = vld [vmem:[#allocation2 + $0x20] sm:$0xf] }
  0x9e   : > { %5649 = vmatprep.subr.bf16.mxu0 %v6158_v52  ;;  %v2042_v54 = vld [vmem:[#allocation2 + $0x40] sm:$0xf] }
  0x9f   : > { %v1474_v51 = vor.u32 %v1473_v41, %v1470_v40  ;;  %v6172_v40 = vld [vmem:[%s7510_s1 + $0x170] sm:$0xff]   ;;  %v6173_v41 = vld [vmem:[%s7510_s1 + $0x178] sm:$0xff]  }
  0xa0   : > { %5642 = vmatmul.mubr.bf16.gmra.mrb[4].mxu0 %v6164_v57  ;;  %v1452_v57 = vsel %vm6451_vm9, %v1447_v35, %v1451_v23  ;;  %v4939_v23 = vcombine.low %v1676_v24, %v1680_v44  ;;  %v370_v35 = vld [vmem:[#allocation3 + $0x1c] sm:$0x1] }
  0xa1   : > { %5650 = vmatpush3.bf16.msra.mxu0 %v6158_v52  ;;  %5661 = vmatprep.mubr.bf16.mxu0 %v4903_v60  ;;  %v1491_v52 = vshll.u32 %v6730_v46, 16  ;;  %v1479_v60 = vrot.slane %v1477_v39, 5  ;;  %v1475_v62 = vrot.slane %v1474_v51, 4  ;;  %v6171_v39 = vld [vmem:[%s7510_s1 + $0x168] sm:$0xff]   ;;  %v1692_v46 = vsel %vm6545_vm12, %v4919_v11, %v1691_v27 }
  0xa2   : > { %5651 = vmatprep.subr.bf16.mxu0 %v6159_v59  ;;  %v6175_v51 = vld [vmem:[%s7510_s1 + $0x188] sm:$0xff]  }
  0xa3   : > { %v1493_v2 = vrot.slane %v1491_v52, 5  ;;  %v1480_v13 = vsel %vm6451_vm9, %v1475_v62, %v1479_v60  ;;  %v2030_v60 = vld [vmem:[#allocation2 + $0x10] sm:$0xf] }
  0xa4   : > { %v6180_v62 = vld [vmem:[%s7510_s1 + $0x1b0] sm:$0xff]   ;;  %v2047_v25 = vshrl.u32 %v2030_v60, 16 }
  0xa5   : > { %5652 = vmatpush3.bf16.msra.mxu0 %v6159_v59  ;;  %v1466_v59 = vsel %vm6451_vm9, %v1461_v37, %v1465_v38  ;;  %v1494_v17 = vsel %vm6451_vm9, %v1489_v0, %v1493_v2  ;;  %v341_v37 = vsel %vm6353_vm2, 0, %v340_v16  ;;  %v371_v38 = vsel %vm6361_vm4, 0, %v370_v35 }
  0xa6   : > { %5653 = vmatprep.subr.bf16.mxu0 %v6160_v63  ;;  %v4905_v4 = vcombine.low %v1452_v57, %v1466_v59  ;;  %v4906_v21 = vcombine.low %v1480_v13, %v1494_v17  ;;  %342 = vst [vmem:[#allocation3 + $0x18] sm:$0x1] %v341_v37  ;;  %372 = vst [vmem:[#allocation3 + $0x1c] sm:$0x1] %v371_v38  ;;  %v6178_v57 = vld [vmem:[%s7510_s1 + $0x1a0] sm:$0xff]   ;;  %v6179_v59 = vld [vmem:[%s7510_s1 + $0x1a8] sm:$0xff]  }
  0xa7   : > { %v2063_v0 = vrot.slane %v2061_v7, 4  ;;  %v6184_v13 = vld [vmem:[#allocation2 + $0x20] ss:$8 sps:$4 sm:$0xff]   ;;  %v2075_v16 = vshrl.u32 %v2034_v31, 16  ;;  %v2078_v35 = vshll.u32 %v2034_v31, 16 }
  0xa9   : > { %5654 = vmatpush3.bf16.msra.mxu0 %v6160_v63  ;;  %v6746_v63 = vld [vmem:[#allocation2 + $0x18] sm:$0xe] }
  0xaa   : > { %5655 = vmatprep.subr.bf16.mxu0 %v6161_v34 }
  0xad   : > { %5656 = vmatpush3.bf16.msra.mxu0 %v6161_v34  ;;  %v4917_v34 = vrot.slane %v6746_v63, 9  ;;  %v2050_v63 = vshll.u32 %v2030_v60, 16  ;;  %v6867_v60 = vld [vmem:[#allocation2 + $0x3c] sm:$0x1] }
  0xae   : > { %5657 = vmatprep.subr.bf16.mxu0 %v6163_v19 }
  0xaf   : > { %v1684_v43 = vsel %vm6545_vm12, %v4917_v34, %v1683_v50  ;;  %v2064_v50 = vshll.u32 %v2032_v61, 16  ;;  %v6190_v34 = vld [vmem:[#allocation2 + $0x30] ss:$8 sps:$4 sm:$0xff]  }
  0xb1   : > { %5658 = vmatpush3.bf16.msra.mxu0 %v6163_v19  ;;  %v4920_v19 = vrot.slane %v1654_v5, 9  ;;  %v2066_v2 = vrot.slane %v2064_v50, 5  ;;  %v6183_v5 = vld [vmem:[%s7510_s1 + $0x1c0] sm:$0xff]  }
  0xb2   : > { %5659 = vmatprep.subr.bf16.mxu0 %v6165_v45 }
  0xb3   : > { %v1696_v47 = vsel %vm6545_vm12, %v4920_v19, %v1695_v26  ;;  %v2067_v24 = vor.u32 %v2066_v2, %v2063_v0  ;;  %v6186_v26 = vld [vmem:[%s7510_s1 + $0x1d0] sm:$0xff]  }
  0xb4   : > { %v4941_v52 = vcombine.low %v1692_v46, %v1696_v47  ;;  %v6861_v46 = vld [vmem:[#allocation2 + $0x24] sm:$0x1]  ;;  %v2077_v47 = vrot.slane %v2075_v16, 4 }
  0xb5   : > { %5660 = vmatpush3.bf16.msra.mxu0 %v6165_v45  ;;  %v1688_v45 = vsel %vm6545_vm12, %v4918_v8, %v1687_v20  ;;  %v6181_v20 = vld [vmem:[%s7510_s1 + $0x1b8] sm:$0xff]   ;;  %v6185_v8 = vld [vmem:[%s7510_s1 + $0x1c8] sm:$0xff]   ;;  %v2068_v17 = vrot.slane %v2067_v24, 4 }
  0xb6   : > { %5669 = vmatprep.subr.bf16.mxu0 %v6166_v14  ;;  %v4940_v49 = vcombine.low %v1684_v43, %v1688_v45  ;;  %v6189_v45 = vld [vmem:[%s7510_s1 + $0x1e8] sm:$0xff]  }
  0xb8   : > { %5662 = vmatmul.mubr.bf16.vlgmr.msra.gmra.mrb[0].mxu0 %v4904_v22  ;;  %v2049_v22 = vrot.slane %v2047_v25, 4  ;;  %v2131_v25 = vshrl.u32 %v2042_v54, 16 }
  0xb9   : > { %5670 = vmatpush3.bf16.msra.mxu0 %v6166_v14  ;;  %5665 = vmatprep.mubr.bf16.mxu0 %v4905_v4  ;;  %v6177_v14 = vld [vmem:[%s7510_s1 + $0x198] sm:$0xff]  }
  0xba   : > { %5671 = vmatprep.subr.bf16.mxu0 %v6167_v28  ;;  %v6835_v4 = vld [vmem:[#allocation2 + $0x1c] sm:$0x1] }
  0xbb   : > { %v2070_v44 = vshll.u32 %v6835_v4, 16 }
  0xbd   : > { %5672 = vmatpush3.bf16.msra.mxu0 %v6167_v28  ;;  %v2052_v28 = vrot.slane %v2050_v63, 5  ;;  %v2072_v11 = vrot.slane %v2070_v44, 5  ;;  %v2134_v63 = vshll.u32 %v2042_v54, 16  ;;  %v2338_v54 = vrot.slane %v6833_v3, 5 }
  0xbe   : > { %5673 = vmatprep.subr.bf16.mxu0 %v6168_v36 }
  0xbf   : > { %v2053_v6 = vor.u32 %v2052_v28, %v2049_v22  ;;  %v2073_v19 = vsel %vm6451_vm9, %v2068_v17, %v2072_v11  ;;  %v6191_v28 = vld [vmem:[%s7510_s1 + $0x1f0] sm:$0xff]  }
  0xc0   : > { %5666 = vmatmul.mubr.bf16.gmra.mrb[4].mxu0 %v4906_v21  ;;  %v2036_v21 = vld [vmem:[#allocation2 + $0x28] sm:$0xf] }
  0xc1   : > { %5674 = vmatpush3.bf16.msra.mxu0 %v6168_v36  ;;  %5685 = vmatprep.mubr.bf16.mxu0 %v4939_v23  ;;  %v2054_v27 = vrot.slane %v2053_v6, 4  ;;  %v2058_v36 = vrot.slane %v2056_v9, 5  ;;  %v2038_v23 = vld [vmem:[#allocation2 + $0x30] sm:$0xf]  ;;  %v2089_v37 = vshrl.u32 %v2036_v21, 16  ;;  %v2092_v38 = vshll.u32 %v2036_v21, 16 }
  0xc2   : > { %5675 = vmatprep.subr.bf16.mxu0 %v6169_v32  ;;  %v2126_v6 = vshll.u32 %v6867_v60, 16  ;;  %v6193_v9 = vld [vmem:[%s7510_s1 + $0x1f8] sm:$0xff]  }
  0xc3   : > { %v2059_v18 = vsel %vm6451_vm9, %v2054_v27, %v2058_v36  ;;  %v2094_v53 = vrot.slane %v2092_v38, 5  ;;  %v6879_v36 = vld [vmem:[#allocation2 + $0x44] sm:$0x1] }
  0xc4   : > { %v4995_v33 = vcombine.low %v2059_v18, %v2073_v19 }
  0xc5   : > { %5676 = vmatpush3.bf16.msra.mxu0 %v6169_v32  ;;  %v6187_v32 = vld [vmem:[%s7510_s1 + $0x1d8] sm:$0xff]  }
  0xc6   : > { %5677 = vmatprep.subr.bf16.mxu0 %v6170_v1 }
  0xc9   : > { %5678 = vmatpush3.bf16.msra.mxu0 %v6170_v1  ;;  %v2040_v1 = vld [vmem:[#allocation2 + $0x38] sm:$0xf] }
  0xca   : > { %5679 = vmatprep.subr.bf16.mxu0 %v6171_v39  ;;  %v2120_v43 = vshll.u32 %v2040_v1, 16 }
  0xcd   : > { %5680 = vmatpush3.bf16.msra.mxu0 %v6171_v39  ;;  %v6188_v39 = vld [vmem:[%s7510_s1 + $0x1e0] sm:$0xff]  }
  0xce   : > { %5681 = vmatprep.subr.bf16.mxu0 %v6172_v40 }
  0xd1   : > { %5682 = vmatpush3.bf16.msra.mxu0 %v6172_v40  ;;  %v2103_v40 = vshrl.u32 %v2038_v23, 16 }
  0xd2   : > { %5683 = vmatprep.subr.bf16.mxu0 %v6173_v41 }
  0xd5   : > { %5684 = vmatpush3.bf16.msra.mxu0 %v6173_v41  ;;  %v2106_v41 = vshll.u32 %v2038_v23, 16  ;;  %v2140_v23 = vshll.u32 %v6879_v36, 16 }
  0xd6   : > { %5693 = vmatprep.subr.bf16.mxu0 %v6174_v42 }
  0xd8   : > { %5686 = vmatmul.mubr.bf16.vlgmr.msra.gmra.mrb[0].mxu0 %v4940_v49  ;;  %v2080_v49 = vrot.slane %v2078_v35, 5  ;;  %v6194_v35 = vld [vmem:[%s7510_s1 + $0x200] sm:$0xff]  }
  0xd9   : > { %5694 = vmatpush3.bf16.msra.mxu0 %v6174_v42  ;;  %5689 = vmatprep.mubr.bf16.mxu0 %v4941_v52  ;;  %v2117_v42 = vshrl.u32 %v2040_v1, 16  ;;  %v2091_v52 = vrot.slane %v2089_v37, 4 }
  0xda   : > { %5695 = vmatprep.subr.bf16.mxu0 %v6175_v51  ;;  %v2081_v61 = vor.u32 %v2080_v49, %v2077_v47 }
  0xdb   : > { %v2095_v7 = vor.u32 %v2094_v53, %v2091_v52  ;;  %v6195_v52 = vld [vmem:[%s7510_s1 + $0x208] sm:$0xff]  }
  0xdc   : > { %v2082_v24 = vrot.slane %v2081_v61, 4 }
  0xdd   : > { %5696 = vmatpush3.bf16.msra.mxu0 %v6175_v51  ;;  %v6863_v51 = vld [vmem:[#allocation2 + $0x2c] sm:$0x1] }
  0xde   : > { %5697 = vmatprep.subr.bf16.mxu0 %v6176_v55  ;;  %v2098_v50 = vshll.u32 %v6863_v51, 16 }
  0xe0   : > { %5690 = vmatmul.mubr.bf16.gmra.mrb[4].mxu0 %v4942_v56  ;;  %v2108_v56 = vrot.slane %v2106_v41, 5  ;;  %v2100_v27 = vrot.slane %v2098_v50, 5  ;;  %v6200_v50 = vld [vmem:[%s7510_s1 + $0x230] sm:$0xff]  }
  0xe1   : > { %5698 = vmatpush3.bf16.msra.mxu0 %v6176_v55  ;;  %5709 = vmatprep.mubr.bf16.mxu0 %v6182_v30  ;;  %v2105_v55 = vrot.slane %v2103_v40, 4  ;;  %v2119_v30 = vrot.slane %v2117_v42, 4  ;;  %v2313_v40 = vld [vmem:[#allocation2 + $0x18] sm:$0xe] }
  0xe2   : > { %5699 = vmatprep.subr.bf16.mxu0 %v6177_v14 }
  0xe3   : > { %v2109_v0 = vor.u32 %v2108_v56, %v2105_v55  ;;  %v5008_v55 = vrot.slane %v2313_v40, 9  ;;  %v2342_v56 = vrot.slane %v6835_v4, 5 }
  0xe5   : > { %5700 = vmatpush3.bf16.msra.mxu0 %v6177_v14  ;;  %v2122_v14 = vrot.slane %v2120_v43, 5  ;;  %v2343_v4 = vsel %vm6545_vm12, %v5008_v55, %v2342_v56  ;;  %v346_v55 = vld [vmem:[#allocation3 + $0x28] sm:$0x1] }
  0xe6   : > { %5701 = vmatprep.subr.bf16.mxu0 %v6178_v57  ;;  %v347_v56 = vsel %vm6353_vm2, 0, %v346_v55 }
  0xe7   : > { %348 = vst [vmem:[#allocation3 + $0x28] sm:$0x1] %v347_v56 }
  0xe9   : > { %5702 = vmatpush3.bf16.msra.mxu0 %v6178_v57  ;;  %v2044_v57 = vld [vmem:[#allocation2 + $0x48] sm:$0xf] }
  0xea   : > { %5703 = vmatprep.subr.bf16.mxu0 %v6179_v59  ;;  %v2148_v22 = vshll.u32 %v2044_v57, 16 }
  0xec   : > { %v2150_v11 = vrot.slane %v2148_v22, 5  ;;  %v2315_v22 = vld [vmem:[#allocation2 + $0x28] sm:$0xe] }
  0xed   : > { %5704 = vmatpush3.bf16.msra.mxu0 %v6179_v59  ;;  %v6865_v59 = vld [vmem:[#allocation2 + $0x34] sm:$0x1] }
  0xee   : > { %5705 = vmatprep.subr.bf16.mxu0 %v6180_v62  ;;  %v2112_v2 = vshll.u32 %v6865_v59, 16 }
  0xf0   : > { %v2114_v18 = vrot.slane %v2112_v2, 5 }
  0xf1   : > { %5706 = vmatpush3.bf16.msra.mxu0 %v6180_v62  ;;  %v2084_v62 = vshll.u32 %v6861_v46, 16 }
  0xf2   : > { %5707 = vmatprep.subr.bf16.mxu0 %v6181_v20 }
  0xf3   : > { %v2086_v44 = vrot.slane %v2084_v62, 5 }
  0xf5   : > { %5708 = vmatpush3.bf16.msra.mxu0 %v6181_v20  ;;  %v2145_v20 = vshrl.u32 %v2044_v57, 16  ;;  %v2087_v31 = vsel %vm6451_vm9, %v2082_v24, %v2086_v44  ;;  %v6196_v57 = vld [vmem:[%s7510_s1 + $0x210] sm:$0xff]   ;;  %v6201_v24 = vld [vmem:[%s7510_s1 + $0x238] sm:$0xff]  }
  0xf6   : > { %5717 = vmatprep.subr.bf16.mxu0 %v6183_v5 }
  0xf7   : > { %v2147_v17 = vrot.slane %v2145_v20, 4  ;;  %v2314_v20 = vld [vmem:[#allocation2 + $0x20] sm:$0xe] }
  0xf8   : > { %5710 = vmatmul.mubr.bf16.vlgmr.msra.gmra.mrb[0].mxu0 %v6184_v13  ;;  %v2133_v13 = vrot.slane %v2131_v25, 4  ;;  %v6197_v25 = vld [vmem:[%s7510_s1 + $0x218] sm:$0xff]   ;;  %v5009_v2 = vrot.slane %v2314_v20, 9  ;;  %v379_v20 = vld [vmem:[#allocation3 + $0x34] sm:$0x1] }
  0xf9   : > { %5718 = vmatpush3.bf16.msra.mxu0 %v6183_v5  ;;  %5713 = vmatprep.mubr.bf16.mxu0 %v6190_v34  ;;  %v2123_v5 = vor.u32 %v2122_v14, %v2119_v30  ;;  %v2136_v34 = vrot.slane %v2134_v63, 5  ;;  %v2151_v1 = vor.u32 %v2150_v11, %v2147_v17  ;;  %v6198_v63 = vld [vmem:[%s7510_s1 + $0x220] sm:$0xff]  }
  0xfa   : > { %5719 = vmatprep.subr.bf16.mxu0 %v6185_v8  ;;  %v2318_v17 = vld [vmem:[#allocation2 + $0x40] sm:$0xe] }
  0xfb   : > { %v2124_v19 = vrot.slane %v2123_v5, 4  ;;  %v2152_v47 = vrot.slane %v2151_v1, 4  ;;  %v2346_v5 = vrot.slane %v6861_v46, 5  ;;  %v6202_v1 = vld [vmem:[%s7511_s2 + $0x40] sm:$0xff]  }
  0xfc   : > { %5765 = vmatprep.subr.bf16.mxu1 %v6202_v1 }
  0xfd   : > { %5720 = vmatpush3.bf16.msra.mxu0 %v6185_v8  ;;  %v2096_v8 = vrot.slane %v2095_v7, 4  ;;  %v6199_v7 = vld [vmem:[%s7510_s1 + $0x228] sm:$0xff]   ;;  %5766 = vmatpush3.bf16.msra.mxu1 %v6202_v1 }
  0xfe   : > { %5721 = vmatprep.subr.bf16.mxu0 %v6186_v26 }
  0xff   : > { %v2101_v21 = vsel %vm6451_vm9, %v2096_v8, %v2100_v27  ;;  %v2358_v8 = vrot.slane %v6867_v60, 5  ;;  %v2347_v27 = vsel %vm6545_vm12, %v5009_v2, %v2346_v5  ;;  %v380_v2 = vsel %vm6361_vm4, 0, %v379_v20  ;;  %v6206_v5 = vld [vmem:[%s7511_s2 + $0x60] sm:$0xff]  }
 0x100   : > { %5714 = vmatmul.mubr.bf16.gmra.mrb[4].mxu0 %v6192_v29  ;;  %v2128_v29 = vrot.slane %v2126_v6, 5  ;;  %v4996_v41 = vcombine.low %v2087_v31, %v2101_v21  ;;  %v5010_v6 = vrot.slane %v2315_v22, 9  ;;  %381 = vst [vmem:[#allocation3 + $0x34] sm:$0x1] %v380_v2 }
 0x101   : > { %5722 = vmatpush3.bf16.msra.mxu0 %v6186_v26  ;;  %5733 = vmatprep.mubr.bf16.mxu0 %v4995_v33  ;;  %v2110_v26 = vrot.slane %v2109_v0, 4  ;;  %v6881_v33 = vld [vmem:[#allocation2 + $0x4c] sm:$0x1]  ;;  %v2317_v0 = vld [vmem:[#allocation2 + $0x38] sm:$0xe] }
 0x102   : > { %5723 = vmatprep.subr.bf16.mxu0 %v6187_v32  ;;  %v2154_v16 = vshll.u32 %v6881_v33, 16  ;;  %v2129_v38 = vsel %vm6451_vm9, %v2124_v19, %v2128_v29  ;;  %v2362_v19 = vrot.slane %v6879_v36, 5  ;;  %v2366_v31 = vrot.slane %v6881_v33, 5  ;;  %v364_v36 = vld [vmem:[#allocation3 + $0xc] sm:$0x1] }
 0x103   : > { %v2115_v37 = vsel %vm6451_vm9, %v2110_v26, %v2114_v18  ;;  %v2319_v26 = vld [vmem:[#allocation2 + $0x48] sm:$0xe]  ;;  %v5013_v18 = vrot.slane %v2318_v17, 9 }
 0x104   : > { %v4997_v43 = vcombine.low %v2115_v37, %v2129_v38  ;;  %v2156_v49 = vrot.slane %v2154_v16, 5  ;;  %v5014_v29 = vrot.slane %v2319_v26, 9  ;;  %v334_v16 = vld [vmem:[#allocation3 + $0x8] sm:$0x1]  ;;  %v343_v37 = vld [vmem:[#allocation3 + $0x20] sm:$0x1] }
 0x105   : > { %5724 = vmatpush3.bf16.msra.mxu0 %v6187_v32  ;;  %v2137_v32 = vor.u32 %v2136_v34, %v2133_v13  ;;  %v2354_v13 = vrot.slane %v6865_v59, 5  ;;  %v5012_v34 = vrot.slane %v2317_v0, 9  ;;  %v335_v33 = vsel %vm6353_vm2, 0, %v334_v16  ;;  %v373_v38 = vld [vmem:[#allocation3 + $0x24] sm:$0x1] }
 0x106   : > { %5725 = vmatprep.subr.bf16.mxu0 %v6188_v39  ;;  %v2157_v14 = vsel %vm6451_vm9, %v2152_v47, %v2156_v49  ;;  %v2367_v21 = vsel %vm6545_vm12, %v5014_v29, %v2366_v31  ;;  %336 = vst [vmem:[#allocation3 + $0x8] sm:$0x1] %v335_v33  ;;  %v374_v40 = vsel %vm6361_vm4, 0, %v373_v38  ;;  %v6203_v47 = vld [vmem:[%s7511_s2 + $0x48] sm:$0xff]  }
 0x107   : > { %v2138_v42 = vrot.slane %v2137_v32, 4  ;;  %v2359_v11 = vsel %vm6545_vm12, %v5012_v34, %v2358_v8  ;;  %v2363_v32 = vsel %vm6545_vm12, %v5013_v18, %v2362_v19  ;;  %375 = vst [vmem:[#allocation3 + $0x24] sm:$0x1] %v374_v40  ;;  %5767 = vmatprep.subr.bf16.mxu1 %v6203_v47  ;;  %v352_v49 = vld [vmem:[#allocation3 + $0x38] sm:$0x1] }
 0x108   : > { %5768 = vmatpush3.bf16.msra.mxu1 %v6203_v47  ;;  %v388_v8 = vld [vmem:[#allocation3 + $0x4c] sm:$0x1] }
 0x109   : > { %5726 = vmatpush3.bf16.msra.mxu0 %v6188_v39  ;;  %v2312_v39 = vld [vmem:[#allocation2 + $0x10] sm:$0xe] }
 0x10a   : > { %5727 = vmatprep.subr.bf16.mxu0 %v6189_v45  ;;  %v5007_v53 = vrot.slane %v2312_v39, 9  ;;  %v344_v39 = vsel %vm6353_vm2, 0, %v343_v37 }
 0x10b   : > { %345 = vst [vmem:[#allocation3 + $0x20] sm:$0x1] %v344_v39 }
 0x10c   : > { %v2339_v3 = vsel %vm6545_vm12, %v5007_v53, %v2338_v54  ;;  %v353_v53 = vsel %vm6353_vm2, 0, %v352_v49 }
 0x10d   : > { %5728 = vmatpush3.bf16.msra.mxu0 %v6189_v45  ;;  %v2142_v45 = vrot.slane %v2140_v23, 5  ;;  %v5031_v62 = vcombine.low %v2339_v3, %v2343_v4  ;;  %v5034_v23 = vcombine.low %v2363_v32, %v2367_v21  ;;  %354 = vst [vmem:[#allocation3 + $0x38] sm:$0x1] %v353_v53  ;;  %v385_v3 = vld [vmem:[#allocation3 + $0x44] sm:$0x1] }
 0x10e   : > { %5729 = vmatprep.subr.bf16.mxu0 %v6191_v28 }
 0x10f   : > { %v2143_v30 = vsel %vm6451_vm9, %v2138_v42, %v2142_v45  ;;  %v367_v42 = vld [vmem:[#allocation3 + $0x14] sm:$0x1] }
 0x110   : > { %v4998_v61 = vcombine.low %v2143_v30, %v2157_v14  ;;  %v368_v45 = vsel %vm6361_vm4, 0, %v367_v42  ;;  %v6204_v30 = vld [vmem:[%s7511_s2 + $0x50] sm:$0xff]   ;;  %v376_v14 = vld [vmem:[#allocation3 + $0x2c] sm:$0x1]  ;;  %v2668_v42 = vld [vmem:[#allocation3 + $0x18] sm:$0xf] }
 0x111   : > { %5730 = vmatpush3.bf16.msra.mxu0 %v6191_v28  ;;  %v2316_v28 = vld [vmem:[#allocation2 + $0x30] sm:$0xe]  ;;  %369 = vst [vmem:[#allocation3 + $0x14] sm:$0x1] %v368_v45  ;;  %v377_v4 = vsel %vm6361_vm4, 0, %v376_v14  ;;  %5769 = vmatprep.subr.bf16.mxu1 %v6204_v30 }
 0x112   : > { %5731 = vmatprep.subr.bf16.mxu0 %v6193_v9  ;;  %v5011_v44 = vrot.slane %v2316_v28, 9  ;;  %378 = vst [vmem:[#allocation3 + $0x2c] sm:$0x1] %v377_v4  ;;  %5770 = vmatpush3.bf16.msra.mxu1 %v6204_v30  ;;  %v2674_v20 = vld [vmem:[#allocation3 + $0x20] sm:$0xf] }
 0x115   : > { %5732 = vmatpush3.bf16.msra.mxu0 %v6193_v9  ;;  %v2350_v9 = vrot.slane %v6863_v51, 5  ;;  %v2355_v51 = vsel %vm6545_vm12, %v5011_v44, %v2354_v13  ;;  %v7004_v44 = vld [vmem:[%s7511_s2] sm:$0xff]   ;;  %v358_v13 = vld [vmem:[#allocation3 + $0x48] sm:$0x1] }
 0x116   : > { %5741 = vmatprep.subr.bf16.mxu0 %v6194_v35  ;;  %v5033_v60 = vcombine.low %v2355_v51, %v2359_v11  ;;  %v359_v34 = vsel %vm6353_vm2, 0, %v358_v13 }
 0x117   : > { %v2351_v46 = vsel %vm6545_vm12, %v5010_v6, %v2350_v9  ;;  %v6207_v6 = vld [vmem:[%s7511_s2 + $0x68] sm:$0xff]   ;;  %v6208_v9 = vld [vmem:[%s7511_s2 + $0x70] sm:$0xff]   ;;  %360 = vst [vmem:[#allocation3 + $0x48] sm:$0x1] %v359_v34 }
 0x118   : > { %5734 = vmatmul.mubr.bf16.vlgmr.msra.gmra.mrb[0].mxu0 %v4996_v41  ;;  %v5032_v59 = vcombine.low %v2347_v27, %v2351_v46  ;;  %v337_v41 = vld [vmem:[#allocation3 + $0x10] sm:$0x1]  ;;  %v389_v27 = vsel %vm6361_vm4, 0, %v388_v8 }
 0x119   : > { %5742 = vmatpush3.bf16.msra.mxu0 %v6194_v35  ;;  %5737 = vmatprep.mubr.bf16.mxu0 %v4997_v43  ;;  %v365_v35 = vsel %vm6361_vm4, 0, %v364_v36  ;;  %v338_v43 = vsel %vm6353_vm2, 0, %v337_v41  ;;  %390 = vst [vmem:[#allocation3 + $0x4c] sm:$0x1] %v389_v27  ;;  %v7014_v46 = vld [vmem:[%s7512_s3] ss:$0 sm:$0xff] }
 0x11a   : > { %5743 = vmatprep.subr.bf16.mxu0 %v6195_v52  ;;  %366 = vst [vmem:[#allocation3 + $0xc] sm:$0x1] %v365_v35  ;;  %339 = vst [vmem:[#allocation3 + $0x10] sm:$0x1] %v338_v43  ;;  %v2671_v43 = vld [vmem:[#allocation3 + $0x1c] sm:$0x1] }
 0x11d   : > { %5744 = vmatpush3.bf16.msra.mxu0 %v6195_v52  ;;  %v382_v52 = vld [vmem:[#allocation3 + $0x3c] sm:$0x1] }
 0x11e   : > { %5745 = vmatprep.subr.bf16.mxu0 %v6196_v57  ;;  %v383_v54 = vsel %vm6361_vm4, 0, %v382_v52 }
 0x11f   : > { %384 = vst [vmem:[#allocation3 + $0x3c] sm:$0x1] %v383_v54  ;;  %v2656_v54 = vld [vmem:[#allocation3 + $0x8] sm:$0xf] }
 0x120   : > { %5738 = vmatmul.mubr.bf16.gmra.mrb[4].mxu0 %v4998_v61 }
 0x121   : > { %5746 = vmatpush3.bf16.msra.mxu0 %v6196_v57  ;;  %5757 = vmatprep.mubr.bf16.mxu0 %v5031_v62  ;;  %v355_v57 = vld [vmem:[#allocation3 + $0x40] sm:$0x1]  ;;  %v386_v62 = vsel %vm6361_vm4, 0, %v385_v3  ;;  %v2659_v3 = vld [vmem:[#allocation3 + $0xc] sm:$0x1] }
 0x122   : > { %5747 = vmatprep.subr.bf16.mxu0 %v6197_v25  ;;  %v356_v61 = vsel %vm6353_vm2, 0, %v355_v57  ;;  %387 = vst [vmem:[#allocation3 + $0x44] sm:$0x1] %v386_v62  ;;  %v2662_v27 = vld [vmem:[#allocation3 + $0x10] sm:$0xf] }
 0x123   : > { %357 = vst [vmem:[#allocation3 + $0x40] sm:$0x1] %v356_v61 }
 0x125   : > { %5748 = vmatpush3.bf16.msra.mxu0 %v6197_v25  ;;  %v6205_v25 = vld [vmem:[%s7511_s2 + $0x58] sm:$0xff]  }
 0x126   : > { %5749 = vmatprep.subr.bf16.mxu0 %v6198_v63  ;;  %5771 = vmatprep.subr.bf16.mxu1 %v6205_v25 }
 0x127   : > { %5772 = vmatpush3.bf16.msra.mxu1 %v6205_v25 }
 0x128   : > { %5773 = vmatprep.subr.bf16.mxu1 %v6206_v5 }
 0x129   : > { %5750 = vmatpush3.bf16.msra.mxu0 %v6198_v63  ;;  %v331_v63 = vld [vmem:[#allocation3] sm:$0x1] }
 0x12a   : > { %5751 = vmatprep.subr.bf16.mxu0 %v6199_v7  ;;  %v332_v22 = vsel %vm6353_vm2, 0, %v331_v63 }
 0x12b   : > { %333 = vst [vmem:[#allocation3] sm:$0x1] %v332_v22  ;;  %5774 = vmatpush3.bf16.msra.mxu1 %v6206_v5  ;;  %v2677_v5 = vld [vmem:[#allocation3 + $0x24] sm:$0x1] }
 0x12c   : > { %5775 = vmatprep.subr.bf16.mxu1 %v6207_v6 }
 0x12d   : > { %5752 = vmatpush3.bf16.msra.mxu0 %v6199_v7  ;;  %v361_v7 = vld [vmem:[#allocation3 + $0x4] sm:$0x1] }
 0x12e   : > { %5753 = vmatprep.subr.bf16.mxu0 %v6200_v50  ;;  %v362_v28 = vsel %vm6361_vm4, 0, %v361_v7 }
 0x12f   : > { %363 = vst [vmem:[#allocation3 + $0x4] sm:$0x1] %v362_v28  ;;  %5776 = vmatpush3.bf16.msra.mxu1 %v6207_v6 }
 0x130   : > { %5777 = vmatprep.subr.bf16.mxu1 %v6208_v9 }
 0x131   : > { %5754 = vmatpush3.bf16.msra.mxu0 %v6200_v50  ;;  %v349_v50 = vld [vmem:[#allocation3 + $0x30] sm:$0x1] }
 0x132   : > { %5755 = vmatprep.subr.bf16.mxu0 %v6201_v24  ;;  %v350_v0 = vsel %vm6353_vm2, 0, %v349_v50  ;;  %v7016_v51 = vld [vmem:[#allocation3] sm:$0xf] }
 0x133   : > { %351 = vst [vmem:[#allocation3 + $0x30] sm:$0x1] %v350_v0  ;;  %5778 = vmatpush3.bf16.msra.mxu1 %v6208_v9  ;;  %v2737_v29 = vshrl.u32 %v7016_v51, 16  ;;  %v2740_v31 = vshll.u32 %v7016_v51, 16 }
 0x135   : > { %5756 = vmatpush3.bf16.msra.mxu0 %v6201_v24  ;;  %v6209_v24 = vld [vmem:[%s7511_s2 + $0x78] sm:$0xff]   ;;  %v7027_v39 = vrot.slane %v2737_v29, 4  ;;  %v7029_v40 = vrot.slane %v2740_v31, 5 }
 0x136   : > { %5779 = vmatprep.subr.bf16.mxu1 %v6209_v24  ;;  %v7024_v16 = vld [vmem:[#allocation3 + $0x4] sm:$0x1] }
 0x137   : > { %5780 = vmatpush3.bf16.msra.mxu1 %v6209_v24  ;;  %v2746_v35 = vshll.u32 %v7024_v16, 16 }
 0x138   : > { %5758 = vmatmul.mubr.bf16.vlgmr.msra.gmra.mrb[0].mxu0 %v5032_v59  ;;  %5789 = vmatprep.subr.bf16.mxu1 %v7004_v44 }
 0x139   : > { %5761 = vmatprep.mubr.bf16.mxu0 %v5033_v60 }
 0x140   : > { %5762 = vmatmul.mubr.bf16.gmra.mrb[4].mxu0 %v5034_v23 }
 0x20b   : > { %v5759_v17 = vpop.f32.mrb[0].mxu0 }
 0x20c   : > { %v2529_v11 = vadd.f32 %v5759_v17, %v7014_v46  ;;  %v2483_v26 = vpop.f32.mrb[1].mxu0  ;;  %v2665_v17 = vld [vmem:[#allocation3 + $0x14] sm:$0x1] }
 0x20d   : > { %v2527_v59 = vadd.f32 %v7014_v46, %v2483_v26  ;;  %v5760_v18 = vpop.f32.mrb[2].mxu0 }
 0x20e   : > { %v2537_v60 = vmax.f32 %v2529_v11, 0.0  ;;  %v2530_v19 = vadd.f32 %v5760_v18, %v7014_v46  ;;  %v2486_v15 = vpop.f32.mrb[3].mxu0 }
 0x20f   : > { %v2535_v32 = vmax.f32 %v2527_v59, 0.0  ;;  %v2528_v21 = vadd.f32 %v7014_v46, %v2486_v15 }
 0x210   : > { %v5327_v23 = vpack.c.bf16 %v2537_v60, %v2537_v60  ;;  %v2538_v1 = vmax.f32 %v2530_v19, 0.0 }
 0x211   : > { %v5325_v36 = vpack.c.bf16 %v2535_v32, %v2535_v32  ;;  %v2536_v33 = vmax.f32 %v2528_v21, 0.0 }
 0x212   : > { %v2592_v37 = vshrl.u32 %v5327_v23, 16  ;;  %v5328_v38 = vpack.c.bf16 %v2538_v1, %v2538_v1  ;;  %v2595_v41 = vshll.u32 %v5327_v23, 16 }
 0x213   : > { %v2576_v45 = vshrl.u32 %v5325_v36, 16  ;;  %v2579_v47 = vshll.u32 %v5325_v36, 16  ;;  %v5326_v49 = vpack.c.bf16 %v2536_v33, %v2536_v33  ;;  %v5763_v52 = vpop.f32.mrb[4].mxu0  ;;  %v2692_v33 = vld [vmem:[#allocation3 + $0x38] sm:$0xf] }
 0x214   : > { %v2594_v53 = vrot.slane %v2592_v37, 7  ;;  %v2600_v55 = vshrl.u32 %v5328_v38, 16  ;;  %v2603_v56 = vshll.u32 %v5328_v38, 16  ;;  %v2533_v30 = vadd.f32 %v5763_v52, %v7014_v46  ;;  %v2499_v14 = vpop.f32.mrb[5].mxu0  ;;  %v2683_v52 = vld [vmem:[#allocation3 + $0x2c] sm:$0x1] }
 0x215   : > { %v2578_v57 = vrot.slane %v2576_v45, 7  ;;  %v2584_v4 = vshrl.u32 %v5326_v49, 16  ;;  %v2587_v61 = vshll.u32 %v5326_v49, 16  ;;  %v2531_v62 = vadd.f32 %v7014_v46, %v2499_v14  ;;  %v5764_v25 = vpop.f32.mrb[6].mxu0  ;;  %v2680_v49 = vld [vmem:[#allocation3 + $0x28] sm:$0xf] }
 0x216   : > { %v2597_v63 = vor.u32 %v2595_v41, %v2594_v53  ;;  %v2598_v7 = vrot.slane %v2594_v53, 4  ;;  %v2602_v50 = vrot.slane %v2600_v55, 7  ;;  %v2541_v22 = vmax.f32 %v2533_v30, 0.0  ;;  %v2502_v28 = vpop.f32.mrb[7].mxu0 }
 0x217   : > { %v2581_v0 = vor.u32 %v2579_v47, %v2578_v57  ;;  %v2582_v2 = vrot.slane %v2578_v57, 4  ;;  %v2586_v6 = vrot.slane %v2584_v4, 7  ;;  %v2539_v9 = vmax.f32 %v2531_v62, 0.0 }
 0x218   : > { %v2669_v24 = vsel %vm6395_vm6, %v2597_v63, %v2668_v42  ;;  %v2672_v13 = vsel %vm6353_vm2, %v2598_v7, %v2671_v43  ;;  %v2605_v34 = vor.u32 %v2603_v56, %v2602_v50  ;;  %v2606_v8 = vrot.slane %v2602_v50, 4  ;;  %v2695_v43 = vld [vmem:[#allocation3 + $0x3c] sm:$0x1]  ;;  %v2698_v7 = vld [vmem:[#allocation3 + $0x40] sm:$0xf] }
 0x219   : > { %2670 = vst [vmem:[#allocation3 + $0x18] sm:$0xf] %v2669_v24  ;;  %2673 = vst [vmem:[#allocation3 + $0x1c] sm:$0x1] %v2672_v13  ;;  %v2657_v11 = vsel %vm6395_vm6, %v2581_v0, %v2656_v54  ;;  %v2660_v26 = vsel %vm6353_vm2, %v2582_v2, %v2659_v3  ;;  %v2589_v59 = vor.u32 %v2587_v61, %v2586_v6  ;;  %v2590_v18 = vrot.slane %v2586_v6, 4 }
 0x21a   : > { %2658 = vst [vmem:[#allocation3 + $0x8] sm:$0xf] %v2657_v11  ;;  %2661 = vst [vmem:[#allocation3 + $0xc] sm:$0x1] %v2660_v26  ;;  %v2675_v60 = vsel %vm6395_vm6, %v2605_v34, %v2674_v20  ;;  %v2678_v19 = vsel %vm6353_vm2, %v2606_v8, %v2677_v5  ;;  %v5331_v15 = vpack.c.bf16 %v2541_v22, %v2541_v22  ;;  %v2701_v50 = vld [vmem:[#allocation3 + $0x44] sm:$0x1] }
 0x21b   : > { %v5329_v29 = vpack.c.bf16 %v2539_v9, %v2539_v9  ;;  %2676 = vst [vmem:[#allocation3 + $0x20] sm:$0xf] %v2675_v60  ;;  %2679 = vst [vmem:[#allocation3 + $0x24] sm:$0x1] %v2678_v19  ;;  %v2663_v31 = vsel %vm6395_vm6, %v2589_v59, %v2662_v27  ;;  %v2666_v32 = vsel %vm6353_vm2, %v2590_v18, %v2665_v17  ;;  %v2686_v20 = vld [vmem:[#allocation3 + $0x30] sm:$0xf] }
 0x21c   : > { %v2534_v21 = vadd.f32 %v5764_v25, %v7014_v46  ;;  %v2532_v23 = vadd.f32 %v7014_v46, %v2502_v28  ;;  %2664 = vst [vmem:[#allocation3 + $0x10] sm:$0xf] %v2663_v31  ;;  %2667 = vst [vmem:[#allocation3 + $0x14] sm:$0x1] %v2666_v32  ;;  %v2624_v1 = vshrl.u32 %v5331_v15, 16  ;;  %v2627_v42 = vshll.u32 %v5331_v15, 16 }
 0x21d   : > { %v2608_v36 = vshrl.u32 %v5329_v29, 16  ;;  %v2611_v47 = vshll.u32 %v5329_v29, 16  ;;  %v2743_v55 = vor.u32 %v7029_v40, %v7027_v39  ;;  %v7055_v46 = vrot.slane %v2746_v35, 5  ;;  %v2689_v9 = vld [vmem:[#allocation3 + $0x34] sm:$0x1] }
 0x21e   : > { %v2542_v37 = vmax.f32 %v2534_v21, 0.0  ;;  %v2540_v38 = vmax.f32 %v2532_v23, 0.0  ;;  %v2626_v41 = vrot.slane %v2624_v1, 7 }
 0x21f   : > { %v2610_v45 = vrot.slane %v2608_v36, 7  ;;  %v2744_v24 = vrot.slane %v2743_v55, 4 }
 0x220   : > { %v5332_v53 = vpack.c.bf16 %v2542_v37, %v2542_v37  ;;  %v5330_v54 = vpack.c.bf16 %v2540_v38, %v2540_v38  ;;  %v2629_v56 = vor.u32 %v2627_v42, %v2626_v41  ;;  %v2630_v30 = vrot.slane %v2626_v41, 4  ;;  %v7076_v59 = vld [vmem:[#allocation3 + $0x18] sm:$0xf]  ;;  %v7088_v23 = vld [vmem:[#allocation3 + $0x1c] sm:$0x1] }
 0x221   : > { %v2613_v14 = vor.u32 %v2611_v47, %v2610_v45  ;;  %v2614_v57 = vrot.slane %v2610_v45, 4  ;;  %v7057_v25 = vld [vmem:[#allocation3 + $0x8] sm:$0xf]  ;;  %v7067_v22 = vld [vmem:[#allocation3 + $0xc] sm:$0x1]  ;;  %v2779_v37 = vshrl.u32 %v7076_v59, 16  ;;  %v2749_v48 = vsel %vm6451_vm9, %v2744_v24, %v7055_v46 }
 0x222   : > { %v2632_v3 = vshrl.u32 %v5332_v53, 16  ;;  %v2635_v4 = vshll.u32 %v5332_v53, 16  ;;  %v2616_v61 = vshrl.u32 %v5330_v54, 16  ;;  %v2619_v62 = vshll.u32 %v5330_v54, 16  ;;  %v7092_v38 = vld [vmem:[#allocation3 + $0x20] sm:$0xf] }
 0x223   : > { %v2693_v63 = vsel %vm6395_vm6, %v2629_v56, %v2692_v33  ;;  %v2696_v39 = vsel %vm6353_vm2, %v2630_v30, %v2695_v43  ;;  %v2681_v35 = vsel %vm6395_vm6, %v2613_v14, %v2680_v49  ;;  %v2684_v40 = vsel %vm6353_vm2, %v2614_v57, %v2683_v52  ;;  %v7071_v6 = vld [vmem:[#allocation3 + $0x10] sm:$0xf]  ;;  %v7078_v18 = vld [vmem:[#allocation3 + $0x14] sm:$0x1]  ;;  %v7105_v30 = vld [vmem:[#allocation3 + $0x24] sm:$0x1] }
 0x224   : > { %2694 = vst [vmem:[#allocation3 + $0x38] sm:$0xf] %v2693_v63  ;;  %2697 = vst [vmem:[#allocation3 + $0x3c] sm:$0x1] %v2696_v39  ;;  %v2634_v28 = vrot.slane %v2632_v3, 7  ;;  %v2618_v0 = vrot.slane %v2616_v61, 7 }
 0x225   : > { %2682 = vst [vmem:[#allocation3 + $0x28] sm:$0xf] %v2681_v35  ;;  %2685 = vst [vmem:[#allocation3 + $0x2c] sm:$0x1] %v2684_v40  ;;  %v2751_v2 = vshrl.u32 %v7057_v25, 16  ;;  %v2754_v5 = vshll.u32 %v7057_v25, 16 }
 0x226   : > { %v2760_v13 = vshll.u32 %v7067_v22, 16  ;;  %v2765_v34 = vshrl.u32 %v7071_v6, 16  ;;  %v2768_v8 = vshll.u32 %v7071_v6, 16  ;;  %v2637_v27 = vor.u32 %v2635_v4, %v2634_v28 }
 0x227   : > { %v2638_v17 = vrot.slane %v2634_v28, 4  ;;  %v2621_v11 = vor.u32 %v2619_v62, %v2618_v0  ;;  %v2622_v26 = vrot.slane %v2618_v0, 4  ;;  %v2753_v60 = vrot.slane %v2751_v2, 4  ;;  %v6211_v2 = vld [vmem:[%s7511_s2 + $0x8] sm:$0xff]  }
 0x228   : > { %v2756_v19 = vrot.slane %v2754_v5, 5  ;;  %v2767_v15 = vrot.slane %v2765_v34, 4  ;;  %v2699_v29 = vsel %vm6395_vm6, %v2637_v27, %v2698_v7  ;;  %v2770_v36 = vrot.slane %v2768_v8, 5 }
 0x229   : > { %v2702_v31 = vsel %vm6353_vm2, %v2638_v17, %v2701_v50  ;;  %v2687_v32 = vsel %vm6395_vm6, %v2621_v11, %v2686_v20  ;;  %v2690_v21 = vsel %vm6353_vm2, %v2622_v26, %v2689_v9  ;;  %2700 = vst [vmem:[#allocation3 + $0x40] sm:$0xf] %v2699_v29  ;;  %v2774_v33 = vshll.u32 %v7078_v18, 16  ;;  %v3133_v11 = vld [vmem:[#allocation3 + $0x10] sm:$0xe] }
 0x22a   : > { %2703 = vst [vmem:[#allocation3 + $0x44] sm:$0x1] %v2702_v31  ;;  %2688 = vst [vmem:[#allocation3 + $0x30] sm:$0xf] %v2687_v32  ;;  %v2757_v1 = vor.u32 %v2756_v19, %v2753_v60  ;;  %v2762_v10 = vrot.slane %v2760_v13, 5  ;;  %v2782_v41 = vshll.u32 %v7076_v59, 16  ;;  %v2771_v43 = vor.u32 %v2770_v36, %v2767_v15 }
 0x22b   : > { %2691 = vst [vmem:[#allocation3 + $0x34] sm:$0x1] %v2690_v21  ;;  %v2781_v45 = vrot.slane %v2779_v37, 4  ;;  %v2788_v47 = vshll.u32 %v7088_v23, 16  ;;  %v2793_v53 = vshrl.u32 %v7092_v38, 16  ;;  %v2796_v54 = vshll.u32 %v7092_v38, 16 }
 0x22c   : > { %v2758_v42 = vrot.slane %v2757_v1, 4  ;;  %v7099_v49 = vld [vmem:[#allocation3 + $0x28] sm:$0xf]  ;;  %v2784_v52 = vrot.slane %v2782_v41, 5  ;;  %v2772_v56 = vrot.slane %v2771_v43, 4  ;;  %v2776_v46 = vrot.slane %v2774_v33, 5 }
 0x22d   : > { %v2807_v14 = vshrl.u32 %v7099_v49, 16  ;;  %v7108_v4 = vld [vmem:[#allocation3 + $0x2c] sm:$0x1]  ;;  %v2795_v61 = vrot.slane %v2793_v53, 4  ;;  %v2798_v62 = vrot.slane %v2796_v54, 5  ;;  %v2790_v63 = vrot.slane %v2788_v47, 5 }
 0x22e   : > { %v2763_v55 = vsel %vm6451_vm9, %v2758_v42, %v2762_v10  ;;  %v2785_v3 = vor.u32 %v2784_v52, %v2781_v45  ;;  %v2810_v35 = vshll.u32 %v7099_v49, 16  ;;  %v7111_v40 = vld [vmem:[#allocation3 + $0x38] sm:$0xf]  ;;  %v2777_v7 = vsel %vm6451_vm9, %v2772_v56, %v2776_v46  ;;  %v2735_v19 = vld [vmem:[#allocation3 + $0x3c] sm:$0x1]  ;;  %v6212_v47 = vld [vmem:[%s7511_s2 + $0x10] sm:$0xff]  }
 0x22f   : > { %v5068_v57 = vcombine.low %v2749_v48, %v2763_v55  ;;  %v2809_v39 = vrot.slane %v2807_v14, 4  ;;  %v2799_v20 = vor.u32 %v2798_v62, %v2795_v61  ;;  %v2802_v28 = vshll.u32 %v7105_v30, 16  ;;  %v3134_v31 = vld [vmem:[#allocation3 + $0x18] sm:$0xe] }
 0x230   : > { %v2786_v50 = vrot.slane %v2785_v3, 4  ;;  %v2812_v5 = vrot.slane %v2810_v35, 5  ;;  %v2816_v9 = vshll.u32 %v7108_v4, 16  ;;  %v2835_v17 = vshrl.u32 %v7111_v40, 16  ;;  %v3138_v14 = vld [vmem:[#allocation3 + $0x38] sm:$0xe] }
 0x231   : > { %5781 = vmatprep.mubr.bf16.mxu1 %v5068_v57  ;;  %v7116_v0 = vld [vmem:[#allocation3 + $0x30] sm:$0xf]  ;;  %v2800_v27 = vrot.slane %v2799_v20, 4  ;;  %v3165_v32 = vrot.slane %v7078_v18, 5  ;;  %v2838_v36 = vshll.u32 %v7111_v40, 16  ;;  %v2804_v33 = vrot.slane %v2802_v28, 5 }
 0x232   : > { %v2734_v24 = vld [vmem:[#allocation3 + $0x34] sm:$0x1]  ;;  %v2821_v13 = vshrl.u32 %v7116_v0, 16  ;;  %v2824_v34 = vshll.u32 %v7116_v0, 16  ;;  %v2791_v8 = vsel %vm6451_vm9, %v2786_v50, %v2790_v63  ;;  %v2813_v60 = vor.u32 %v2812_v5, %v2809_v39  ;;  %v6214_v63 = vld [vmem:[%s7511_s2 + $0x18] sm:$0xff]  }
 0x233   : > { %v5069_v26 = vcombine.low %v2777_v7, %v2791_v8  ;;  %v2830_v21 = vshll.u32 %v2734_v24, 16  ;;  %v2837_v1 = vrot.slane %v2835_v17, 4  ;;  %v2818_v48 = vrot.slane %v2816_v9, 5  ;;  %v6218_v8 = vld [vmem:[%s7511_s2 + $0x38] sm:$0xff]   ;;  %v3131_v17 = vld [vmem:[#allocation3] sm:$0xe] }
 0x234   : > { %v2823_v15 = vrot.slane %v2821_v13, 4  ;;  %v2826_v29 = vrot.slane %v2824_v34, 5  ;;  %v2814_v37 = vrot.slane %v2813_v60, 4  ;;  %v3169_v41 = vrot.slane %v7088_v23, 5  ;;  %v6222_v60 = vld [vmem:[%s7511_s2 + $0x88] sm:$0xff]  }
 0x235   : > { %5782 = vmatmul.mubr.bf16.vlgmr.msra.gmra.mrb[0].mxu1 %v5069_v26  ;;  %v2840_v42 = vrot.slane %v2838_v36, 5  ;;  %v2844_v43 = vshll.u32 %v2735_v19, 16  ;;  %v2805_v45 = vsel %vm6451_vm9, %v2800_v27, %v2804_v33  ;;  %v5094_v53 = vrot.slane %v3133_v11, 9  ;;  %v6220_v27 = vld [vmem:[%s7511_s2 + $0x80] sm:$0xff]   ;;  %v3132_v11 = vld [vmem:[#allocation3 + $0x8] sm:$0xe] }
 0x236   : > { %v2827_v10 = vor.u32 %v2826_v29, %v2823_v15  ;;  %5790 = vmatpush3.bf16.msra.mxu1 %v7004_v44  ;;  %v2819_v18 = vsel %vm6451_vm9, %v2814_v37, %v2818_v48  ;;  %v2832_v55 = vrot.slane %v2830_v21, 5  ;;  %v5095_v56 = vrot.slane %v3134_v31, 9  ;;  %v3137_v44 = vld [vmem:[#allocation3 + $0x30] sm:$0xe]  ;;  %v6229_v36 = vld [vmem:[%s7511_s2 + $0xb8] sm:$0xff]  }
 0x237   : > { %5791 = vmatprep.subr.bf16.mxu1 %v6211_v2  ;;  %v5070_v54 = vcombine.low %v2805_v45, %v2819_v18  ;;  %v2841_v23 = vor.u32 %v2840_v42, %v2837_v1  ;;  %v7140_v46 = vsel %vm6545_vm12, %v5094_v53, %v3165_v32  ;;  %v2846_v61 = vrot.slane %v2844_v43, 5  ;;  %v6226_v21 = vld [vmem:[%s7511_s2 + $0xa0] sm:$0xff]   ;;  %v3136_v1 = vld [vmem:[#allocation3 + $0x28] sm:$0xe]  ;;  %v3135_v33 = vld [vmem:[#allocation3 + $0x20] sm:$0xe] }
 0x238   : > { %v2828_v52 = vrot.slane %v2827_v10, 4  ;;  %v7146_v62 = vsel %vm6545_vm12, %v5095_v56, %v3169_v41  ;;  %v5098_v35 = vrot.slane %v3137_v44, 9  ;;  %v3181_v7 = vrot.slane %v2734_v24, 5  ;;  %v6215_v24 = vld [vmem:[%s7511_s2 + $0x20] sm:$0xff]   ;;  %v3511_v56 = vld [vmem:[#allocation3 + $0x8] sm:$0xf] }
 0x239   : > { %5785 = vmatprep.mubr.bf16.mxu1 %v5070_v54  ;;  %v2842_v3 = vrot.slane %v2841_v23, 4  ;;  %v5117_v39 = vcombine.low %v7140_v46, %v7146_v62  ;;  %v5099_v20 = vrot.slane %v3138_v14, 9  ;;  %v3185_v28 = vrot.slane %v2735_v19, 5  ;;  %v6230_v10 = vld [vmem:[%s7511_s2 + $0xc0] sm:$0xff]   ;;  %v6236_v54 = vld [vmem:[%s7511_s2 + $0xe8] sm:$0xff]   ;;  %v6237_v23 = vld [vmem:[%s7511_s2 + $0xf0] sm:$0xff]  }
 0x23a   : > { %5792 = vmatpush3.bf16.msra.mxu1 %v6211_v2  ;;  %v2833_v57 = vsel %vm6451_vm9, %v2828_v52, %v2832_v55  ;;  %v7157_v5 = vsel %vm6545_vm12, %v5098_v35, %v3181_v7  ;;  %v5080_v9 = vcombine.low %v7016_v51, %v7057_v25  ;;  %v6216_v51 = vld [vmem:[%s7511_s2 + $0x28] sm:$0xff]   ;;  %v6217_v25 = vld [vmem:[%s7511_s2 + $0x30] sm:$0xff]   ;;  %v5081_v26 = vcombine.low %v7071_v6, %v7076_v59  ;;  %v6233_v52 = vld [vmem:[#allocation3 + $0x8] ss:$8 sps:$4 sm:$0xff]  }
 0x23b   : > { %5793 = vmatprep.subr.bf16.mxu1 %v6212_v47  ;;  %v2847_v50 = vsel %vm6451_vm9, %v2842_v3, %v2846_v61  ;;  %v7163_v13 = vsel %vm6545_vm12, %v5099_v20, %v3185_v28  ;;  %v5082_v19 = vcombine.low %v7092_v38, %v7099_v49  ;;  %v3157_v15 = vrot.slane %v7024_v16, 5  ;;  %v6224_v6 = vld [vmem:[%s7511_s2 + $0x90] sm:$0xff]   ;;  %v6235_v53 = vld [vmem:[%s7511_s2 + $0xe0] sm:$0xff]   ;;  %v6238_v14 = vld [vmem:[%s7511_s2 + $0xf8] sm:$0xff]  }
 0x23c   : > { %v5071_v2 = vcombine.low %v2833_v57, %v2847_v50  ;;  %v5119_v34 = vcombine.low %v7157_v5, %v7163_v13  ;;  %v3161_v29 = vrot.slane %v7067_v22, 5  ;;  %v5092_v31 = vrot.slane %v3131_v17, 9  ;;  %v6225_v22 = vld [vmem:[%s7511_s2 + $0x98] sm:$0xff]   ;;  %v3513_v55 = vld [vmem:[#allocation3 + $0x10] sm:$0xf] }
 0x23d   : > { %v5093_v32 = vrot.slane %v3132_v11, 9  ;;  %v5083_v16 = vcombine.low %v7116_v0, %v7111_v40  ;;  %v6227_v40 = vld [vmem:[%s7511_s2 + $0xa8] sm:$0xff]   ;;  %v6228_v0 = vld [vmem:[%s7511_s2 + $0xb0] sm:$0xff]   ;;  %v5097_v37 = vrot.slane %v3136_v1, 9  ;;  %v3177_v48 = vrot.slane %v7108_v4, 5 }
 0x23e   : > { %5794 = vmatpush3.bf16.msra.mxu1 %v6212_v47  ;;  %v3158_v59 = vsel %vm6545_vm12, %v5092_v31, %v3157_v15  ;;  %v5096_v41 = vrot.slane %v3135_v33, 9  ;;  %v3173_v42 = vrot.slane %v7105_v30, 5  ;;  %v6231_v4 = vld [vmem:[%s7511_s2 + $0xc8] sm:$0xff]   ;;  %v6232_v30 = vld [vmem:[%s7511_s2 + $0xd0] sm:$0xff]   ;;  %v6234_v47 = vld [vmem:[%s7511_s2 + $0xd8] sm:$0xff]   ;;  %v3542_v44 = vshrl.u32 %v3513_v55, 16 }
 0x23f   : > { %5786 = vmatmul.mubr.bf16.gmra.mrb[4].mxu1 %v5071_v2  ;;  %5795 = vmatprep.subr.bf16.mxu1 %v6214_v63  ;;  %v3162_v38 = vsel %vm6545_vm12, %v5093_v32, %v3161_v29  ;;  %v3178_v43 = vsel %vm6545_vm12, %v5097_v37, %v3177_v48  ;;  %v3545_v46 = vshll.u32 %v3513_v55, 16  ;;  %v3528_v57 = vshrl.u32 %v3511_v56, 16  ;;  %v7254_v7 = vld [vmem:[#allocation3 + $0x14] sm:$0x1]  ;;  %v7256_v20 = vld [vmem:[#allocation3 + $0xc] sm:$0x1] }
 0x240   : > { %5805 = vmatprep.mubr.bf16.mxu1 %v5080_v9  ;;  %v5116_v49 = vcombine.low %v3158_v59, %v3162_v38  ;;  %v3174_v45 = vsel %vm6545_vm12, %v5096_v41, %v3173_v42  ;;  %v3531_v3 = vshll.u32 %v3511_v56, 16  ;;  %v3544_v61 = vrot.slane %v3542_v44, 4  ;;  %v6239_v28 = vld [vmem:[#allocation3 + $0x18] ss:$8 sps:$4 sm:$0xff]   ;;  %v6241_v13 = vld [vmem:[#allocation3 + $0x28] ss:$8 sps:$4 sm:$0xff]  }
 0x241   : > { %v5118_v18 = vcombine.low %v3174_v45, %v3178_v43  ;;  %v3547_v62 = vrot.slane %v3545_v46, 5  ;;  %v6242_v2 = vld [vmem:[%s7511_s2 + $0x108] sm:$0xff]   ;;  %v3551_v9 = vshll.u32 %v7254_v7, 16  ;;  %v3517_v15 = vld [vmem:[#allocation3 + $0x20] sm:$0xf]  ;;  %v6246_v31 = vld [vmem:[%s7511_s2 + $0x120] sm:$0xff]  }
 0x242   : > { %5796 = vmatpush3.bf16.msra.mxu1 %v6214_v63  ;;  %v6240_v63 = vld [vmem:[%s7511_s2 + $0x100] sm:$0xff]   ;;  %v3533_v35 = vrot.slane %v3531_v3, 5  ;;  %v6243_v11 = vld [vmem:[#allocation3 + $0x38] ss:$8 sps:$4 sm:$0xff]   ;;  %v3573_v59 = vshll.u32 %v3517_v15, 16  ;;  %v6249_v3 = vld [vmem:[%s7511_s2 + $0x138] sm:$0xff]  }
 0x243   : > { %5797 = vmatprep.subr.bf16.mxu1 %v6215_v24  ;;  %v3548_v50 = vor.u32 %v3547_v62, %v3544_v61  ;;  %v3521_v29 = vld [vmem:[#allocation3 + $0x30] sm:$0xf]  ;;  %v3515_v32 = vld [vmem:[#allocation3 + $0x18] sm:$0xf]  ;;  %v3519_v38 = vld [vmem:[#allocation3 + $0x28] sm:$0xf] }
 0x244   : > { %v3587_v1 = vshll.u32 %v3519_v38, 16  ;;  %v3575_v33 = vrot.slane %v3573_v59, 5  ;;  %v6248_v41 = vld [vmem:[%s7511_s2 + $0x130] sm:$0xff]   ;;  %v7286_v55 = vld [vmem:[#allocation3 + $0x1c] sm:$0x1] }
 0x245   : > { %v7282_v45 = vld [vmem:[#allocation3 + $0x24] sm:$0x1]  ;;  %v7289_v46 = vld [vmem:[#allocation3 + $0x2c] sm:$0x1] }
 0x246   : > { %5798 = vmatpush3.bf16.msra.mxu1 %v6215_v24  ;;  %v3537_v24 = vshll.u32 %v7256_v20, 16  ;;  %v3579_v44 = vshll.u32 %v7282_v45, 16 }
 0x247   : > { %5799 = vmatprep.subr.bf16.mxu1 %v6216_v51 }
 0x24a   : > { %5800 = vmatpush3.bf16.msra.mxu1 %v6216_v51  ;;  %v6244_v51 = vld [vmem:[%s7511_s2 + $0x110] sm:$0xff]  }
 0x24b   : > { %5801 = vmatprep.subr.bf16.mxu1 %v6217_v25 }
 0x24e   : > { %5802 = vmatpush3.bf16.msra.mxu1 %v6217_v25 }
 0x24f   : > { %5803 = vmatprep.subr.bf16.mxu1 %v6218_v8 }
 0x252   : > { %5804 = vmatpush3.bf16.msra.mxu1 %v6218_v8  ;;  %v3553_v8 = vrot.slane %v3551_v9, 5  ;;  %v3581_v9 = vrot.slane %v3579_v44, 5  ;;  %v3795_v44 = vld [vmem:[#allocation3 + $0x18] sm:$0xe] }
 0x253   : > { %5813 = vmatprep.subr.bf16.mxu1 %v6220_v27 }
 0x255   : > { %5806 = vmatmul.mubr.bf16.vlgmr.msra.gmra.mrb[0].mxu1 %v5081_v26 }
 0x256   : > { %5809 = vmatprep.mubr.bf16.mxu1 %v5082_v19  ;;  %5814 = vmatpush3.bf16.msra.mxu1 %v6220_v27  ;;  %v3539_v27 = vrot.slane %v3537_v24, 5 }
 0x257   : > { %5815 = vmatprep.subr.bf16.mxu1 %v6222_v60 }
 0x25a   : > { %5816 = vmatpush3.bf16.msra.mxu1 %v6222_v60  ;;  %v6245_v60 = vld [vmem:[%s7511_s2 + $0x118] sm:$0xff]  }
 0x25b   : > { %5817 = vmatprep.subr.bf16.mxu1 %v6224_v6 }
 0x25d   : > { %5810 = vmatmul.mubr.bf16.gmra.mrb[4].mxu1 %v5083_v16  ;;  %v3598_v16 = vshrl.u32 %v3521_v29, 16 }
 0x25e   : > { %5818 = vmatpush3.bf16.msra.mxu1 %v6224_v6  ;;  %5829 = vmatprep.mubr.bf16.mxu1 %v5116_v49  ;;  %v3570_v6 = vshrl.u32 %v3517_v15, 16  ;;  %v3556_v49 = vshrl.u32 %v3515_v32, 16 }
 0x25f   : > { %5819 = vmatprep.subr.bf16.mxu1 %v6225_v22  ;;  %v3600_v37 = vrot.slane %v3598_v16, 4 }
 0x260   : > { %v3558_v42 = vrot.slane %v3556_v49, 4 }
 0x262   : > { %5820 = vmatpush3.bf16.msra.mxu1 %v6225_v22  ;;  %v3601_v22 = vshll.u32 %v3521_v29, 16 }
 0x263   : > { %5821 = vmatprep.subr.bf16.mxu1 %v6226_v21 }
 0x264   : > { %v3603_v48 = vrot.slane %v3601_v22, 5 }
 0x266   : > { %5822 = vmatpush3.bf16.msra.mxu1 %v6226_v21  ;;  %v3559_v21 = vshll.u32 %v3515_v32, 16  ;;  %v3794_v32 = vld [vmem:[#allocation3 + $0x10] sm:$0xe] }
 0x267   : > { %5823 = vmatprep.subr.bf16.mxu1 %v6227_v40 }
 0x268   : > { %v3561_v43 = vrot.slane %v3559_v21, 5  ;;  %v3793_v21 = vld [vmem:[#allocation3 + $0x8] sm:$0xe] }
 0x26a   : > { %5824 = vmatpush3.bf16.msra.mxu1 %v6227_v40  ;;  %v6247_v40 = vld [vmem:[%s7511_s2 + $0x128] sm:$0xff]   ;;  %v3562_v56 = vor.u32 %v3561_v43, %v3558_v42 }
 0x26b   : > { %5825 = vmatprep.subr.bf16.mxu1 %v6228_v0 }
 0x26e   : > { %5826 = vmatpush3.bf16.msra.mxu1 %v6228_v0  ;;  %v3584_v0 = vshrl.u32 %v3519_v38, 16  ;;  %v6251_v38 = vld [vmem:[%s7511_s2 + $0x148] sm:$0xff]  }
 0x26f   : > { %5827 = vmatprep.subr.bf16.mxu1 %v6229_v36 }
 0x272   : > { %5828 = vmatpush3.bf16.msra.mxu1 %v6229_v36  ;;  %v3572_v36 = vrot.slane %v3570_v6, 4 }
 0x273   : > { %5837 = vmatprep.subr.bf16.mxu1 %v6230_v10 }
 0x275   : > { %5830 = vmatmul.mubr.bf16.vlgmr.msra.gmra.mrb[0].mxu1 %v5117_v39  ;;  %v3530_v39 = vrot.slane %v3528_v57, 4 }
 0x276   : > { %5833 = vmatprep.mubr.bf16.mxu1 %v5118_v18  ;;  %5838 = vmatpush3.bf16.msra.mxu1 %v6230_v10  ;;  %v3525_v10 = vld [vmem:[#allocation3 + $0x40] sm:$0xf]  ;;  %v3589_v18 = vrot.slane %v3587_v1, 5 }
 0x277   : > { %5839 = vmatprep.subr.bf16.mxu1 %v6231_v4  ;;  %v3534_v5 = vor.u32 %v3533_v35, %v3530_v39 }
 0x279   : > { %v3535_v25 = vrot.slane %v3534_v5, 4  ;;  %v3563_v5 = vrot.slane %v3562_v56, 4  ;;  %v6257_v56 = vld [vmem:[%s7511_s2 + $0x178] sm:$0xff]  }
 0x27a   : > { %5840 = vmatpush3.bf16.msra.mxu1 %v6231_v4  ;;  %v3586_v4 = vrot.slane %v3584_v0, 4  ;;  %v3823_v0 = vrot.slane %v7254_v7, 5 }
 0x27b   : > { %5841 = vmatprep.subr.bf16.mxu1 %v6232_v30  ;;  %v3540_v26 = vsel %vm6451_vm9, %v3535_v25, %v3539_v27 }
 0x27c   : > { %v3590_v61 = vor.u32 %v3589_v18, %v3586_v4 }
 0x27d   : > { %5834 = vmatmul.mubr.bf16.gmra.mrb[4].mxu1 %v5119_v34  ;;  %v3549_v34 = vrot.slane %v3548_v50, 4 }
 0x27e   : > { %5842 = vmatpush3.bf16.msra.mxu1 %v6232_v30  ;;  %5853 = vmatprep.mubr.bf16.mxu1 %v6233_v52  ;;  %v3523_v30 = vld [vmem:[#allocation3 + $0x38] sm:$0xf]  ;;  %v7284_v52 = vld [vmem:[#allocation3 + $0x34] sm:$0x1] }
 0x27f   : > { %5843 = vmatprep.subr.bf16.mxu1 %v6234_v47  ;;  %v3554_v17 = vsel %vm6451_vm9, %v3549_v34, %v3553_v8  ;;  %v3615_v57 = vshll.u32 %v3523_v30, 16  ;;  %v3607_v62 = vshll.u32 %v7284_v52, 16  ;;  %v6250_v34 = vld [vmem:[%s7511_s2 + $0x140] sm:$0xff]   ;;  %v7300_v8 = vld [vmem:[#allocation3 + $0x44] sm:$0x1] }
 0x280   : > { %v5172_v19 = vcombine.low %v3540_v26, %v3554_v17 }
 0x281   : > { %v3617_v24 = vrot.slane %v3615_v57, 5  ;;  %v3609_v25 = vrot.slane %v3607_v62, 5  ;;  %v3831_v57 = vrot.slane %v7282_v45, 5  ;;  %v3839_v62 = vrot.slane %v7284_v52, 5 }
 0x282   : > { %5844 = vmatpush3.bf16.msra.mxu1 %v6234_v47  ;;  %v3576_v47 = vor.u32 %v3575_v33, %v3572_v36  ;;  %v6252_v33 = vld [vmem:[%s7511_s2 + $0x150] sm:$0xff]  }
 0x283   : > { %5845 = vmatprep.subr.bf16.mxu1 %v6235_v53 }
 0x284   : > { %v3577_v39 = vrot.slane %v3576_v47, 4  ;;  %v6255_v47 = vld [vmem:[%s7511_s2 + $0x168] sm:$0xff]  }
 0x286   : > { %5846 = vmatpush3.bf16.msra.mxu1 %v6235_v53  ;;  %v3626_v53 = vshrl.u32 %v3525_v10, 16  ;;  %v3582_v17 = vsel %vm6451_vm9, %v3577_v39, %v3581_v9  ;;  %v3827_v39 = vrot.slane %v7286_v55, 5 }
 0x287   : > { %5847 = vmatprep.subr.bf16.mxu1 %v6236_v54 }
 0x288   : > { %v3628_v35 = vrot.slane %v3626_v53, 4  ;;  %v6256_v53 = vld [vmem:[%s7511_s2 + $0x170] sm:$0xff]  }
 0x28a   : > { %5848 = vmatpush3.bf16.msra.mxu1 %v6236_v54  ;;  %v3629_v54 = vshll.u32 %v3525_v10, 16 }
 0x28b   : > { %5849 = vmatprep.subr.bf16.mxu1 %v6237_v23 }
 0x28c   : > { %v3631_v50 = vrot.slane %v3629_v54, 5  ;;  %v3796_v54 = vld [vmem:[#allocation3 + $0x20] sm:$0xe] }
 0x28e   : > { %5850 = vmatpush3.bf16.msra.mxu1 %v6237_v23  ;;  %v3604_v23 = vor.u32 %v3603_v48, %v3600_v37  ;;  %v5184_v37 = vrot.slane %v3793_v21, 9  ;;  %v3819_v48 = vrot.slane %v7256_v20, 5  ;;  %v6253_v20 = vld [vmem:[%s7511_s2 + $0x158] sm:$0xff]  }
 0x28f   : > { %5851 = vmatprep.subr.bf16.mxu1 %v6238_v14 }
 0x290   : > { %v3820_v4 = vsel %vm6545_vm12, %v5184_v37, %v3819_v48  ;;  %v7392_v48 = vld [vmem:[#allocation3 + $0x1c] sm:$0x1] }
 0x292   : > { %5852 = vmatpush3.bf16.msra.mxu1 %v6238_v14  ;;  %v3612_v14 = vshrl.u32 %v3523_v30, 16  ;;  %v6254_v30 = vld [vmem:[%s7511_s2 + $0x160] sm:$0xff]  }
 0x293   : > { %5861 = vmatprep.subr.bf16.mxu1 %v6240_v63 }
 0x295   : > { %5854 = vmatmul.mubr.bf16.vlgmr.msra.gmra.mrb[0].mxu1 %v6239_v28  ;;  %v3593_v28 = vshll.u32 %v7289_v46, 16 }
 0x296   : > { %5857 = vmatprep.mubr.bf16.mxu1 %v6241_v13  ;;  %5862 = vmatpush3.bf16.msra.mxu1 %v6240_v63  ;;  %v3565_v63 = vshll.u32 %v7286_v55, 16  ;;  %v3614_v13 = vrot.slane %v3612_v14, 4  ;;  %v5187_v14 = vrot.slane %v3796_v54, 9 }
 0x297   : > { %5863 = vmatprep.subr.bf16.mxu1 %v6242_v2  ;;  %v3595_v26 = vrot.slane %v3593_v28, 5  ;;  %v3835_v28 = vrot.slane %v7289_v46, 5  ;;  %v6259_v46 = vld [vmem:[%s7511_s2 + $0x188] sm:$0xff]  }
 0x298   : > { %v3567_v27 = vrot.slane %v3565_v63, 5  ;;  %v3618_v29 = vor.u32 %v3617_v24, %v3614_v13  ;;  %v5186_v63 = vrot.slane %v3795_v44, 9  ;;  %v3799_v13 = vld [vmem:[#allocation3 + $0x38] sm:$0xe]  ;;  %v6273_v44 = vld [vmem:[%s7511_s2 + $0x1d8] sm:$0xff]  }
 0x29a   : > { %5864 = vmatpush3.bf16.msra.mxu1 %v6242_v2  ;;  %v3605_v2 = vrot.slane %v3604_v23, 4  ;;  %v3568_v15 = vsel %vm6451_vm9, %v3563_v5, %v3567_v27  ;;  %v3619_v1 = vrot.slane %v3618_v29, 4  ;;  %v3798_v23 = vld [vmem:[#allocation3 + $0x30] sm:$0xe]  ;;  %v3800_v5 = vld [vmem:[#allocation3 + $0x40] sm:$0xe]  ;;  %v3828_v52 = vsel %vm6545_vm12, %v5186_v63, %v3827_v39 }
 0x29b   : > { %5865 = vmatprep.subr.bf16.mxu1 %v6244_v51  ;;  %v5173_v6 = vcombine.low %v3568_v15, %v3582_v17  ;;  %v6260_v17 = vld [vmem:[%s7511_s2 + $0x190] sm:$0xff]   ;;  %v6261_v15 = vld [vmem:[#allocation3 + $0x10] ss:$8 sps:$4 sm:$0xff]  }
 0x29c   : > { %v6264_v29 = vld [vmem:[%s7511_s2 + $0x1a8] sm:$0xff]  }
 0x29d   : > { %5858 = vmatmul.mubr.bf16.gmra.mrb[4].mxu1 %v6243_v11  ;;  %v3632_v11 = vor.u32 %v3631_v50, %v3628_v35  ;;  %v6258_v35 = vld [vmem:[%s7511_s2 + $0x180] sm:$0xff]  }
 0x29e   : > { %5866 = vmatpush3.bf16.msra.mxu1 %v6244_v51  ;;  %5877 = vmatprep.mubr.bf16.mxu1 %v5172_v19  ;;  %v3591_v51 = vrot.slane %v3590_v61, 4  ;;  %v7306_v19 = vld [vmem:[#allocation3 + $0x3c] sm:$0x1]  ;;  %v5189_v61 = vrot.slane %v3798_v23, 9  ;;  %v6271_v23 = vld [vmem:[#allocation3 + $0x40] ss:$8 sps:$4 sm:$0xff]  }
 0x29f   : > { %5867 = vmatprep.subr.bf16.mxu1 %v6245_v60  ;;  %v3621_v22 = vshll.u32 %v7306_v19, 16  ;;  %v3633_v49 = vrot.slane %v3632_v11, 4  ;;  %v3843_v27 = vrot.slane %v7306_v19, 5  ;;  %v6263_v19 = vld [vmem:[%s7511_s2 + $0x1a0] sm:$0xff]  }
 0x2a0   : > { %v3596_v59 = vsel %vm6451_vm9, %v3591_v51, %v3595_v26  ;;  %v3840_v45 = vsel %vm6545_vm12, %v5189_v61, %v3839_v62  ;;  %v3847_v51 = vrot.slane %v7300_v8, 5  ;;  %v6274_v61 = vld [vmem:[%s7511_s2 + $0x1e0] sm:$0xff]   ;;  %v4178_v62 = vld [vmem:[#allocation3 + $0x20] sm:$0xf] }
 0x2a1   : > { %v3623_v10 = vrot.slane %v3621_v22, 5 }
 0x2a2   : > { %5868 = vmatpush3.bf16.msra.mxu1 %v6245_v60  ;;  %v3610_v60 = vsel %vm6451_vm9, %v3605_v2, %v3609_v25  ;;  %v3832_v2 = vsel %vm6545_vm12, %v5187_v14, %v3831_v57  ;;  %v5190_v25 = vrot.slane %v3799_v13, 9  ;;  %v4180_v57 = vld [vmem:[#allocation3 + $0x28] sm:$0xf] }
 0x2a3   : > { %5869 = vmatprep.subr.bf16.mxu1 %v6246_v31  ;;  %v5174_v16 = vcombine.low %v3596_v59, %v3610_v60  ;;  %v3624_v7 = vsel %vm6451_vm9, %v3619_v1, %v3623_v10  ;;  %v5209_v55 = vcombine.low %v3828_v52, %v3832_v2  ;;  %v6267_v10 = vld [vmem:[#allocation3 + $0x20] ss:$8 sps:$4 sm:$0xff]   ;;  %v4233_v63 = vshrl.u32 %v4180_v57, 16 }
 0x2a4   : > { %v3844_v26 = vsel %vm6545_vm12, %v5190_v25, %v3843_v27  ;;  %v4236_v39 = vshll.u32 %v4180_v57, 16  ;;  %v4219_v2 = vshrl.u32 %v4178_v62, 16 }
 0x2a6   : > { %5870 = vmatpush3.bf16.msra.mxu1 %v6246_v31  ;;  %v3635_v31 = vshll.u32 %v7300_v8, 16  ;;  %v6262_v8 = vld [vmem:[%s7511_s2 + $0x198] sm:$0xff]   ;;  %v4238_v13 = vrot.slane %v4236_v39, 5  ;;  %v4221_v25 = vrot.slane %v4219_v2, 4 }
 0x2a7   : > { %5871 = vmatprep.subr.bf16.mxu1 %v6247_v40 }
 0x2a8   : > { %v3637_v36 = vrot.slane %v3635_v31, 5  ;;  %v4174_v31 = vld [vmem:[#allocation3 + $0x10] sm:$0xf] }
 0x2a9   : > { %v4191_v59 = vshrl.u32 %v4174_v31, 16 }
 0x2aa   : > { %5872 = vmatpush3.bf16.msra.mxu1 %v6247_v40  ;;  %v5185_v40 = vrot.slane %v3794_v32, 9  ;;  %v6265_v32 = vld [vmem:[%s7511_s2 + $0x1b0] sm:$0xff]  }
 0x2ab   : > { %5873 = vmatprep.subr.bf16.mxu1 %v6248_v41  ;;  %v4193_v21 = vrot.slane %v4191_v59, 4 }
 0x2ac   : > { %v3824_v42 = vsel %vm6545_vm12, %v5185_v40, %v3823_v0  ;;  %v6268_v0 = vld [vmem:[%s7511_s2 + $0x1c0] sm:$0xff]  }
 0x2ad   : > { %v5208_v18 = vcombine.low %v3820_v4, %v3824_v42 }
 0x2ae   : > { %5874 = vmatpush3.bf16.msra.mxu1 %v6248_v41  ;;  %v3638_v41 = vsel %vm6451_vm9, %v3633_v49, %v3637_v36 }
 0x2af   : > { %5875 = vmatprep.subr.bf16.mxu1 %v6249_v3  ;;  %v5175_v43 = vcombine.low %v3624_v7, %v3638_v41  ;;  %v6270_v41 = vld [vmem:[%s7511_s2 + $0x1c8] sm:$0xff]  }
 0x2b2   : > { %5876 = vmatpush3.bf16.msra.mxu1 %v6249_v3  ;;  %v3797_v3 = vld [vmem:[#allocation3 + $0x28] sm:$0xe] }
 0x2b3   : > { %5885 = vmatprep.subr.bf16.mxu1 %v6250_v34  ;;  %v5188_v50 = vrot.slane %v3797_v3, 9  ;;  %v4182_v3 = vld [vmem:[#allocation3 + $0x30] sm:$0xf] }
 0x2b5   : > { %5878 = vmatmul.mubr.bf16.vlgmr.msra.gmra.mrb[0].mxu1 %v5173_v6  ;;  %v3836_v9 = vsel %vm6545_vm12, %v5188_v50, %v3835_v28  ;;  %v4176_v6 = vld [vmem:[#allocation3 + $0x18] sm:$0xf]  ;;  %v4247_v50 = vshrl.u32 %v4182_v3, 16  ;;  %v4250_v28 = vshll.u32 %v4182_v3, 16 }
 0x2b6   : > { %5881 = vmatprep.mubr.bf16.mxu1 %v5174_v16  ;;  %5886 = vmatpush3.bf16.msra.mxu1 %v6250_v34  ;;  %v5210_v24 = vcombine.low %v3836_v9, %v3840_v45  ;;  %v5191_v34 = vrot.slane %v3800_v5, 9  ;;  %v6266_v16 = vld [vmem:[%s7511_s2 + $0x1b8] sm:$0xff]   ;;  %v4205_v22 = vshrl.u32 %v4176_v6, 16  ;;  %v4208_v49 = vshll.u32 %v4176_v6, 16  ;;  %v6275_v5 = vld [vmem:[%s7511_s2 + $0x1e8] sm:$0xff]  }
 0x2b7   : > { %5887 = vmatprep.subr.bf16.mxu1 %v6251_v38  ;;  %v4222_v45 = vshll.u32 %v4178_v62, 16  ;;  %v4188_v9 = vld [vmem:[#allocation3 + $0x48] sm:$0xf]  ;;  %v7422_v6 = vld [vmem:[#allocation3 + $0x24] sm:$0x1] }
 0x2b8   : > { %v3848_v11 = vsel %vm6545_vm12, %v5191_v34, %v3847_v51  ;;  %v4207_v1 = vrot.slane %v4205_v22, 4  ;;  %v4210_v36 = vrot.slane %v4208_v49, 5  ;;  %v4252_v34 = vrot.slane %v4250_v28, 5  ;;  %v4186_v51 = vld [vmem:[#allocation3 + $0x40] sm:$0xf]  ;;  %v6277_v49 = vld [vmem:[%s7511_s2 + $0x1f8] sm:$0xff]  }
 0x2b9   : > { %v5211_v60 = vcombine.low %v3844_v26, %v3848_v11  ;;  %v4224_v27 = vrot.slane %v4222_v45, 5  ;;  %v6276_v11 = vld [vmem:[%s7511_s2 + $0x1f0] sm:$0xff]   ;;  %v7418_v26 = vld [vmem:[#allocation3 + $0x2c] sm:$0x1]  ;;  %v7425_v22 = vld [vmem:[#allocation3 + $0x3c] sm:$0x1] }
 0x2ba   : > { %5888 = vmatpush3.bf16.msra.mxu1 %v6251_v38  ;;  %v4194_v38 = vshll.u32 %v4174_v31, 16  ;;  %v4211_v7 = vor.u32 %v4210_v36, %v4207_v1  ;;  %v4275_v31 = vshrl.u32 %v4186_v51, 16  ;;  %v4228_v36 = vshll.u32 %v7422_v6, 16 }
 0x2bb   : > { %5889 = vmatprep.subr.bf16.mxu1 %v6252_v33 }
 0x2bc   : > { %v4196_v40 = vrot.slane %v4194_v38, 5  ;;  %v4225_v38 = vor.u32 %v4224_v27, %v4221_v25 }
 0x2bd   : > { %5882 = vmatmul.mubr.bf16.gmra.mrb[4].mxu1 %v5175_v43  ;;  %v6269_v43 = vld [vmem:[#allocation3 + $0x30] ss:$8 sps:$4 sm:$0xff]  }
 0x2be   : > { %5890 = vmatpush3.bf16.msra.mxu1 %v6252_v33  ;;  %5901 = vmatprep.mubr.bf16.mxu1 %v5208_v18  ;;  %v7390_v33 = vld [vmem:[#allocation3 + $0x14] sm:$0x1]  ;;  %v4197_v37 = vor.u32 %v4196_v40, %v4193_v21  ;;  %v6272_v18 = vld [vmem:[%s7511_s2 + $0x1d0] sm:$0xff]  }
 0x2bf   : > { %5891 = vmatprep.subr.bf16.mxu1 %v6253_v20  ;;  %v4200_v42 = vshll.u32 %v7390_v33, 16 }
 0x2c0   : > { %v4198_v4 = vrot.slane %v4197_v37, 4 }
 0x2c2   : > { %5892 = vmatpush3.bf16.msra.mxu1 %v6253_v20  ;;  %v4214_v20 = vshll.u32 %v7392_v48, 16 }
 0x2c3   : > { %5893 = vmatprep.subr.bf16.mxu1 %v6254_v30 }
 0x2c4   : > { %v4216_v54 = vrot.slane %v4214_v20, 5  ;;  %v7433_v20 = vld [vmem:[#allocation3 + $0x4c] sm:$0x1] }
 0x2c6   : > { %5894 = vmatpush3.bf16.msra.mxu1 %v6254_v30  ;;  %v4202_v30 = vrot.slane %v4200_v42, 5 }
 0x2c7   : > { %5895 = vmatprep.subr.bf16.mxu1 %v6255_v47 }
 0x2ca   : > { %5896 = vmatpush3.bf16.msra.mxu1 %v6255_v47  ;;  %v4212_v47 = vrot.slane %v4211_v7, 4  ;;  %v4270_v7 = vshll.u32 %v7425_v22, 16 }
 0x2cb   : > { %5897 = vmatprep.subr.bf16.mxu1 %v6256_v53 }
 0x2cc   : > { %v4272_v3 = vrot.slane %v4270_v7, 5 }
 0x2ce   : > { %5898 = vmatpush3.bf16.msra.mxu1 %v6256_v53  ;;  %v4203_v53 = vsel %vm6451_vm9, %v4198_v4, %v4202_v30 }
 0x2cf   : > { %5899 = vmatprep.subr.bf16.mxu1 %v6257_v56 }
 0x2d2   : > { %5900 = vmatpush3.bf16.msra.mxu1 %v6257_v56  ;;  %v4217_v56 = vsel %vm6451_vm9, %v4212_v47, %v4216_v54 }
 0x2d3   : > { %5909 = vmatprep.subr.bf16.mxu1 %v6258_v35  ;;  %v5264_v14 = vcombine.low %v4203_v53, %v4217_v56  ;;  %v7438_v53 = vld [vmem:[#allocation3 + $0x44] sm:$0x1] }
 0x2d4   : > { %v4284_v62 = vshll.u32 %v7438_v53, 16 }
 0x2d5   : > { %5902 = vmatmul.mubr.bf16.vlgmr.msra.gmra.mrb[0].mxu1 %v5209_v55 }
 0x2d6   : > { %5905 = vmatprep.mubr.bf16.mxu1 %v5210_v24  ;;  %5910 = vmatpush3.bf16.msra.mxu1 %v6258_v35  ;;  %v4184_v35 = vld [vmem:[#allocation3 + $0x38] sm:$0xf]  ;;  %v4249_v24 = vrot.slane %v4247_v50, 4 }
 0x2d7   : > { %5911 = vmatprep.subr.bf16.mxu1 %v6259_v46  ;;  %v4261_v52 = vshrl.u32 %v4184_v35, 16  ;;  %v4264_v55 = vshll.u32 %v4184_v35, 16  ;;  %v6279_v50 = vld [vmem:[%s7511_s2 + $0x208] sm:$0xff]  }
 0x2d8   : > { %v4253_v59 = vor.u32 %v4252_v34, %v4249_v24  ;;  %v4486_v34 = vrot.slane %v7392_v48, 5 }
 0x2da   : > { %5912 = vmatpush3.bf16.msra.mxu1 %v6259_v46  ;;  %v4235_v46 = vrot.slane %v4233_v63, 4  ;;  %v4254_v42 = vrot.slane %v4253_v59, 4  ;;  %v4456_v63 = vld [vmem:[#allocation3 + $0x10] sm:$0xe] }
 0x2db   : > { %5913 = vmatprep.subr.bf16.mxu1 %v6260_v17 }
 0x2dd   : > { %5906 = vmatmul.mubr.bf16.gmra.mrb[4].mxu1 %v5211_v60  ;;  %v4263_v60 = vrot.slane %v4261_v52, 4  ;;  %v4457_v52 = vld [vmem:[#allocation3 + $0x18] sm:$0xe] }
 0x2de   : > { %5914 = vmatpush3.bf16.msra.mxu1 %v6260_v17  ;;  %5925 = vmatprep.mubr.bf16.mxu1 %v6261_v15  ;;  %v4289_v17 = vshrl.u32 %v4188_v9, 16  ;;  %v4292_v15 = vshll.u32 %v4188_v9, 16  ;;  %v4482_v9 = vrot.slane %v7390_v33, 5  ;;  %v5277_v24 = vrot.slane %v4457_v52, 9 }
 0x2df   : > { %5915 = vmatprep.subr.bf16.mxu1 %v6262_v8 }
 0x2e0   : > { %v4294_v1 = vrot.slane %v4292_v15, 5  ;;  %v4459_v15 = vld [vmem:[#allocation3 + $0x28] sm:$0xe] }
 0x2e1   : > { %v5279_v59 = vrot.slane %v4459_v15, 9 }
 0x2e2   : > { %5916 = vmatpush3.bf16.msra.mxu1 %v6262_v8  ;;  %v4266_v8 = vrot.slane %v4264_v55, 5  ;;  %v5276_v55 = vrot.slane %v4456_v63, 9 }
 0x2e3   : > { %5917 = vmatprep.subr.bf16.mxu1 %v6263_v19 }
 0x2e4   : > { %v4267_v40 = vor.u32 %v4266_v8, %v4263_v60  ;;  %v4483_v33 = vsel %vm6545_vm12, %v5276_v55, %v4482_v9  ;;  %v6283_v60 = vld [vmem:[%s7511_s2 + $0x228] sm:$0xff]   ;;  %v6284_v8 = vld [vmem:[%s7511_s2 + $0x230] sm:$0xff]  }
 0x2e6   : > { %5918 = vmatpush3.bf16.msra.mxu1 %v6263_v19  ;;  %v4239_v19 = vor.u32 %v4238_v13, %v4235_v46  ;;  %v4268_v47 = vrot.slane %v4267_v40, 4  ;;  %v4286_v46 = vrot.slane %v4284_v62, 5  ;;  %v6280_v13 = vld [vmem:[%s7511_s2 + $0x210] sm:$0xff]  }
 0x2e7   : > { %5919 = vmatprep.subr.bf16.mxu1 %v6264_v29 }
 0x2e8   : > { %v4240_v37 = vrot.slane %v4239_v19, 4  ;;  %v4273_v35 = vsel %vm6451_vm9, %v4268_v47, %v4272_v3  ;;  %v4460_v19 = vld [vmem:[#allocation3 + $0x30] sm:$0xe] }
 0x2ea   : > { %5920 = vmatpush3.bf16.msra.mxu1 %v6264_v29  ;;  %v7420_v29 = vld [vmem:[#allocation3 + $0x34] sm:$0x1] }
 0x2eb   : > { %5921 = vmatprep.subr.bf16.mxu1 %v6265_v32  ;;  %v4256_v21 = vshll.u32 %v7420_v29, 16 }
 0x2ed   : > { %v4258_v30 = vrot.slane %v4256_v21, 5  ;;  %v4498_v21 = vrot.slane %v7420_v29, 5 }
 0x2ee   : > { %5922 = vmatpush3.bf16.msra.mxu1 %v6265_v32  ;;  %v4278_v32 = vshll.u32 %v4186_v51, 16 }
 0x2ef   : > { %5923 = vmatprep.subr.bf16.mxu1 %v6266_v16  ;;  %v4259_v57 = vsel %vm6451_vm9, %v4254_v42, %v4258_v30 }
 0x2f0   : > { %v5266_v28 = vcombine.low %v4259_v57, %v4273_v35 }
 0x2f2   : > { %5924 = vmatpush3.bf16.msra.mxu1 %v6266_v16  ;;  %v4242_v16 = vshll.u32 %v7418_v26, 16 }
 0x2f3   : > { %5933 = vmatprep.subr.bf16.mxu1 %v6268_v0 }
 0x2f4   : > { %v4244_v4 = vrot.slane %v4242_v16, 5  ;;  %v4461_v16 = vld [vmem:[#allocation3 + $0x38] sm:$0xe] }
 0x2f5   : > { %5926 = vmatmul.mubr.bf16.vlgmr.msra.gmra.mrb[0].mxu1 %v6267_v10  ;;  %v4277_v10 = vrot.slane %v4275_v31, 4  ;;  %v6285_v31 = vld [vmem:[%s7511_s2 + $0x238] sm:$0xff]  }
 0x2f6   : > { %5929 = vmatprep.mubr.bf16.mxu1 %v6269_v43  ;;  %5934 = vmatpush3.bf16.msra.mxu1 %v6268_v0  ;;  %v4291_v0 = vrot.slane %v4289_v17, 4  ;;  %v4226_v43 = vrot.slane %v4225_v38, 4  ;;  %v4245_v56 = vsel %vm6451_vm9, %v4240_v37, %v4244_v4  ;;  %v4487_v17 = vsel %vm6545_vm12, %v5277_v24, %v4486_v34 }
 0x2f7   : > { %5935 = vmatprep.subr.bf16.mxu1 %v6270_v41  ;;  %v5300_v48 = vcombine.low %v4483_v33, %v4487_v17  ;;  %v4494_v38 = vrot.slane %v7418_v26, 5  ;;  %v4462_v26 = vld [vmem:[#allocation3 + $0x40] sm:$0xe]  ;;  %v4506_v4 = vrot.slane %v7438_v53, 5 }
 0x2f8   : > { %v4295_v54 = vor.u32 %v4294_v1, %v4291_v0  ;;  %v4490_v0 = vrot.slane %v7422_v6, 5  ;;  %v5281_v1 = vrot.slane %v4461_v16, 9 }
 0x2f9   : > { %v4495_v37 = vsel %vm6545_vm12, %v5279_v59, %v4494_v38 }
 0x2fa   : > { %5936 = vmatpush3.bf16.msra.mxu1 %v6270_v41  ;;  %v4280_v41 = vrot.slane %v4278_v32, 5  ;;  %v4296_v45 = vrot.slane %v4295_v54, 4  ;;  %v4458_v32 = vld [vmem:[#allocation3 + $0x20] sm:$0xe] }
 0x2fb   : > { %5937 = vmatprep.subr.bf16.mxu1 %v6272_v18  ;;  %v5278_v40 = vrot.slane %v4458_v32, 9 }
 0x2fd   : > { %5930 = vmatmul.mubr.bf16.gmra.mrb[4].mxu1 %v6271_v23  ;;  %v4230_v23 = vrot.slane %v4228_v36, 5  ;;  %v4502_v36 = vrot.slane %v7425_v22, 5  ;;  %v4491_v29 = vsel %vm6545_vm12, %v5278_v40, %v4490_v0  ;;  %v5282_v22 = vrot.slane %v4462_v26, 9 }
 0x2fe   : > { %5938 = vmatpush3.bf16.msra.mxu1 %v6272_v18  ;;  %5949 = vmatprep.mubr.bf16.mxu1 %v5264_v14  ;;  %v6278_v18 = vld [vmem:[%s7511_s2 + $0x200] sm:$0xff]   ;;  %v4298_v14 = vshll.u32 %v7433_v20, 16  ;;  %v5301_v42 = vcombine.low %v4491_v29, %v4495_v37 }
 0x2ff   : > { %5939 = vmatprep.subr.bf16.mxu1 %v6273_v44  ;;  %v4503_v6 = vsel %vm6545_vm12, %v5281_v1, %v4502_v36  ;;  %v4507_v30 = vsel %vm6545_vm12, %v5282_v22, %v4506_v4 }
 0x302   : > { %5940 = vmatpush3.bf16.msra.mxu1 %v6273_v44  ;;  %v4281_v44 = vor.u32 %v4280_v41, %v4277_v10  ;;  %v4463_v10 = vld [vmem:[#allocation3 + $0x48] sm:$0xe] }
 0x303   : > { %5941 = vmatprep.subr.bf16.mxu1 %v6274_v61  ;;  %v5283_v7 = vrot.slane %v4463_v10, 9 }
 0x304   : > { %v4282_v2 = vrot.slane %v4281_v44, 4 }
 0x306   : > { %5942 = vmatpush3.bf16.msra.mxu1 %v6274_v61  ;;  %v4231_v61 = vsel %vm6451_vm9, %v4226_v43, %v4230_v23  ;;  %v4287_v51 = vsel %vm6451_vm9, %v4282_v2, %v4286_v46  ;;  %v5312_v23 = vld [vmem:[%s7512_s3 + $0x1] ss:$0 sm:$0xff] }
 0x307   : > { %5943 = vmatprep.subr.bf16.mxu1 %v6275_v5  ;;  %v5265_v39 = vcombine.low %v4231_v61, %v4245_v56 }
 0x30a   : > { %5944 = vmatpush3.bf16.msra.mxu1 %v6275_v5  ;;  %v4300_v5 = vrot.slane %v4298_v14, 5 }
 0x30b   : > { %5945 = vmatprep.subr.bf16.mxu1 %v6276_v11 }
 0x30c   : > { %v4301_v25 = vsel %vm6451_vm9, %v4296_v45, %v4300_v5 }
 0x30d   : > { %v5267_v27 = vcombine.low %v4287_v51, %v4301_v25 }
 0x30e   : > { %5946 = vmatpush3.bf16.msra.mxu1 %v6276_v11  ;;  %v6281_v11 = vld [vmem:[%s7511_s2 + $0x218] sm:$0xff]  }
 0x30f   : > { %5947 = vmatprep.subr.bf16.mxu1 %v6277_v49 }
 0x312   : > { %5948 = vmatpush3.bf16.msra.mxu1 %v6277_v49  ;;  %v5280_v49 = vrot.slane %v4460_v19, 9 }
 0x313   : > { %5957 = vmatprep.subr.bf16.mxu1 %v6278_v18 }
 0x314   : > { %v4499_v41 = vsel %vm6545_vm12, %v5280_v49, %v4498_v21 }
 0x315   : > { %5950 = vmatmul.mubr.bf16.vlgmr.msra.gmra.mrb[0].mxu1 %v5265_v39  ;;  %v5302_v43 = vcombine.low %v4499_v41, %v4503_v6 }
 0x316   : > { %5953 = vmatprep.mubr.bf16.mxu1 %v5266_v28  ;;  %5958 = vmatpush3.bf16.msra.mxu1 %v6278_v18  ;;  %v4510_v18 = vrot.slane %v7433_v20, 5 }
 0x317   : > { %5959 = vmatprep.subr.bf16.mxu1 %v6279_v50 }
 0x318   : > { %v4511_v47 = vsel %vm6545_vm12, %v5283_v7, %v4510_v18 }
 0x319   : > { %v5303_v54 = vcombine.low %v4507_v30, %v4511_v47 }
 0x31a   : > { %5960 = vmatpush3.bf16.msra.mxu1 %v6279_v50 }
 0x31b   : > { %5961 = vmatprep.subr.bf16.mxu1 %v6280_v13 }
 0x31d   : > { %5954 = vmatmul.mubr.bf16.gmra.mrb[4].mxu1 %v5267_v27 }
 0x31e   : > { %5962 = vmatpush3.bf16.msra.mxu1 %v6280_v13  ;;  %5973 = vmatprep.mubr.bf16.mxu1 %v5300_v48 }
 0x31f   : > { %5963 = vmatprep.subr.bf16.mxu1 %v6281_v11 }
 0x322   : > { %5964 = vmatpush3.bf16.msra.mxu1 %v6281_v11 }
 0x323   : > { %5965 = vmatprep.subr.bf16.mxu1 %v6282_v58 }
 0x326   : > { %5966 = vmatpush3.bf16.msra.mxu1 %v6282_v58 }
 0x327   : > { %5967 = vmatprep.subr.bf16.mxu1 %v6283_v60 }
 0x32a   : > { %5968 = vmatpush3.bf16.msra.mxu1 %v6283_v60 }
 0x32b   : > { %5969 = vmatprep.subr.bf16.mxu1 %v6284_v8 }
 0x32e   : > { %5970 = vmatpush3.bf16.msra.mxu1 %v6284_v8 }
 0x32f   : > { %5971 = vmatprep.subr.bf16.mxu1 %v6285_v31 }
 0x332   : > { %5972 = vmatpush3.bf16.msra.mxu1 %v6285_v31 }
 0x335   : > { %5974 = vmatmul.mubr.bf16.vlgmr.msra.gmra.mrb[0].mxu1 %v5301_v42 }
 0x336   : > { %5977 = vmatprep.mubr.bf16.mxu1 %v5302_v43 }
 0x33d   : > { %5978 = vmatmul.mubr.bf16.gmra.mrb[4].mxu1 %v5303_v54 }
 0x408   : > { %v5975_v56 = vpop.f32.mrb[0].mxu1 }
 0x409   : > { %v4673_v44 = vadd.f32 %v5975_v56, %v5312_v23  ;;  %v4627_v53 = vpop.f32.mrb[1].mxu1 }
 0x40a   : > { %v4671_v20 = vadd.f32 %v5312_v23, %v4627_v53  ;;  %v5976_v14 = vpop.f32.mrb[2].mxu1 }
 0x40b   : > { %v4681_v57 = vmax.f32 %v4673_v44, 0.0  ;;  %v4674_v3 = vadd.f32 %v5976_v14, %v5312_v23  ;;  %v4630_v12 = vpop.f32.mrb[3].mxu1 }
 0x40c   : > { %v4679_v61 = vmax.f32 %v4671_v20, 0.0  ;;  %v4672_v62 = vadd.f32 %v5312_v23, %v4630_v12 }
 0x40d   : > { %4689 = vst [vmem:[%s197_s29 + $0x10] sm:$0xff] %v4681_v57  ;;  %v4682_v63 = vmax.f32 %v4674_v3, 0.0 }
 0x40e   : > { %4687 = vst [vmem:[%s197_s29] sm:$0xff] %v4679_v61  ;;  %v4680_v39 = vmax.f32 %v4672_v62, 0.0 }
 0x40f   : > { %4690 = vst [vmem:[%s197_s29 + $0x18] sm:$0xff] %v4682_v63 }
 0x410   : > { %4688 = vst [vmem:[%s197_s29 + $0x8] sm:$0xff] %v4680_v39  ;;  %v5979_v35 = vpop.f32.mrb[4].mxu1 }
 0x411   : > { %v4677_v50 = vadd.f32 %v5979_v35, %v5312_v23  ;;  %v4643_v28 = vpop.f32.mrb[5].mxu1 }
 0x412   : > { %v4675_v2 = vadd.f32 %v5312_v23, %v4643_v28  ;;  %v5980_v45 = vpop.f32.mrb[6].mxu1 }
 0x413   : > { %v4685_v5 = vmax.f32 %v4677_v50, 0.0  ;;  %v4678_v52 = vadd.f32 %v5980_v45, %v5312_v23  ;;  %v4646_v55 = vpop.f32.mrb[7].mxu1 }
 0x414   : > { %v4683_v9 = vmax.f32 %v4675_v2, 0.0  ;;  %v4676_v46 = vadd.f32 %v5312_v23, %v4646_v55 }
 0x415   : > { %4693 = vst [vmem:[%s197_s29 + $0x30] sm:$0xff] %v4685_v5  ;;  %v4686_v13 = vmax.f32 %v4678_v52, 0.0 }
 0x416   : > { %4691 = vst [vmem:[%s197_s29 + $0x20] sm:$0xff] %v4683_v9  ;;  %v4684_v24 = vmax.f32 %v4676_v46, 0.0 }
 0x417   : > { %4694 = vst [vmem:[%s197_s29 + $0x38] sm:$0xff] %v4686_v13 }
 0x418   : > { %4692 = vst [vmem:[%s197_s29 + $0x28] sm:$0xff] %v4684_v24 }
 0x419 PF: > { %s14_s15 = sadd.s32 1, %s6292_s15  }
 0x41a   : > { %p11_p4 = scmp.ge.s32.totalorder %s14_s15, 4  }
 0x41c   :  { %13 = sbr.rel (!%p11_p4) target bundleno = 1 (0x1), region = 89 }

</bundles_post_ra>
